<compile_context>
chip_gen: v7x
topology: tpu7x:2x2x1
jax: 0.10.0
libtpu: 0.0.40
codegen_flags: <defaults>
</compile_context>

<pallas_src>
import jax
import jax.numpy as jnp
from jax.experimental import pallas as pl
from jax.experimental.pallas import tpu as pltpu

LANE = 128


def _round_up(x: int, m: int) -> int:
    return -(-x // m) * m


def _make_kernel(num_layers: int, a_pad: int, attention_dim: int):
    scale = 1.0 / (attention_dim ** 0.5)

    def kernel(*refs):
        # refs = [x, wqkv, bqkv, (W_i, b_i) * num_layers, out]
        x_ref = refs[0]
        wqkv = refs[1][...]                      # (D, 3*a_pad)  bf16
        bqkv = refs[2][...]                      # (1, 3*a_pad)  f32
        layer_refs = refs[3:-1]
        o_ref = refs[-1]

        TB, S, D = x_ref.shape
        rows = TB * S

        # Fold batch into the MXU M dimension; bf16 operands, f32 accumulation.
        x2d = x_ref[...].reshape(rows, D).astype(jnp.bfloat16)

        # Fused Q/K/V projection.  Columns are padded so the q/k/v slices fall
        # on 128-lane boundaries (free views, no relayout).
        qkv = jnp.dot(x2d, wqkv, preferred_element_type=jnp.float32) + bqkv
        qkv = qkv.astype(jnp.bfloat16)
        q = qkv[:, 0 * a_pad:1 * a_pad].reshape(TB, S, a_pad)
        k = qkv[:, 1 * a_pad:2 * a_pad].reshape(TB, S, a_pad)
        v = qkv[:, 2 * a_pad:3 * a_pad].reshape(TB, S, a_pad)

        # Attention scores: batched contraction on last dims (no explicit .T).
        # Softmax entirely in f32; exact reciprocal (EUP is otherwise idle).
        scores = jnp.einsum("bqd,bkd->bqk", q, k,
                            preferred_element_type=jnp.float32) * scale
        scores = scores - jnp.max(scores, axis=-1, keepdims=True)
        e = jnp.exp(scores)
        w = e / jnp.sum(e, axis=-1, keepdims=True)
        h = jnp.einsum("bqk,bkd->bqd", w.astype(jnp.bfloat16), v,
                       preferred_element_type=jnp.float32)     # (TB, S, a_pad)

        # MLP encoder: Linear + leaky_relu per layer, on folded rows.
        h = h.reshape(rows, a_pad)
        for i in range(num_layers):
            W = layer_refs[2 * i][...]           # bf16 (in, out)
            b = layer_refs[2 * i + 1][...]       # f32  (1, out)
            h = jnp.dot(h.astype(jnp.bfloat16), W,
                        preferred_element_type=jnp.float32) + b
            h = jnp.maximum(h, 0.01 * h)         # leaky_relu, single vmax

        o_ref[...] = h.reshape(TB, S, -1).astype(o_ref.dtype)

    return kernel


def encoder_with_attention(x, params, *, tb: int | None = None):
    """x: (B, S, input_dim) or (B, input_dim) float32. params: pre-transposed weights."""
    if x.ndim == 2:                      # mirror PyTorch `x.unsqueeze(1)`
        x = x[:, None, :]
    B, S, D = x.shape
    A = params["wq"].shape[1]
    layers = params["layers"]
    num_layers = len(layers)
    state_dim = layers[-1][0].shape[1]

    # --- Q/K/V fused weights, padded so each of q/k/v starts on a 128-lane
    #     boundary (padded columns are zero -> no effect on scores or values).
    a_pad = _round_up(max(A, LANE), LANE)

    def pad_cols(m, cols):
        return jnp.pad(m, ((0, 0), (0, cols - m.shape[1])))

    wqkv = jnp.concatenate(
        [pad_cols(params["wq"], a_pad),
         pad_cols(params["wk"], a_pad),
         pad_cols(params["wv"], a_pad)], axis=1).astype(jnp.bfloat16)
    bqkv = jnp.concatenate(
        [pad_cols(params["bq"], a_pad),
         pad_cols(params["bk"], a_pad),
         pad_cols(params["bv"], a_pad)], axis=1).astype(jnp.float32)

    # --- MLP weights: bf16 operands; first layer gets zero rows for the
    #     zero-padded attention features so the math is unchanged.
    layer_args = []
    for li, (W, b) in enumerate(layers):
        if li == 0 and W.shape[0] != a_pad:
            W = jnp.pad(W, ((0, a_pad - W.shape[0]), (0, 0)))
        layer_args += [W.astype(jnp.bfloat16), b.astype(jnp.float32)]

    # --- Grid coarsening: fat M = tb*S for the MXU, but keep >= 2 grid steps.
    if tb is None:
        tb = max(1, _round_up(256, S) // S)      # tb*S >= 256 rows
    tb = int(max(1, min(tb, B)))
    if B >= 2:
        tb = min(tb, max(1, B // 2))             # at least 2 steps for pipelining

    # --- VMEM budget math (blocks + replicated weights + in-kernel temporaries).
    weight_bytes = sum(int(a.size) * a.dtype.itemsize for a in [wqkv, bqkv] + layer_args)
    max_w = max([a_pad] + [int(W.shape[1]) for W, _ in layers])

    def vmem_est(tb_):
        rows = tb_ * S
        x_blk = tb_ * S * D * 4
        o_blk = tb_ * S * state_dim * 4
        temps = (rows * 3 * a_pad * (4 + 2)      # qkv f32 + bf16 copy
                 + 2 * tb_ * S * S * 4           # scores / softmax weights
                 + 3 * rows * max_w * 4)         # h working copies
        return 2 * (x_blk + o_blk) + 2 * weight_bytes + temps

    VMEM_WORK_BUDGET = 40 * 1024 * 1024          # fits v7x's 64 MiB with headroom
    while tb > 1 and vmem_est(tb) > VMEM_WORK_BUDGET:
        tb //= 2
    vmem_limit = int(min(48 * 1024 * 1024,       # v7x-safe; above v6e/v5e defaults
                         max(32 * 1024 * 1024, 2 * vmem_est(tb))))

    B_pad = _round_up(B, tb)
    if B_pad != B:
        x = jnp.pad(x, ((0, B_pad - B), (0, 0), (0, 0)))
    grid = (B_pad // tb,)

    kernel = _make_kernel(num_layers, a_pad, A)

    # Parameters are replicated (full-array blocks, constant index_map).
    def rep_spec(arr):
        nd = arr.ndim
        return pl.BlockSpec(arr.shape, lambda g, _nd=nd: (0,) * _nd)

    in_specs = [pl.BlockSpec((tb, S, D), lambda g: (g, 0, 0)),
                rep_spec(wqkv), rep_spec(bqkv)]
    in_specs += [rep_spec(a) for a in layer_args]

    # Output block is exactly the useful columns — no 8x writeback inflation.
    out_specs = pl.BlockSpec((tb, S, state_dim), lambda g: (g, 0, 0))
    out_shape = jax.ShapeDtypeStruct((B_pad, S, state_dim), jnp.float32)

    fn = pl.pallas_call(
        kernel,
        grid=grid,
        in_specs=in_specs,
        out_specs=out_specs,
        out_shape=out_shape,
        compiler_params=pltpu.CompilerParams(
            dimension_semantics=("parallel",),   # shard grid steps across TCs (v7x)
            vmem_limit_bytes=vmem_limit),
    )
    out = fn(x, wqkv, bqkv, *layer_args)
    return out[:B]


def _reference(x, params):
    """Plain-JAX f32 reference matching the PyTorch forward."""
    if x.ndim == 2:
        x = x[:, None, :]
    q = x @ params["wq"] + params["bq"]
    k = x @ params["wk"] + params["bk"]
    v = x @ params["wv"] + params["bv"]
    A = params["wq"].shape[1]
    scores = jnp.einsum("bqd,bkd->bqk", q, k) / (A ** 0.5)
    w = jax.nn.softmax(scores, axis=-1)
    h = jnp.einsum("bqk,bkd->bqd", w, v)
    for W, b in params["layers"]:
        h = h @ W + b
        h = jnp.where(h > 0, h, 0.01 * h)
    return h


def _init_params(key, input_dim, hidden_dim, state_dim, num_layers, attention_dim):
    keys = jax.random.split(key, 16)
    ki = iter(range(16))

    def lin(k1, k2, fan_in, fan_out):
        s = 1.0 / (fan_in ** 0.5)
        W = jax.random.uniform(k1, (fan_in, fan_out), jnp.float32, -s, s)
        b = jax.random.uniform(k2, (1, fan_out), jnp.float32, -s, s)
        return W, b

    wq, bq = lin(keys[next(ki)], keys[next(ki)], input_dim, attention_dim)
    wk, bk = lin(keys[next(ki)], keys[next(ki)], input_dim, attention_dim)
    wv, bv = lin(keys[next(ki)], keys[next(ki)], input_dim, attention_dim)

    layers = []
    if num_layers > 1:
        layers.append(lin(keys[next(ki)], keys[next(ki)], input_dim, hidden_dim))
        for _ in range(num_layers - 2):
            layers.append(lin(keys[next(ki)], keys[next(ki)], hidden_dim, hidden_dim))
        layers.append(lin(keys[next(ki)], keys[next(ki)], hidden_dim, state_dim))
    else:
        layers.append(lin(keys[next(ki)], keys[next(ki)], input_dim, state_dim))

    return {"wq": wq, "bq": bq, "wk": wk, "bk": bk, "wv": wv, "bv": bv,
            "layers": layers}


if __name__ == "__main__":
    # Module-consistent shapes (attention_dim == input_dim required by the
    # PyTorch model).  B=256 / S=8 -> auto tb=32, grid of 8 even steps, folded
    # matmul M = 256 rows per step.
    B, S = 256, 8
    input_dim, attention_dim = 32, 32
    hidden_dim, state_dim, num_layers = 32, 16, 3

    key = jax.random.PRNGKey(0)
    kx, kp = jax.random.split(key)
    x = jax.random.normal(kx, (B, S, input_dim), jnp.float32)
    params = _init_params(kp, input_dim, hidden_dim, state_dim,
                          num_layers, attention_dim)

    out = encoder_with_attention(x, params)
    out = jax.block_until_ready(out)

    ref = _reference(x, params)
    assert out.shape == (B, S, state_dim)
    # Tolerance accounts for bf16 matmul operands (f32 accumulation).
    assert jnp.allclose(out, ref, atol=5e-2, rtol=5e-2), (
        f"max err {jnp.max(jnp.abs(out - ref))}")

    print("KERNEL_OK")
</pallas_src>

<mosaic_0001>
module attributes {stable_mosaic.version = 11 : i64} {
  func.func @kernel(%arg0: i32, %arg1: memref<32x8x32xf32, #tpu.memory_space<vmem>>, %arg2: memref<32x384xbf16, #tpu.memory_space<vmem>>, %arg3: memref<1x384xf32, #tpu.memory_space<vmem>>, %arg4: memref<128x32xbf16, #tpu.memory_space<vmem>>, %arg5: memref<1x32xf32, #tpu.memory_space<vmem>>, %arg6: memref<32x32xbf16, #tpu.memory_space<vmem>>, %arg7: memref<1x32xf32, #tpu.memory_space<vmem>>, %arg8: memref<32x16xbf16, #tpu.memory_space<vmem>>, %arg9: memref<1x16xf32, #tpu.memory_space<vmem>>, %arg10: memref<32x8x16xf32, #tpu.memory_space<vmem>>) attributes {dimension_semantics = [#tpu.dimension_semantics<parallel>], iteration_bounds = array<i64: 8>, scalar_prefetch = 0 : i64, scratch_operands = 0 : i64, tpu.core_type = #tpu.core_type<tc>, window_params = [{transform_indices = @transform_0, window_bounds = array<i64: 32, 8, 32>}, {pipeline_mode = #tpu.pipeline_mode<synchronous>, transform_indices = @transform_1, window_bounds = array<i64: 32, 384>}, {pipeline_mode = #tpu.pipeline_mode<synchronous>, transform_indices = @transform_2, window_bounds = array<i64: 1, 384>}, {pipeline_mode = #tpu.pipeline_mode<synchronous>, transform_indices = @transform_3, window_bounds = array<i64: 128, 32>}, {pipeline_mode = #tpu.pipeline_mode<synchronous>, transform_indices = @transform_4, window_bounds = array<i64: 1, 32>}, {pipeline_mode = #tpu.pipeline_mode<synchronous>, transform_indices = @transform_5, window_bounds = array<i64: 32, 32>}, {pipeline_mode = #tpu.pipeline_mode<synchronous>, transform_indices = @transform_6, window_bounds = array<i64: 1, 32>}, {pipeline_mode = #tpu.pipeline_mode<synchronous>, transform_indices = @transform_7, window_bounds = array<i64: 32, 16>}, {pipeline_mode = #tpu.pipeline_mode<synchronous>, transform_indices = @transform_8, window_bounds = array<i64: 1, 16>}, {transform_indices = @transform_9, window_bounds = array<i64: 32, 8, 16>}]} {
    %c0 = arith.constant 0 : index
    %c0_0 = arith.constant 0 : index
    %0 = vector.load %arg2[%c0, %c0_0] : memref<32x384xbf16, #tpu.memory_space<vmem>>, vector<32x384xbf16>
    %c0_1 = arith.constant 0 : index
    %c0_2 = arith.constant 0 : index
    %1 = vector.load %arg3[%c0_1, %c0_2] : memref<1x384xf32, #tpu.memory_space<vmem>>, vector<1x384xf32>
    %c0_3 = arith.constant 0 : index
    %c0_4 = arith.constant 0 : index
    %c0_5 = arith.constant 0 : index
    %2 = vector.load %arg1[%c0_3, %c0_4, %c0_5] : memref<32x8x32xf32, #tpu.memory_space<vmem>>, vector<32x8x32xf32>
    %3 = vector.shape_cast %2 : vector<32x8x32xf32> to vector<256x32xf32>
    %4 = arith.truncf %3 : vector<256x32xf32> to vector<256x32xbf16>
    %cst = arith.constant dense<0.000000e+00> : vector<256x384xf32>
    %5 = tpu.matmul %4, %0, %cst {dimension_numbers = #tpu.dot_dimension_numbers<[1], [0], [0], [1], [0, 0, 1, 1], [], []>} : vector<256x32xbf16>, vector<32x384xbf16>, vector<256x384xf32> -> vector<256x384xf32>
    %6 = vector.broadcast %1 : vector<1x384xf32> to vector<256x384xf32>
    %7 = arith.addf %5, %6 : vector<256x384xf32>
    %8 = arith.truncf %7 : vector<256x384xf32> to vector<256x384xbf16>
    %9 = vector.extract_strided_slice %8 {offsets = [0, 0], sizes = [256, 128], strides = [1, 1]} : vector<256x384xbf16> to vector<256x128xbf16>
    %10 = vector.shape_cast %9 : vector<256x128xbf16> to vector<32x8x128xbf16>
    %11 = vector.extract_strided_slice %8 {offsets = [0, 128], sizes = [256, 128], strides = [1, 1]} : vector<256x384xbf16> to vector<256x128xbf16>
    %12 = vector.shape_cast %11 : vector<256x128xbf16> to vector<32x8x128xbf16>
    %13 = vector.extract_strided_slice %8 {offsets = [0, 256], sizes = [256, 128], strides = [1, 1]} : vector<256x384xbf16> to vector<256x128xbf16>
    %14 = vector.shape_cast %13 : vector<256x128xbf16> to vector<32x8x128xbf16>
    "tpu.trace_start"() <{level = 10 : i32, message = "bqd,bkd->bqk"}> : () -> ()
    %cst_6 = arith.constant dense<0.000000e+00> : vector<32x8x8xf32>
    %15 = tpu.matmul %10, %12, %cst_6 {dimension_numbers = #tpu.dot_dimension_numbers<[2], [2], [1], [1], [0, 0, 0, 1, 1, 1], [0], [0]>} : vector<32x8x128xbf16>, vector<32x8x128xbf16>, vector<32x8x8xf32> -> vector<32x8x8xf32>
    "tpu.trace_stop"() : () -> ()
    %cst_7 = arith.constant 0.176776692 : f32
    %16 = vector.broadcast %cst_7 : f32 to vector<32x8x8xf32>
    %17 = arith.mulf %15, %16 : vector<32x8x8xf32>
    %cst_8 = arith.constant dense<0xFF800000> : vector<32x8xf32>
    %18 = vector.multi_reduction <maximumf>, %17, %cst_8 [2] : vector<32x8x8xf32> to vector<32x8xf32>
    %19 = vector.shape_cast %18 : vector<32x8xf32> to vector<32x8x1xf32>
    %20 = vector.broadcast %19 : vector<32x8x1xf32> to vector<32x8x8xf32>
    %21 = arith.subf %17, %20 : vector<32x8x8xf32>
    %22 = math.exp %21 : vector<32x8x8xf32>
    %cst_9 = arith.constant dense<0.000000e+00> : vector<32x8xf32>
    %23 = vector.multi_reduction <add>, %22, %cst_9 [2] : vector<32x8x8xf32> to vector<32x8xf32>
    %24 = vector.shape_cast %23 : vector<32x8xf32> to vector<32x8x1xf32>
    %25 = vector.broadcast %24 : vector<32x8x1xf32> to vector<32x8x8xf32>
    %26 = arith.divf %22, %25 : vector<32x8x8xf32>
    %27 = arith.truncf %26 : vector<32x8x8xf32> to vector<32x8x8xbf16>
    "tpu.trace_start"() <{level = 10 : i32, message = "bqk,bkd->bqd"}> : () -> ()
    %cst_10 = arith.constant dense<0.000000e+00> : vector<32x8x128xf32>
    %28 = tpu.matmul %27, %14, %cst_10 {dimension_numbers = #tpu.dot_dimension_numbers<[2], [1], [1], [2], [0, 0, 0, 1, 1, 2], [0], [0]>} : vector<32x8x8xbf16>, vector<32x8x128xbf16>, vector<32x8x128xf32> -> vector<32x8x128xf32>
    "tpu.trace_stop"() : () -> ()
    %29 = vector.shape_cast %28 : vector<32x8x128xf32> to vector<256x128xf32>
    %c0_11 = arith.constant 0 : index
    %c0_12 = arith.constant 0 : index
    %30 = vector.load %arg4[%c0_11, %c0_12] : memref<128x32xbf16, #tpu.memory_space<vmem>>, vector<128x32xbf16>
    %c0_13 = arith.constant 0 : index
    %c0_14 = arith.constant 0 : index
    %31 = vector.load %arg5[%c0_13, %c0_14] : memref<1x32xf32, #tpu.memory_space<vmem>>, vector<1x32xf32>
    %32 = arith.truncf %29 : vector<256x128xf32> to vector<256x128xbf16>
    %cst_15 = arith.constant dense<0.000000e+00> : vector<256x32xf32>
    %33 = tpu.matmul %32, %30, %cst_15 {dimension_numbers = #tpu.dot_dimension_numbers<[1], [0], [0], [1], [0, 0, 1, 1], [], []>} : vector<256x128xbf16>, vector<128x32xbf16>, vector<256x32xf32> -> vector<256x32xf32>
    %34 = vector.broadcast %31 : vector<1x32xf32> to vector<256x32xf32>
    %35 = arith.addf %33, %34 : vector<256x32xf32>
    %cst_16 = arith.constant 0.00999999977 : f32
    %36 = vector.broadcast %cst_16 : f32 to vector<256x32xf32>
    %37 = arith.mulf %36, %35 : vector<256x32xf32>
    %38 = arith.maximumf %35, %37 : vector<256x32xf32>
    %c0_17 = arith.constant 0 : index
    %c0_18 = arith.constant 0 : index
    %39 = vector.load %arg6[%c0_17, %c0_18] : memref<32x32xbf16, #tpu.memory_space<vmem>>, vector<32x32xbf16>
    %c0_19 = arith.constant 0 : index
    %c0_20 = arith.constant 0 : index
    %40 = vector.load %arg7[%c0_19, %c0_20] : memref<1x32xf32, #tpu.memory_space<vmem>>, vector<1x32xf32>
    %41 = arith.truncf %38 : vector<256x32xf32> to vector<256x32xbf16>
    %cst_21 = arith.constant dense<0.000000e+00> : vector<256x32xf32>
    %42 = tpu.matmul %41, %39, %cst_21 {dimension_numbers = #tpu.dot_dimension_numbers<[1], [0], [0], [1], [0, 0, 1, 1], [], []>} : vector<256x32xbf16>, vector<32x32xbf16>, vector<256x32xf32> -> vector<256x32xf32>
    %43 = vector.broadcast %40 : vector<1x32xf32> to vector<256x32xf32>
    %44 = arith.addf %42, %43 : vector<256x32xf32>
    %cst_22 = arith.constant 0.00999999977 : f32
    %45 = vector.broadcast %cst_22 : f32 to vector<256x32xf32>
    %46 = arith.mulf %45, %44 : vector<256x32xf32>
    %47 = arith.maximumf %44, %46 : vector<256x32xf32>
    %c0_23 = arith.constant 0 : index
    %c0_24 = arith.constant 0 : index
    %48 = vector.load %arg8[%c0_23, %c0_24] : memref<32x16xbf16, #tpu.memory_space<vmem>>, vector<32x16xbf16>
    %c0_25 = arith.constant 0 : index
    %c0_26 = arith.constant 0 : index
    %49 = vector.load %arg9[%c0_25, %c0_26] : memref<1x16xf32, #tpu.memory_space<vmem>>, vector<1x16xf32>
    %50 = arith.truncf %47 : vector<256x32xf32> to vector<256x32xbf16>
    %cst_27 = arith.constant dense<0.000000e+00> : vector<256x16xf32>
    %51 = tpu.matmul %50, %48, %cst_27 {dimension_numbers = #tpu.dot_dimension_numbers<[1], [0], [0], [1], [0, 0, 1, 1], [], []>} : vector<256x32xbf16>, vector<32x16xbf16>, vector<256x16xf32> -> vector<256x16xf32>
    %52 = vector.broadcast %49 : vector<1x16xf32> to vector<256x16xf32>
    %53 = arith.addf %51, %52 : vector<256x16xf32>
    %cst_28 = arith.constant 0.00999999977 : f32
    %54 = vector.broadcast %cst_28 : f32 to vector<256x16xf32>
    %55 = arith.mulf %54, %53 : vector<256x16xf32>
    %56 = arith.maximumf %53, %55 : vector<256x16xf32>
    %57 = vector.shape_cast %56 : vector<256x16xf32> to vector<32x8x16xf32>
    %c0_29 = arith.constant 0 : index
    %c0_30 = arith.constant 0 : index
    %c0_31 = arith.constant 0 : index
    %58 = vector.load %arg10[%c0_29, %c0_30, %c0_31] : memref<32x8x16xf32, #tpu.memory_space<vmem>>, vector<32x8x16xf32>
    tpu.vector_store %arg10[%c0_29, %c0_30, %c0_31], %57 {strides = array<i32>} : memref<32x8x16xf32, #tpu.memory_space<vmem>>, vector<32x8x16xf32>,
    return
  }
  func.func @transform_0(%arg0: i32) -> (i32, i32, i32) {
    %c0_i32 = arith.constant 0 : i32
    %c0_i32_0 = arith.constant 0 : i32
    %c0_i32_1 = arith.constant 0 : i32
    return %arg0, %c0_i32, %c0_i32_0 : i32, i32, i32
  }
  func.func @transform_1(%arg0: i32) -> (i32, i32) {
    %c0_i32 = arith.constant 0 : i32
    %c0_i32_0 = arith.constant 0 : i32
    %c0_i32_1 = arith.constant 0 : i32
    return %c0_i32, %c0_i32_0 : i32, i32
  }
  func.func @transform_2(%arg0: i32) -> (i32, i32) {
    %c0_i32 = arith.constant 0 : i32
    %c0_i32_0 = arith.constant 0 : i32
    %c0_i32_1 = arith.constant 0 : i32
    return %c0_i32, %c0_i32_0 : i32, i32
  }
  func.func @transform_3(%arg0: i32) -> (i32, i32) {
    %c0_i32 = arith.constant 0 : i32
    %c0_i32_0 = arith.constant 0 : i32
    %c0_i32_1 = arith.constant 0 : i32
    return %c0_i32, %c0_i32_0 : i32, i32
  }
  func.func @transform_4(%arg0: i32) -> (i32, i32) {
    %c0_i32 = arith.constant 0 : i32
    %c0_i32_0 = arith.constant 0 : i32
    %c0_i32_1 = arith.constant 0 : i32
    return %c0_i32, %c0_i32_0 : i32, i32
  }
  func.func @transform_5(%arg0: i32) -> (i32, i32) {
    %c0_i32 = arith.constant 0 : i32
    %c0_i32_0 = arith.constant 0 : i32
    %c0_i32_1 = arith.constant 0 : i32
    return %c0_i32, %c0_i32_0 : i32, i32
  }
  func.func @transform_6(%arg0: i32) -> (i32, i32) {
    %c0_i32 = arith.constant 0 : i32
    %c0_i32_0 = arith.constant 0 : i32
    %c0_i32_1 = arith.constant 0 : i32
    return %c0_i32, %c0_i32_0 : i32, i32
  }
  func.func @transform_7(%arg0: i32) -> (i32, i32) {
    %c0_i32 = arith.constant 0 : i32
    %c0_i32_0 = arith.constant 0 : i32
    %c0_i32_1 = arith.constant 0 : i32
    return %c0_i32, %c0_i32_0 : i32, i32
  }
  func.func @transform_8(%arg0: i32) -> (i32, i32) {
    %c0_i32 = arith.constant 0 : i32
    %c0_i32_0 = arith.constant 0 : i32
    %c0_i32_1 = arith.constant 0 : i32
    return %c0_i32, %c0_i32_0 : i32, i32
  }
  func.func @transform_9(%arg0: i32) -> (i32, i32, i32) {
    %c0_i32 = arith.constant 0 : i32
    %c0_i32_0 = arith.constant 0 : i32
    %c0_i32_1 = arith.constant 0 : i32
    return %arg0, %c0_i32, %c0_i32_0 : i32, i32, i32
  }
}

</mosaic_0001>

<bundles_post_ra>
// kernel: tpu_custom_call.1
= control target key start
LH: loop header
LB: loop body
LE: loop exit
PB: predicated region body
PF: predicated region fallthrough
CT: control target
= control target key end

     0   :  { %s6682_s30 = smov 0   ;;  %s7934_s0 = inlined_call_operand.vmem [shape: f32[256,8,32], index: 0, kind: input, shape index: {}]   ;;  %s7935_s1 = inlined_call_operand.vmem [shape: bf16[32,384], index: 1, kind: input, shape index: {}]   ;;  %s7936_s2 = inlined_call_operand.vmem [shape: f32[1,384], index: 2, kind: input, shape index: {}]   ;;  %s7937_s3 = inlined_call_operand.vmem [shape: bf16[128,32], index: 3, kind: input, shape index: {}]   ;;  %s7938_s4 = inlined_call_operand.vmem [shape: f32[1,32], index: 4, kind: input, shape index: {}]   ;;  %s7939_s5 = inlined_call_operand.vmem [shape: bf16[32,32], index: 5, kind: input, shape index: {}]   ;;  %s7940_s6 = inlined_call_operand.vmem [shape: f32[1,32], index: 6, kind: input, shape index: {}]   ;;  %s7941_s7 = inlined_call_operand.vmem [shape: bf16[32,16], index: 7, kind: input, shape index: {}]   ;;  %s7942_s8 = inlined_call_operand.vmem [shape: f32[1,16], index: 8, kind: input, shape index: {}]   ;;  %s7943_s9 = inlined_call_operand.vmem [shape: f32[256,8,16], index: 9, kind: output, shape index: {}]  }
   0x1 LB: > { %s5392_s10 = sadd.s32 4294967295, %s6627_s30   ;;  %p5396_p0 = scmp.ge.s32.totalorder %s6627_s30, 1  ;;  %s6627_s30 = sphi %s6682_s30, %s19_s30  }
   0x2   : > { %p288_p1 = scmp.lt.s32.totalorder %s6627_s30, 9 }
   0x4   : > { %p289_p2 = pnand %p5396_p0, %p288_p1 }
   0x6   : > { %292 = sbr.rel (%p289_p2) target bundleno = 1879 (0x757), region = 56 }
   0xd   : > { %v6473_v0 = vld [vmem:[%s7935_s1 + $0x4] ss:$12 sps:$4 sm:$0xff]   ;;  %s5397_s13 = sshll.u32 %s5392_s10, 5  ;;  %v6475_v1 = vld [vmem:[%s7935_s1] ss:$12 sps:$4 sm:$0xff]   ;;  %v6629_v2 = vmov 0   ;;  %v395_v56 = vlaneseq }
   0xe   : > { %523 = vmatprep.mubr.bf16.mxu0 %v6629_v2  ;;  %p325_p3 = scmp.lt.s32.totalorder %s5397_s13, 255  ;;  %491 = vmatprep.subr.bf16.mxu0 %v6473_v0  ;;  %v6476_v3 = vld [vmem:[%s7935_s1 + $0x1c] ss:$12 sps:$4 sm:$0xff]   ;;  %v6478_v4 = vld [vmem:[%s7935_s1 + $0x18] ss:$12 sps:$4 sm:$0xff]   ;;  %vm442_vm0 = vcmask 261120  }
   0xf   : > { %492 = vmatpush1.bf16.msra.mxu0 %v6475_v1  ;;  %v6479_v5 = vld [vmem:[%s7935_s1 + $0x8] ss:$12 sps:$4 sm:$0xff]   ;;  %v6480_v6 = vld [vmem:[%s7935_s1 + $0x20] ss:$12 sps:$4 sm:$0xff]   ;;  %v7944_v55 = vmov 0.0   ;;  %vm6631_vm1 = vmmov 0  }
  0x10   : > { %s7974_s13 = smov (!%p325_p3, %s5397_s13), 255  ;;  %493 = vmatprep.subr.bf16.mxu0 %v6476_v3  ;;  %6458 = vmatprep.subr.bf16.mxu1 %v6479_v5  ;;  %v6816_v57 = vshrl.u32 %v395_v56, 7  ;;  %v6822_v59 = vld [vmem:[%s7936_s2] sm:$0x7]  ;;  %vm2897_vm2 = vcmask 1043456   ;;  %vm2509_vm3 = vcmask 64512  }
  0x11   : > { %s5398_s24 = sshll.u32 %s7974_s13, 3  ;;  %6460 = vmatpush3.bf16.msra.mxu1 %v6479_v5  ;;  %vm5303_vm4 = vcmask 130048  }
  0x12   : > { %s6717_s27 = scalar_lea.vmem %s7934_s0, %s5398_s24  ;;  %6459 = vmatprep.subr.bf16.mxu1 %v6480_v6  ;;  %v401_v58 = vsub.s32 1, %v6816_v57  ;;  %v397_v61 = vsub.s32 0, %v6816_v57  ;;  %s7836_s26 = scalar_lea.vmem %s7943_s9, %s5398_s24 }
  0x13   : > { %494 = vmatpush1.bf16.msra.mxu0 %v6478_v4  ;;  %v346_v7 = vld [vmem:[%s6717_s27] sm:$0xff]  ;;  %v347_v8 = vld [vmem:[%s6717_s27 + $0x8] sm:$0xff]  ;;  %v348_v10 = vld [vmem:[%s6717_s27 + $0x10] sm:$0xff] }
  0x14   : > { %v6721_v9 = vpack.c.bf16 %v347_v8, %v346_v7  ;;  %5918 = vmatprep.subr.bf16.mxu0 %v6479_v5  ;;  %v354_v11 = vld [vmem:[%s6717_s27 + $0x40] sm:$0xff]  ;;  %v355_v12 = vld [vmem:[%s6717_s27 + $0x48] sm:$0xff]  ;;  %v356_v13 = vld [vmem:[%s6717_s27 + $0x50] sm:$0xff]  ;;  %v6825_v60 = vrot.slane %v6822_v59, %v401_v58 }
  0x15   : > { %v357_v14 = vld [vmem:[%s6717_s27 + $0x58] sm:$0xff]  ;;  %6461 = vmatpush3.bf16.msra.mxu1 %v6480_v6  ;;  %v382_v16 = vpack.c.bf16 %v355_v12, %v354_v11  ;;  %v358_v17 = vld [vmem:[%s6717_s27 + $0x60] sm:$0xff]  ;;  %v359_v18 = vld [vmem:[%s6717_s27 + $0x68] sm:$0xff] }
  0x16   : > { %5407 = vmatmul.mubr.msk.bf16.vlgmr.msra.gmra.mrb[0].mxu0 %vm442_vm0, %v6721_v9  ;;  %v349_v15 = vld [vmem:[%s6717_s27 + $0x18] sm:$0xff]  ;;  %v383_v19 = vpack.c.bf16 %v357_v14, %v356_v13  ;;  %v384_v20 = vpack.c.bf16 %v359_v18, %v358_v17  ;;  %v360_v22 = vld [vmem:[%s6717_s27 + $0x70] sm:$0xff]  ;;  %v350_v24 = vld [vmem:[%s6717_s27 + $0x20] sm:$0xff]  ;;  %5954 = vmatprep.subr.bf16.mxu1 %v7944_v55 }
  0x17   : > { %533 = vmatprep.mubr.bf16.mxu0 %v6629_v2  ;;  %5919 = vmatpush3.bf16.msra.mxu0 %v6479_v5  ;;  %v6735_v21 = vpack.c.bf16 %v349_v15, %v348_v10  ;;  %v361_v23 = vld [vmem:[%s6717_s27 + $0x78] sm:$0xff]  ;;  %v351_v25 = vld [vmem:[%s6717_s27 + $0x28] sm:$0xff]  ;;  %v362_v26 = vld [vmem:[%s6717_s27 + $0x80] sm:$0xff] }
  0x18   : > { %5920 = vmatprep.subr.bf16.mxu0 %v6480_v6  ;;  %5930 = vmatprep.mubr.msk.bf16.mxu1 %vm442_vm0, %v382_v16  ;;  %v363_v27 = vld [vmem:[%s6717_s27 + $0x88] sm:$0xff]  ;;  %v385_v28 = vpack.c.bf16 %v361_v23, %v360_v22  ;;  %v6748_v30 = vpack.c.bf16 %v351_v25, %v350_v24  ;;  %v364_v31 = vld [vmem:[%s6717_s27 + $0x90] sm:$0xff]  ;;  %v365_v32 = vld [vmem:[%s6717_s27 + $0x98] sm:$0xff] }
  0x19   : > { %5931 = vmatmul.mubr.msk.bf16.vlgmr.msra.gmra.mrb[0].mxu1 %vm442_vm0, %v383_v19  ;;  %v386_v29 = vpack.c.bf16 %v363_v27, %v362_v26  ;;  %v366_v33 = vld [vmem:[%s6717_s27 + $0xa0] sm:$0xff]  ;;  %v367_v34 = vld [vmem:[%s6717_s27 + $0xa8] sm:$0xff]  ;;  %v352_v35 = vld [vmem:[%s6717_s27 + $0x30] sm:$0xff]  ;;  %v387_v37 = vpack.c.bf16 %v365_v32, %v364_v31 }
  0x1a   : > { %5934 = vmatprep.mubr.msk.bf16.mxu1 %vm442_vm0, %v384_v20  ;;  %v353_v36 = vld [vmem:[%s6717_s27 + $0x38] sm:$0xff]  ;;  %v388_v38 = vpack.c.bf16 %v367_v34, %v366_v33  ;;  %v368_v40 = vld [vmem:[%s6717_s27 + $0xb0] sm:$0xff]  ;;  %v370_v42 = vld [vmem:[%s6717_s27 + $0xc0] sm:$0xff] }
  0x1b   : > { %5921 = vmatpush3.bf16.msra.mxu0 %v6480_v6  ;;  %v381_v39 = vpack.c.bf16 %v353_v36, %v352_v35  ;;  %v369_v41 = vld [vmem:[%s6717_s27 + $0xb8] sm:$0xff]  ;;  %v371_v43 = vld [vmem:[%s6717_s27 + $0xc8] sm:$0xff]  ;;  %v372_v46 = vld [vmem:[%s6717_s27 + $0xd0] sm:$0xff] }
  0x1c   : > { %v389_v44 = vpack.c.bf16 %v369_v41, %v368_v40  ;;  %v390_v45 = vpack.c.bf16 %v371_v43, %v370_v42  ;;  %v373_v47 = vld [vmem:[%s6717_s27 + $0xd8] sm:$0xff]  ;;  %v374_v48 = vld [vmem:[%s6717_s27 + $0xe0] sm:$0xff]  ;;  %v375_v49 = vld [vmem:[%s6717_s27 + $0xe8] sm:$0xff]  ;;  %6002 = vmatprep.subr.bf16.mxu0 %v7944_v55 }
  0x1d   : > { %v391_v50 = vpack.c.bf16 %v373_v47, %v372_v46  ;;  %v392_v51 = vpack.c.bf16 %v375_v49, %v374_v48  ;;  %v376_v52 = vld [vmem:[%s6717_s27 + $0xf0] sm:$0xff]  ;;  %v377_v53 = vld [vmem:[%s6717_s27 + $0xf8] sm:$0xff] }
  0x1e   : > { %5408 = vmatmul.mubr.msk.bf16.gmra.mrb[4].mxu0 %vm442_vm0, %v6735_v21  ;;  %v393_v54 = vpack.c.bf16 %v377_v53, %v376_v52 }
  0x1f   : > { %543 = vmatprep.mubr.bf16.mxu0 %v6629_v2 }
  0x21   : > { %5935 = vmatmul.mubr.msk.bf16.gmra.mrb[4].mxu1 %vm442_vm0, %v385_v28 }
  0x22   : > { %5938 = vmatprep.mubr.msk.bf16.mxu1 %vm442_vm0, %v386_v29 }
  0x26   : > { %5409 = vmatmul.mubr.msk.bf16.gmra.mrb[8].mxu0 %vm442_vm0, %v6748_v30 }
  0x27   : > { %553 = vmatprep.mubr.bf16.mxu0 %v6629_v2 }
  0x29   : > { %5939 = vmatmul.mubr.msk.bf16.gmra.mrb[8].mxu1 %vm442_vm0, %v387_v37 }
  0x2a   : > { %5942 = vmatprep.mubr.msk.bf16.mxu1 %vm442_vm0, %v388_v38 }
  0x2e   : > { %5410 = vmatmul.mubr.msk.bf16.gmra.mrb[12].mxu0 %vm442_vm0, %v381_v39 }
  0x2f   : > { %563 = vmatprep.mubr.bf16.mxu0 %v6629_v2 }
  0x31   : > { %5943 = vmatmul.mubr.msk.bf16.gmra.mrb[12].mxu1 %vm442_vm0, %v389_v44 }
  0x32   : > { %5946 = vmatprep.mubr.msk.bf16.mxu1 %vm442_vm0, %v390_v45 }
  0x36   : > { %5411 = vmatmul.mubr.msk.bf16.gmra.mrb[16].mxu0 %vm442_vm0, %v382_v16 }
  0x37   : > { %573 = vmatprep.mubr.bf16.mxu0 %v6629_v2 }
  0x39   : > { %5947 = vmatmul.mubr.msk.bf16.gmra.mrb[16].mxu1 %vm442_vm0, %v391_v50 }
  0x3a   : > { %5950 = vmatprep.mubr.msk.bf16.mxu1 %vm442_vm0, %v392_v51 }
  0x3e   : > { %5412 = vmatmul.mubr.msk.bf16.gmra.mrb[20].mxu0 %vm442_vm0, %v383_v19 }
  0x3f   : > { %583 = vmatprep.mubr.bf16.mxu0 %v6629_v2 }
  0x41   : > { %5951 = vmatmul.mubr.msk.bf16.gmra.mrb[20].mxu1 %vm442_vm0, %v393_v54 }
  0x42   : > { %5956 = vmatprep.mubr.msk.bf16.mxu1 %vm6631_vm1, %v7944_v55 }
  0x46   : > { %5413 = vmatmul.mubr.msk.bf16.gmra.mrb[24].mxu0 %vm442_vm0, %v384_v20 }
  0x47   : > { %593 = vmatprep.mubr.bf16.mxu0 %v6629_v2 }
  0x4e   : > { %5414 = vmatmul.mubr.msk.bf16.gmra.mrb[28].mxu0 %vm442_vm0, %v385_v28 }
  0x4f   : > { %603 = vmatprep.mubr.bf16.mxu0 %v6629_v2 }
  0x56   : > { %5415 = vmatmul.mubr.msk.bf16.gmra.mrb[32].mxu0 %vm442_vm0, %v386_v29 }
  0x57   : > { %613 = vmatprep.mubr.bf16.mxu0 %v6629_v2 }
  0x5e   : > { %5416 = vmatmul.mubr.msk.bf16.gmra.mrb[36].mxu0 %vm442_vm0, %v387_v37 }
  0x5f   : > { %623 = vmatprep.mubr.bf16.mxu0 %v6629_v2 }
  0x66   : > { %5417 = vmatmul.mubr.msk.bf16.gmra.mrb[40].mxu0 %vm442_vm0, %v388_v38 }
  0x67   : > { %633 = vmatprep.mubr.bf16.mxu0 %v6629_v2 }
  0x6e   : > { %5418 = vmatmul.mubr.msk.bf16.gmra.mrb[44].mxu0 %vm442_vm0, %v389_v44 }
  0x6f   : > { %643 = vmatprep.mubr.bf16.mxu0 %v6629_v2 }
  0x76   : > { %5419 = vmatmul.mubr.msk.bf16.gmra.mrb[48].mxu0 %vm442_vm0, %v390_v45 }
  0x77   : > { %653 = vmatprep.mubr.bf16.mxu0 %v6629_v2 }
  0x7e   : > { %5420 = vmatmul.mubr.msk.bf16.gmra.mrb[52].mxu0 %vm442_vm0, %v391_v50 }
  0x7f   : > { %663 = vmatprep.mubr.bf16.mxu0 %v6629_v2 }
  0x86   : > { %5421 = vmatmul.mubr.msk.bf16.gmra.mrb[56].mxu0 %vm442_vm0, %v392_v51 }
  0x87   : > { %673 = vmatprep.mubr.bf16.mxu0 %v6629_v2  ;;  %v6830_v2 = vrot.slane %v6822_v59, %v397_v61 }
  0x8e   : > { %5422 = vmatmul.mubr.msk.bf16.gmra.mrb[60].mxu0 %vm442_vm0, %v393_v54 }
  0x8f   : > { %5922 = vmatprep.mubr.msk.bf16.mxu0 %vm442_vm0, %v6721_v9 }
  0x96   : > { %5923 = vmatmul.mubr.msk.bf16.vlgmr.msra.gmra.mrb[64].mxu0 %vm442_vm0, %v6735_v21 }
  0x97   : > { %5926 = vmatprep.mubr.msk.bf16.mxu0 %vm442_vm0, %v6748_v30 }
  0x9e   : > { %5927 = vmatmul.mubr.msk.bf16.gmra.mrb[68].mxu0 %vm442_vm0, %v381_v39 }
  0x9f   : > { %6004 = vmatprep.mubr.msk.bf16.mxu0 %vm6631_vm1, %v7944_v55 }
  0xe9   : > { %v525_v62 = vpop.f32.mrb[0].mxu0 }
  0xea   : > { %v527_v63 = vpop.f32.mrb[1].mxu0  ;;  %v526_v5 = vadd.f32 %v525_v62, %v6830_v2 }
  0xeb   : > { %v528_v0 = vadd.f32 %v527_v63, %v6825_v60  ;;  %v529_v1 = vpop.f32.mrb[2].mxu0 }
  0xec   : > { %v531_v3 = vpop.f32.mrb[3].mxu0  ;;  %v5616_v10 = vpack.c.bf16 %v526_v5, %v526_v5  ;;  %v530_v14 = vadd.f32 %v529_v1, %v6830_v2  ;;  %v6842_v21 = vpop.f32.mrb[0].mxu1 }
  0xed   : > { %v5648_v4 = vpack.c.bf16 %v528_v0, %v528_v0  ;;  %v532_v6 = vadd.f32 %v531_v3, %v6825_v60  ;;  %v6846_v22 = vpop.f32.mrb[1].mxu1 }
  0xee   : > { %v5617_v19 = vpack.c.bf16 %v530_v14, %v530_v14  ;;  %v6850_v24 = vpop.f32.mrb[2].mxu1 }
  0xef   : > { %5955 = vmatpush3.bf16.xpose.msra.mxu1 %v5648_v4  ;;  %v5649_v12 = vpack.c.bf16 %v532_v6, %v532_v6  ;;  %v6855_v27 = vpop.f32.mrb[3].mxu1 }
  0xf0   : > { %5960 = vmatprep.subr.bf16.mxu1 %v7944_v55 }
  0xf1   : > { %v535_v7 = vpop.f32.mrb[4].mxu0 }
  0xf2   : > { %v537_v8 = vpop.f32.mrb[5].mxu0  ;;  %v536_v23 = vadd.f32 %v535_v7, %v6830_v2 }
  0xf3   : > { %v539_v9 = vpop.f32.mrb[6].mxu0  ;;  %v538_v13 = vadd.f32 %v537_v8, %v6825_v60 }
  0xf4   : > { %v541_v11 = vpop.f32.mrb[7].mxu0  ;;  %v6857_v29 = vpop.f32.mrb[4].mxu1  ;;  %v5618_v32 = vpack.c.bf16 %v536_v23, %v536_v23  ;;  %v540_v40 = vadd.f32 %v539_v9, %v6830_v2 }
  0xf5   : > { %v5650_v17 = vpack.c.bf16 %v538_v13, %v538_v13  ;;  %v542_v25 = vadd.f32 %v541_v11, %v6825_v60  ;;  %v6861_v31 = vpop.f32.mrb[5].mxu1 }
  0xf6   : > { %5957 = vmatmul.mubr.bf16.vlgmr.msra.gmra.mrb[24].mxu1 %v5616_v10  ;;  %v6865_v34 = vpop.f32.mrb[6].mxu1  ;;  %v5619_v50 = vpack.c.bf16 %v540_v40, %v540_v40 }
  0xf7   : > { %5961 = vmatpush3.bf16.xpose.msra.mxu1 %v5649_v12  ;;  %5962 = vmatprep.mubr.msk.bf16.mxu1 %vm6631_vm1, %v7944_v55  ;;  %v5651_v35 = vpack.c.bf16 %v542_v25, %v542_v25  ;;  %v6867_v36 = vpop.f32.mrb[7].mxu1 }
  0xf8   : > { %5966 = vmatprep.subr.bf16.mxu1 %v7944_v55 }
  0xf9   : > { %v545_v15 = vpop.f32.mrb[8].mxu0 }
  0xfa   : > { %v547_v16 = vpop.f32.mrb[9].mxu0  ;;  %v546_v62 = vadd.f32 %v545_v15, %v6830_v2 }
  0xfb   : > { %v6840_v18 = vpop.f32.mrb[10].mxu0  ;;  %v548_v38 = vadd.f32 %v547_v16, %v6825_v60 }
  0xfc   : > { %v551_v20 = vpop.f32.mrb[11].mxu0  ;;  %v6869_v37 = vpop.f32.mrb[8].mxu1  ;;  %v5620_v8 = vpack.c.bf16 %v546_v62, %v546_v62 }
  0xfd   : > { %v6874_v39 = vpop.f32.mrb[9].mxu1  ;;  %v5652_v46 = vpack.c.bf16 %v548_v38, %v548_v38  ;;  %v552_v0 = vadd.f32 %v551_v20, %v6825_v60 }
  0xfe   : > { %5963 = vmatmul.mubr.bf16.vlgmr.msra.gmra.mrb[28].mxu1 %v5617_v19  ;;  %v6878_v41 = vpop.f32.mrb[10].mxu1 }
  0xff   : > { %5967 = vmatpush3.bf16.xpose.msra.mxu1 %v5650_v17  ;;  %5968 = vmatprep.mubr.msk.bf16.mxu1 %vm6631_vm1, %v7944_v55  ;;  %7946 = vst [vmem:[#allocation2_spill] sm:$0xff] %v6878_v41  ;;  %v6880_v43 = vpop.f32.mrb[11].mxu1  ;;  %v5653_v10 = vpack.c.bf16 %v552_v0, %v552_v0  ;;  %v550_v17 = vadd.f32 %v6840_v18, %v6830_v2 }
 0x100   : > { %5972 = vmatprep.subr.bf16.mxu1 %v7944_v55 }
 0x101   : > { %v6853_v26 = vpop.f32.mrb[12].mxu0  ;;  %v5621_v18 = vpack.c.bf16 %v550_v17, %v550_v17 }
 0x102   : > { %v557_v28 = vpop.f32.mrb[13].mxu0 }
 0x103   : > { %v6859_v30 = vpop.f32.mrb[14].mxu0  ;;  %v558_v15 = vadd.f32 %v557_v28, %v6825_v60 }
 0x104   : > { %v6863_v33 = vpop.f32.mrb[15].mxu0  ;;  %v6882_v45 = vpop.f32.mrb[12].mxu1 }
 0x105   : > { %7947 = vst [vmem:[#allocation3_spill] sm:$0xff] %v6882_v45  ;;  %v6887_v49 = vpop.f32.mrb[13].mxu1  ;;  %v5654_v28 = vpack.c.bf16 %v558_v15, %v558_v15 }
 0x106   : > { %5969 = vmatmul.mubr.bf16.vlgmr.msra.gmra.mrb[32].mxu1 %v5618_v32  ;;  %7948 = vst [vmem:[#allocation4_spill] sm:$0xff] %v6887_v49  ;;  %v6891_v52 = vpop.f32.mrb[14].mxu1 }
 0x107   : > { %5973 = vmatpush3.bf16.xpose.msra.mxu1 %v5651_v35  ;;  %5974 = vmatprep.mubr.msk.bf16.mxu1 %vm6631_vm1, %v7944_v55  ;;  %7949 = vst [vmem:[#allocation5_spill] sm:$0xff] %v6891_v52  ;;  %v6893_v54 = vpop.f32.mrb[15].mxu1 }
 0x108   : > { %5978 = vmatprep.subr.bf16.mxu1 %v7944_v55  ;;  %7950 = vst [vmem:[#allocation6_spill] sm:$0xff] %v6893_v54 }
 0x109   : > { %v565_v42 = vpop.f32.mrb[16].mxu0 }
 0x10a   : > { %v567_v44 = vpop.f32.mrb[17].mxu0  ;;  %v566_v56 = vadd.f32 %v565_v42, %v6830_v2 }
 0x10b   : > { %v568_v47 = vadd.f32 %v567_v44, %v6825_v60  ;;  %v6885_v48 = vpop.f32.mrb[18].mxu0  ;;  %v556_v44 = vadd.f32 %v6853_v26, %v6830_v2 }
 0x10c   : > { %v6889_v51 = vpop.f32.mrb[19].mxu0  ;;  %v6896_v58 = vpop.f32.mrb[16].mxu1  ;;  %v5624_v4 = vpack.c.bf16 %v566_v56, %v566_v56 }
 0x10d   : > { %v5656_v53 = vpack.c.bf16 %v568_v47, %v568_v47  ;;  %7951 = vst [vmem:[#allocation7_spill] sm:$0xff] %v6896_v58  ;;  %v6898_v61 = vpop.f32.mrb[17].mxu1  ;;  %v5622_v26 = vpack.c.bf16 %v556_v44, %v556_v44 }
 0x10e   : > { %5975 = vmatmul.mubr.bf16.vlgmr.msra.gmra.mrb[36].mxu1 %v5619_v50  ;;  %7952 = vst [vmem:[#allocation8_spill] sm:$0xff] %v6898_v61  ;;  %v6904_v63 = vpop.f32.mrb[18].mxu1 }
 0x10f   : > { %5979 = vmatpush3.bf16.xpose.msra.mxu1 %v5652_v46  ;;  %6003 = vmatpush3.bf16.xpose.msra.mxu0 %v5656_v53  ;;  %7953 = vst [vmem:[#allocation9_spill] sm:$0xff] %v6904_v63  ;;  %v6908_v3 = vpop.f32.mrb[19].mxu1  ;;  %v562_v46 = vadd.f32 %v6863_v33, %v6825_v60  ;;  %v572_v33 = vadd.f32 %v6889_v51, %v6825_v60 }
 0x110   : > { %5980 = vmatprep.mubr.msk.bf16.mxu1 %vm6631_vm1, %v7944_v55  ;;  %5984 = vmatprep.subr.bf16.mxu1 %v7944_v55  ;;  %7954 = vst [vmem:[#allocation10_spill] sm:$0xff] %v6908_v3 }
 0x111   : > { %v575_v1 = vpop.f32.mrb[20].mxu0  ;;  %6014 = vmatprep.subr.bf16.mxu0 %v7944_v55 }
 0x112   : > { %v577_v5 = vpop.f32.mrb[21].mxu0  ;;  %v576_v13 = vadd.f32 %v575_v1, %v6830_v2  ;;  %v5655_v1 = vpack.c.bf16 %v562_v46, %v562_v46 }
 0x113   : > { %v578_v6 = vadd.f32 %v577_v5, %v6825_v60  ;;  %v6911_v7 = vpop.f32.mrb[22].mxu0 }
 0x114   : > { %v6913_v9 = vpop.f32.mrb[23].mxu0  ;;  %v6915_v12 = vpop.f32.mrb[20].mxu1  ;;  %v5626_v23 = vpack.c.bf16 %v576_v13, %v576_v13  ;;  %v5657_v13 = vpack.c.bf16 %v572_v33, %v572_v33 }
 0x115   : > { %v5658_v11 = vpack.c.bf16 %v578_v6, %v578_v6  ;;  %7955 = vst [vmem:[#allocation11_spill] sm:$0xff] %v6915_v12  ;;  %v6918_v14 = vpop.f32.mrb[21].mxu1  ;;  %v560_v6 = vadd.f32 %v6859_v30, %v6830_v2 }
 0x116   : > { %5981 = vmatmul.mubr.bf16.vlgmr.msra.gmra.mrb[40].mxu1 %v5620_v8  ;;  %6005 = vmatmul.mubr.bf16.vlgmr.msra.gmra.mrb[72].mxu0 %v5624_v4  ;;  %7956 = vst [vmem:[#allocation12_spill] sm:$0xff] %v6918_v14  ;;  %v6921_v16 = vpop.f32.mrb[22].mxu1 }
 0x117   : > { %5985 = vmatpush3.bf16.xpose.msra.mxu1 %v5653_v10  ;;  %6015 = vmatpush3.bf16.xpose.msra.mxu0 %v5658_v11  ;;  %7957 = vst [vmem:[#allocation13_spill] sm:$0xff] %v6921_v16  ;;  %v6929_v19 = vpop.f32.mrb[23].mxu1  ;;  %v5623_v17 = vpack.c.bf16 %v560_v6, %v560_v6 }
 0x118   : > { %5986 = vmatprep.mubr.msk.bf16.mxu1 %vm6631_vm1, %v7944_v55  ;;  %6016 = vmatprep.mubr.msk.bf16.mxu0 %vm6631_vm1, %v7944_v55  ;;  %7958 = vst [vmem:[#allocation14_spill] sm:$0xff] %v6929_v19 }
 0x119   : > { %v585_v20 = vpop.f32.mrb[24].mxu0  ;;  %5990 = vmatprep.subr.bf16.mxu1 %v7944_v55  ;;  %6026 = vmatprep.subr.bf16.mxu0 %v7944_v55 }
 0x11a   : > { %v587_v25 = vpop.f32.mrb[25].mxu0  ;;  %v586_v42 = vadd.f32 %v585_v20, %v6830_v2 }
 0x11b   : > { %v588_v32 = vadd.f32 %v587_v25, %v6825_v60  ;;  %v6934_v35 = vpop.f32.mrb[26].mxu0 }
 0x11c   : > { %v6936_v38 = vpop.f32.mrb[27].mxu0  ;;  %v5628_v50 = vpack.c.bf16 %v586_v42, %v586_v42 }
 0x11d   : > { %v5660_v40 = vpack.c.bf16 %v588_v32, %v588_v32 }
 0x11e   : > { %5987 = vmatmul.mubr.bf16.vlgmr.msra.gmra.mrb[44].mxu1 %v5621_v18  ;;  %6017 = vmatmul.mubr.bf16.vlgmr.msra.gmra.mrb[76].mxu0 %v5626_v23  ;;  %v570_v23 = vadd.f32 %v6885_v48, %v6830_v2 }
 0x11f   : > { %5991 = vmatpush3.bf16.xpose.msra.mxu1 %v5654_v28  ;;  %6027 = vmatpush3.bf16.xpose.msra.mxu0 %v5660_v40  ;;  %v582_v28 = vadd.f32 %v6913_v9, %v6825_v60 }
 0x120   : > { %5992 = vmatprep.mubr.msk.bf16.mxu1 %vm6631_vm1, %v7944_v55  ;;  %6028 = vmatprep.mubr.msk.bf16.mxu0 %vm6631_vm1, %v7944_v55  ;;  %v5625_v48 = vpack.c.bf16 %v570_v23, %v570_v23 }
 0x121   : > { %v595_v47 = vpop.f32.mrb[28].mxu0  ;;  %5996 = vmatprep.subr.bf16.mxu1 %v7944_v55  ;;  %6038 = vmatprep.subr.bf16.mxu0 %v7944_v55  ;;  %v5659_v42 = vpack.c.bf16 %v582_v28, %v582_v28 }
 0x122   : > { %v597_v53 = vpop.f32.mrb[29].mxu0  ;;  %v596_v5 = vadd.f32 %v595_v47, %v6830_v2 }
 0x123   : > { %v598_v56 = vadd.f32 %v597_v53, %v6825_v60  ;;  %v6950_v62 = vpop.f32.mrb[30].mxu0 }
 0x124   : > { %v6952_v0 = vpop.f32.mrb[31].mxu0  ;;  %v5630_v10 = vpack.c.bf16 %v596_v5, %v596_v5 }
 0x125   : > { %v5662_v4 = vpack.c.bf16 %v598_v56, %v598_v56  ;;  %v592_v56 = vadd.f32 %v6936_v38, %v6825_v60 }
 0x126   : > { %5993 = vmatmul.mubr.bf16.vlgmr.msra.gmra.mrb[48].mxu1 %v5622_v26  ;;  %6029 = vmatmul.mubr.bf16.vlgmr.msra.gmra.mrb[80].mxu0 %v5628_v50  ;;  %v580_v50 = vadd.f32 %v6911_v7, %v6830_v2 }
 0x127   : > { %5997 = vmatpush3.bf16.xpose.msra.mxu1 %v5655_v1  ;;  %6039 = vmatpush3.bf16.xpose.msra.mxu0 %v5662_v4  ;;  %v5661_v5 = vpack.c.bf16 %v592_v56, %v592_v56 }
 0x128   : > { %5998 = vmatprep.mubr.msk.bf16.mxu1 %vm6631_vm1, %v7944_v55  ;;  %6040 = vmatprep.mubr.msk.bf16.mxu0 %vm6631_vm1, %v7944_v55  ;;  %v5627_v7 = vpack.c.bf16 %v580_v50, %v580_v50 }
 0x129   : > { %v605_v8 = vpop.f32.mrb[32].mxu0  ;;  %6008 = vmatprep.subr.bf16.mxu1 %v7944_v55  ;;  %6050 = vmatprep.subr.bf16.mxu0 %v7944_v55 }
 0x12a   : > { %v607_v11 = vpop.f32.mrb[33].mxu0  ;;  %v606_v25 = vadd.f32 %v605_v8, %v6830_v2 }
 0x12b   : > { %v608_v51 = vadd.f32 %v607_v11, %v6825_v60  ;;  %v6966_v15 = vpop.f32.mrb[34].mxu0 }
 0x12c   : > { %v6968_v30 = vpop.f32.mrb[35].mxu0  ;;  %v5632_v18 = vpack.c.bf16 %v606_v25, %v606_v25 }
 0x12d   : > { %v5664_v20 = vpack.c.bf16 %v608_v51, %v608_v51 }
 0x12e   : > { %5999 = vmatmul.mubr.bf16.vlgmr.msra.gmra.mrb[52].mxu1 %v5623_v17  ;;  %6041 = vmatmul.mubr.bf16.vlgmr.msra.gmra.mrb[84].mxu0 %v5630_v10  ;;  %v590_v10 = vadd.f32 %v6934_v35, %v6830_v2 }
 0x12f   : > { %6009 = vmatpush3.bf16.xpose.msra.mxu1 %v5657_v13  ;;  %6051 = vmatpush3.bf16.xpose.msra.mxu0 %v5664_v20  ;;  %v602_v13 = vadd.f32 %v6952_v0, %v6825_v60 }
 0x130   : > { %6010 = vmatprep.mubr.msk.bf16.mxu1 %vm6631_vm1, %v7944_v55  ;;  %6052 = vmatprep.mubr.msk.bf16.mxu0 %vm6631_vm1, %v7944_v55  ;;  %v5629_v35 = vpack.c.bf16 %v590_v10, %v590_v10 }
 0x131   : > { %v615_v32 = vpop.f32.mrb[36].mxu0  ;;  %6020 = vmatprep.subr.bf16.mxu1 %v7944_v55  ;;  %6062 = vmatprep.subr.bf16.mxu0 %v7944_v55  ;;  %v5663_v23 = vpack.c.bf16 %v602_v13, %v602_v13 }
 0x132   : > { %v617_v40 = vpop.f32.mrb[37].mxu0  ;;  %v616_v53 = vadd.f32 %v615_v32, %v6830_v2 }
 0x133   : > { %v618_v44 = vadd.f32 %v617_v40, %v6825_v60  ;;  %v6982_v9 = vpop.f32.mrb[38].mxu0  ;;  %v612_v40 = vadd.f32 %v6968_v30, %v6825_v60 }
 0x134   : > { %v6984_v46 = vpop.f32.mrb[39].mxu0  ;;  %v5634_v1 = vpack.c.bf16 %v616_v53, %v616_v53 }
 0x135   : > { %v5666_v47 = vpack.c.bf16 %v618_v44, %v618_v44  ;;  %v5665_v50 = vpack.c.bf16 %v612_v40, %v612_v40 }
 0x136   : > { %6011 = vmatmul.mubr.bf16.vlgmr.msra.gmra.mrb[56].mxu1 %v5625_v48  ;;  %6053 = vmatmul.mubr.bf16.vlgmr.msra.gmra.mrb[88].mxu0 %v5632_v18  ;;  %v600_v48 = vadd.f32 %v6950_v62, %v6830_v2 }
 0x137   : > { %6021 = vmatpush3.bf16.xpose.msra.mxu1 %v5659_v42  ;;  %6063 = vmatpush3.bf16.xpose.msra.mxu0 %v5666_v47 }
 0x138   : > { %6022 = vmatprep.mubr.msk.bf16.mxu1 %vm6631_vm1, %v7944_v55  ;;  %6064 = vmatprep.mubr.msk.bf16.mxu0 %vm6631_vm1, %v7944_v55  ;;  %v5631_v62 = vpack.c.bf16 %v600_v48, %v600_v48 }
 0x139   : > { %v625_v26 = vpop.f32.mrb[40].mxu0  ;;  %6032 = vmatprep.subr.bf16.mxu1 %v7944_v55  ;;  %6074 = vmatprep.subr.bf16.mxu0 %v7944_v55 }
 0x13a   : > { %v627_v4 = vpop.f32.mrb[41].mxu0  ;;  %v626_v11 = vadd.f32 %v625_v26, %v6830_v2 }
 0x13b   : > { %v628_v33 = vadd.f32 %v627_v4, %v6825_v60  ;;  %v6998_v38 = vpop.f32.mrb[42].mxu0 }
 0x13c   : > { %v7000_v6 = vpop.f32.mrb[43].mxu0  ;;  %v5636_v17 = vpack.c.bf16 %v626_v11, %v626_v11 }
 0x13d   : > { %v5668_v8 = vpack.c.bf16 %v628_v33, %v628_v33 }
 0x13e   : > { %6023 = vmatmul.mubr.bf16.vlgmr.msra.gmra.mrb[60].mxu1 %v5627_v7  ;;  %6065 = vmatmul.mubr.bf16.vlgmr.msra.gmra.mrb[92].mxu0 %v5634_v1  ;;  %v610_v7 = vadd.f32 %v6966_v15, %v6830_v2  ;;  %v622_v1 = vadd.f32 %v6984_v46, %v6825_v60 }
 0x13f   : > { %6033 = vmatpush3.bf16.xpose.msra.mxu1 %v5661_v5  ;;  %6075 = vmatpush3.bf16.xpose.msra.mxu0 %v5668_v8 }
 0x140   : > { %6034 = vmatprep.mubr.msk.bf16.mxu1 %vm6631_vm1, %v7944_v55  ;;  %6076 = vmatprep.mubr.msk.bf16.mxu0 %vm6631_vm1, %v7944_v55  ;;  %v5633_v15 = vpack.c.bf16 %v610_v7, %v610_v7  ;;  %v5667_v8 = vpack.c.bf16 %v622_v1, %v622_v1 }
 0x141   : > { %v635_v51 = vpop.f32.mrb[44].mxu0  ;;  %6044 = vmatprep.subr.bf16.mxu1 %v7944_v55  ;;  %6086 = vmatprep.subr.bf16.mxu0 %v7944_v55 }
 0x142   : > { %v637_v20 = vpop.f32.mrb[45].mxu0  ;;  %v636_v18 = vadd.f32 %v635_v51, %v6830_v2 }
 0x143   : > { %v638_v25 = vadd.f32 %v637_v20, %v6825_v60  ;;  %v7014_v0 = vpop.f32.mrb[46].mxu0 }
 0x144   : > { %v7016_v28 = vpop.f32.mrb[47].mxu0  ;;  %v5638_v44 = vpack.c.bf16 %v636_v18, %v636_v18 }
 0x145   : > { %v5670_v32 = vpack.c.bf16 %v638_v25, %v638_v25 }
 0x146   : > { %6035 = vmatmul.mubr.bf16.vlgmr.msra.gmra.mrb[64].mxu1 %v5629_v35  ;;  %6077 = vmatmul.mubr.bf16.vlgmr.msra.gmra.mrb[96].mxu0 %v5636_v17  ;;  %v620_v35 = vadd.f32 %v6982_v9, %v6830_v2  ;;  %v632_v17 = vadd.f32 %v7000_v6, %v6825_v60 }
 0x147   : > { %6045 = vmatpush3.bf16.xpose.msra.mxu1 %v5663_v23  ;;  %6087 = vmatpush3.bf16.xpose.msra.mxu0 %v5670_v32 }
 0x148   : > { %6046 = vmatprep.mubr.msk.bf16.mxu1 %vm6631_vm1, %v7944_v55  ;;  %6088 = vmatprep.mubr.msk.bf16.mxu0 %vm6631_vm1, %v7944_v55  ;;  %v5635_v25 = vpack.c.bf16 %v620_v35, %v620_v35  ;;  %v5669_v32 = vpack.c.bf16 %v632_v17, %v632_v17  ;;  %v405_v35 = vsub.s32 2, %v6816_v57 }
 0x149   : > { %6056 = vmatprep.subr.bf16.mxu1 %v7944_v55  ;;  %v645_v42 = vpop.f32.mrb[48].mxu0  ;;  %6098 = vmatprep.subr.bf16.mxu0 %v7944_v55 }
 0x14a   : > { %v647_v47 = vpop.f32.mrb[49].mxu0  ;;  %v646_v4 = vadd.f32 %v645_v42, %v6830_v2 }
 0x14b   : > { %v648_v53 = vadd.f32 %v647_v47, %v6825_v60  ;;  %v7030_v30 = vpop.f32.mrb[50].mxu0 }
 0x14c   : > { %v7032_v56 = vpop.f32.mrb[51].mxu0  ;;  %v5640_v11 = vpack.c.bf16 %v646_v4, %v646_v4 }
 0x14d   : > { %v5672_v26 = vpack.c.bf16 %v648_v53, %v648_v53 }
 0x14e   : > { %6047 = vmatmul.mubr.bf16.vlgmr.msra.gmra.mrb[68].mxu1 %v5631_v62  ;;  %6089 = vmatmul.mubr.bf16.vlgmr.msra.gmra.mrb[100].mxu0 %v5638_v44  ;;  %v630_v62 = vadd.f32 %v6998_v38, %v6830_v2  ;;  %v642_v44 = vadd.f32 %v7016_v28, %v6825_v60 }
 0x14f   : > { %6057 = vmatpush3.bf16.xpose.msra.mxu1 %v5665_v50  ;;  %6058 = vmatprep.mubr.msk.bf16.mxu1 %vm6631_vm1, %v7944_v55 }
 0x150   : > { %6068 = vmatprep.subr.bf16.mxu1 %v7944_v55  ;;  %6099 = vmatpush3.bf16.xpose.msra.mxu0 %v5672_v26  ;;  %v5637_v53 = vpack.c.bf16 %v630_v62, %v630_v62  ;;  %v5671_v26 = vpack.c.bf16 %v642_v44, %v642_v44 }
 0x151   : > { %6100 = vmatprep.mubr.msk.bf16.mxu0 %vm6631_vm1, %v7944_v55  ;;  %v655_v5 = vpop.f32.mrb[52].mxu0  ;;  %6110 = vmatprep.subr.bf16.mxu0 %v7944_v55 }
 0x152   : > { %v657_v33 = vpop.f32.mrb[53].mxu0  ;;  %v656_v20 = vadd.f32 %v655_v5, %v6830_v2 }
 0x153   : > { %v658_v46 = vadd.f32 %v657_v33, %v6825_v60  ;;  %v7046_v10 = vpop.f32.mrb[54].mxu0  ;;  %v652_v33 = vadd.f32 %v7032_v56, %v6825_v60 }
 0x154   : > { %v661_v13 = vpop.f32.mrb[55].mxu0  ;;  %v5642_v18 = vpack.c.bf16 %v656_v20, %v656_v20 }
 0x155   : > { %v5674_v51 = vpack.c.bf16 %v658_v46, %v658_v46  ;;  %v662_v56 = vadd.f32 %v661_v13, %v6825_v60  ;;  %v660_v13 = vadd.f32 %v7046_v10, %v6830_v2 }
 0x156   : > { %6059 = vmatmul.mubr.bf16.vlgmr.msra.gmra.mrb[72].mxu1 %v5633_v15  ;;  %v640_v15 = vadd.f32 %v7014_v0, %v6830_v2  ;;  %v5673_v0 = vpack.c.bf16 %v652_v33, %v652_v33 }
 0x157   : > { %6069 = vmatpush3.bf16.xpose.msra.mxu1 %v5667_v8  ;;  %6070 = vmatprep.mubr.msk.bf16.mxu1 %vm6631_vm1, %v7944_v55 }
 0x158   : > { %6080 = vmatprep.subr.bf16.mxu1 %v7944_v55  ;;  %6101 = vmatmul.mubr.bf16.vlgmr.msra.gmra.mrb[104].mxu0 %v5640_v11  ;;  %v5639_v46 = vpack.c.bf16 %v640_v15, %v640_v15 }
 0x159   : > { %6111 = vmatpush3.bf16.xpose.msra.mxu0 %v5674_v51  ;;  %6112 = vmatprep.mubr.msk.bf16.mxu0 %vm6631_vm1, %v7944_v55  ;;  %v665_v23 = vpop.f32.mrb[56].mxu0  ;;  %v650_v51 = vadd.f32 %v7030_v30, %v6830_v2  ;;  %v7097_v30 = vrot.slane %v6822_v59, %v405_v35 }
 0x15a   : > { %v667_v9 = vpop.f32.mrb[57].mxu0  ;;  %6122 = vmatprep.subr.bf16.mxu0 %v7944_v55  ;;  %v666_v47 = vadd.f32 %v665_v23, %v6830_v2  ;;  %v5675_v23 = vpack.c.bf16 %v662_v56, %v662_v56 }
 0x15b   : > { %v668_v6 = vadd.f32 %v667_v9, %v6825_v60  ;;  %v7060_v48 = vpop.f32.mrb[58].mxu0  ;;  %v5641_v17 = vpack.c.bf16 %v650_v51, %v650_v51 }
 0x15c   : > { %v671_v40 = vpop.f32.mrb[59].mxu0  ;;  %v5644_v1 = vpack.c.bf16 %v666_v47, %v666_v47 }
 0x15d   : > { %v5676_v42 = vpack.c.bf16 %v668_v6, %v668_v6  ;;  %v672_v57 = vadd.f32 %v671_v40, %v6825_v60  ;;  %v670_v40 = vadd.f32 %v7060_v48, %v6830_v2 }
 0x15e   : > { %6071 = vmatmul.mubr.bf16.vlgmr.msra.gmra.mrb[76].mxu1 %v5635_v25 }
 0x15f   : > { %6081 = vmatpush3.bf16.xpose.msra.mxu1 %v5669_v32  ;;  %6082 = vmatprep.mubr.msk.bf16.mxu1 %vm6631_vm1, %v7944_v55  ;;  %v5677_v44 = vpack.c.bf16 %v672_v57, %v672_v57 }
 0x160   : > { %6092 = vmatprep.subr.bf16.mxu1 %v7944_v55  ;;  %6113 = vmatmul.mubr.bf16.vlgmr.msra.gmra.mrb[108].mxu0 %v5642_v18 }
 0x161   : > { %6123 = vmatpush3.bf16.xpose.msra.mxu0 %v5676_v42  ;;  %6124 = vmatprep.mubr.msk.bf16.mxu0 %vm6631_vm1, %v7944_v55  ;;  %v675_v50 = vpop.f32.mrb[60].mxu0  ;;  %v5643_v42 = vpack.c.bf16 %v660_v13, %v660_v13 }
 0x162   : > { %v677_v38 = vpop.f32.mrb[61].mxu0  ;;  %6134 = vmatprep.subr.bf16.mxu0 %v7944_v55  ;;  %v676_v8 = vadd.f32 %v675_v50, %v6830_v2 }
 0x163   : > { %v678_v28 = vadd.f32 %v677_v38, %v6825_v60  ;;  %v679_v7 = vpop.f32.mrb[62].mxu0  ;;  %v5645_v38 = vpack.c.bf16 %v670_v40, %v670_v40 }
 0x164   : > { %v681_v4 = vpop.f32.mrb[63].mxu0  ;;  %v5646_v11 = vpack.c.bf16 %v676_v8, %v676_v8 }
 0x165   : > { %v5678_v5 = vpack.c.bf16 %v678_v28, %v678_v28 }
 0x166   : > { %6083 = vmatmul.mubr.bf16.vlgmr.msra.gmra.mrb[80].mxu1 %v5637_v53  ;;  %v682_v53 = vadd.f32 %v681_v4, %v6825_v60 }
 0x167   : > { %6093 = vmatpush3.bf16.xpose.msra.mxu1 %v5671_v26  ;;  %6094 = vmatprep.mubr.msk.bf16.mxu1 %vm6631_vm1, %v7944_v55 }
 0x168   : > { %6104 = vmatprep.subr.bf16.mxu1 %v7944_v55  ;;  %6125 = vmatmul.mubr.bf16.vlgmr.msra.gmra.mrb[112].mxu0 %v5644_v1  ;;  %v5679_v26 = vpack.c.bf16 %v682_v53, %v682_v53  ;;  %v680_v1 = vadd.f32 %v679_v7, %v6830_v2 }
 0x169   : > { %6135 = vmatpush3.bf16.xpose.msra.mxu0 %v5678_v5  ;;  %6136 = vmatprep.mubr.msk.bf16.mxu0 %vm6631_vm1, %v7944_v55  ;;  %v7094_v20 = vpop.f32.mrb[64].mxu0 }
 0x16a   : > { %6146 = vmatprep.subr.bf16.mxu0 %v7944_v55  ;;  %v718_v25 = vpop.f32.mrb[65].mxu0  ;;  %v5647_v5 = vpack.c.bf16 %v680_v1, %v680_v1 }
 0x16b   : > { %v719_v9 = vadd.f32 %v718_v25, %v7097_v30  ;;  %v7102_v32 = vpop.f32.mrb[66].mxu0 }
 0x16c   : > { %v721_v6 = vpop.f32.mrb[67].mxu0 }
 0x16d   : > { %v5680_v59 = vpack.c.bf16 %v719_v9, %v719_v9  ;;  %v722_v28 = vadd.f32 %v721_v6, %v7097_v30 }
 0x16e   : > { %6095 = vmatmul.mubr.bf16.vlgmr.msra.gmra.mrb[84].mxu1 %v5639_v46 }
 0x16f   : > { %6105 = vmatpush3.bf16.xpose.msra.mxu1 %v5673_v0  ;;  %6106 = vmatprep.mubr.msk.bf16.mxu1 %vm6631_vm1, %v7944_v55  ;;  %v2899_v10 = vsel %vm2897_vm2, %v5680_v59, 0  ;;  %v5681_v48 = vpack.c.bf16 %v722_v28, %v722_v28 }
 0x170   : > { %6116 = vmatprep.subr.bf16.mxu1 %v7944_v55  ;;  %6137 = vmatmul.mubr.bf16.vlgmr.msra.gmra.mrb[116].mxu0 %v5646_v11 }
 0x171   : > { %6148 = vmatprep.mubr.msk.bf16.mxu0 %vm6631_vm1, %v7944_v55  ;;  %v7108_v18 = vpop.f32.mrb[68].mxu0  ;;  %6147 = vmatpush3.bf16.msra.mxu0 %v2899_v10  ;;  %v2945_v15 = vsel %vm2897_vm2, %v5681_v48, 0 }
 0x172   : > { %v7111_v62 = vpop.f32.mrb[69].mxu0  ;;  %6158 = vmatprep.subr.bf16.mxu0 %v7944_v55 }
 0x173   : > { %v7113_v47 = vpop.f32.mrb[70].mxu0 }
 0x174   : > { %v7115_v50 = vpop.f32.mrb[71].mxu0 }
 0x176   : > { %6107 = vmatmul.mubr.bf16.vlgmr.msra.gmra.mrb[88].mxu1 %v5641_v17 }
 0x177   : > { %6117 = vmatpush3.bf16.xpose.msra.mxu1 %v5675_v23  ;;  %6118 = vmatprep.mubr.msk.bf16.mxu1 %vm6631_vm1, %v7944_v55 }
 0x178   : > { %6128 = vmatprep.subr.bf16.mxu1 %v7944_v55 }
 0x17e   : > { %6119 = vmatmul.mubr.bf16.vlgmr.msra.gmra.mrb[92].mxu1 %v5643_v42 }
 0x17f   : > { %6129 = vmatpush3.bf16.xpose.msra.mxu1 %v5677_v44  ;;  %6130 = vmatprep.mubr.msk.bf16.mxu1 %vm6631_vm1, %v7944_v55 }
 0x180   : > { %6140 = vmatprep.subr.bf16.mxu1 %v7944_v55 }
 0x186   : > { %6131 = vmatmul.mubr.bf16.vlgmr.msra.gmra.mrb[96].mxu1 %v5645_v38 }
 0x187   : > { %6141 = vmatpush3.bf16.xpose.msra.mxu1 %v5679_v26  ;;  %6142 = vmatprep.mubr.msk.bf16.mxu1 %vm6631_vm1, %v7944_v55 }
 0x188   : > { %6152 = vmatprep.subr.bf16.mxu1 %v7944_v55 }
 0x18e   : > { %6143 = vmatmul.mubr.bf16.vlgmr.msra.gmra.mrb[100].mxu1 %v5647_v5 }
 0x18f   : > { %6153 = vmatpush3.bf16.msra.mxu1 %v2945_v15  ;;  %6154 = vmatprep.mubr.msk.bf16.mxu1 %vm6631_vm1, %v7944_v55 }
 0x190   : > { %6164 = vmatprep.subr.bf16.mxu1 %v7944_v55 }
 0x1c9   : > { %v1231_v60 = vpop.f32.mrb[24].mxu1 }
 0x1ca   : > { %v7133_v2 = vmul.f32 0.17677669, %v1231_v60  ;;  %v5958_v7 = vpop.f32.mrb[25].mxu1 }
 0x1cb   : > { %v1234_v4 = vpop.f32.mrb[26].mxu1 }
 0x1cc   : > { %v5959_v33 = vpop.f32.mrb[27].mxu1  ;;  %v2510_v8 = vsel %vm2509_vm3, %v7133_v2, -inf }
 0x1cd   : > { %2511 = vmax.xlane.f32.xlu0 %v2510_v8 }
 0x1d1   : > { %v1271_v46 = vpop.f32.mrb[28].mxu1 }
 0x1d2   : > { %v7137_v0 = vmul.f32 0.17677669, %v1271_v46  ;;  %v5964_v11 = vpop.f32.mrb[29].mxu1 }
 0x1d3   : > { %v1274_v51 = vpop.f32.mrb[30].mxu1 }
 0x1d4   : > { %v5965_v56 = vpop.f32.mrb[31].mxu1  ;;  %v2513_v35 = vsel %vm2509_vm3, %v7137_v0, -inf }
 0x1d5   : > { %2514 = vmax.xlane.f32.xlu0 %v2513_v35 }
 0x1d9   : > { %v1311_v17 = vpop.f32.mrb[32].mxu1 }
 0x1da   : > { %v7141_v23 = vmul.f32 0.17677669, %v1311_v17  ;;  %v5970_v25 = vpop.f32.mrb[33].mxu1 }
 0x1db   : > { %v1314_v13 = vpop.f32.mrb[34].mxu1 }
 0x1dc   : > { %v2516_v9 = vsel %vm2509_vm3, %v7141_v23, -inf  ;;  %v5971_v57 = vpop.f32.mrb[35].mxu1 }
 0x1dd   : > { %2517 = vmax.xlane.f32.xlu1 %v2516_v9 }
 0x1e1   : > { %v1351_v6 = vpop.f32.mrb[36].mxu1 }
 0x1e2   : > { %v7145_v59 = vmul.f32 0.17677669, %v1351_v6  ;;  %v5976_v42 = vpop.f32.mrb[37].mxu1 }
 0x1e3   : > { %v1354_v10 = vpop.f32.mrb[38].mxu1 }
 0x1e4   : > { %v2519_v44 = vsel %vm2509_vm3, %v7145_v59, -inf  ;;  %v5977_v40 = vpop.f32.mrb[39].mxu1 }
 0x1e5   : > { %2520 = vmax.xlane.f32.xlu1 %v2519_v44 }
 0x1e9   : > { %v1391_v53 = vpop.f32.mrb[40].mxu1  ;;  %v1551_v38 = vpop.f32.mrb[72].mxu0 }
 0x1ea   : > { %v7149_v26 = vmul.f32 0.17677669, %v1391_v53  ;;  %v5982_v28 = vpop.f32.mrb[41].mxu1  ;;  %v6006_v1 = vpop.f32.mrb[73].mxu0  ;;  %v7159_v6 = vmul.f32 0.17677669, %v1551_v38 }
 0x1eb   : > { %v1394_v48 = vpop.f32.mrb[42].mxu1  ;;  %v1554_v5 = vpop.f32.mrb[74].mxu0 }
 0x1ec   : > { %v2522_v15 = vsel %vm2509_vm3, %v7149_v26, -inf  ;;  %v5983_v60 = vpop.f32.mrb[43].mxu1  ;;  %v6007_v7 = vpop.f32.mrb[75].mxu0  ;;  %v2534_v5 = vsel %vm2509_vm3, %v7159_v6, -inf }
 0x1ed   : > { %2523 = vmax.xlane.f32.xlu0 %v2522_v15 }
 0x1f1   : > { %v1431_v4 = vpop.f32.mrb[44].mxu1  ;;  %v1631_v33 = vpop.f32.mrb[76].mxu0 }
 0x1f2   : > { %v7153_v8 = vmul.f32 0.17677669, %v1431_v4  ;;  %v5988_v46 = vpop.f32.mrb[45].mxu1  ;;  %v6018_v11 = vpop.f32.mrb[77].mxu0  ;;  %v7163_v48 = vmul.f32 0.17677669, %v1631_v33 }
 0x1f3   : > { %v1434_v51 = vpop.f32.mrb[46].mxu1  ;;  %v1634_v56 = vpop.f32.mrb[78].mxu0 }
 0x1f4   : > { %v2525_v35 = vsel %vm2509_vm3, %v7153_v8, -inf  ;;  %v5989_v17 = vpop.f32.mrb[47].mxu1  ;;  %v6019_v25 = vpop.f32.mrb[79].mxu0  ;;  %v2540_v38 = vsel %vm2509_vm3, %v7163_v48, -inf }
 0x1f5   : > { %2526 = vmax.xlane.f32.xlu1 %v2525_v35 }
 0x1f9   : > { %v1471_v13 = vpop.f32.mrb[48].mxu1  ;;  %v1711_v9 = vpop.f32.mrb[80].mxu0 }
 0x1fa   : > { %v7157_v57 = vmul.f32 0.17677669, %v1471_v13  ;;  %v5994_v42 = vpop.f32.mrb[49].mxu1  ;;  %v6030_v10 = vpop.f32.mrb[81].mxu0  ;;  %v7171_v4 = vmul.f32 0.17677669, %v1711_v9 }
 0x1fb   : > { %v1474_v44 = vpop.f32.mrb[50].mxu1  ;;  %v1714_v40 = vpop.f32.mrb[82].mxu0 }
 0x1fc   : > { %v2528_v53 = vsel %vm2509_vm3, %v7157_v57, -inf  ;;  %v5995_v28 = vpop.f32.mrb[51].mxu1  ;;  %v6031_v1 = vpop.f32.mrb[83].mxu0  ;;  %v2546_v13 = vsel %vm2509_vm3, %v7171_v4, -inf }
 0x1fd   : > { %2529 = vmax.xlane.f32.xlu0 %v2528_v53 }
 0x201   : > { %2535 = vmax.xlane.f32.xlu0 %v2534_v5  ;;  %v1511_v15 = vpop.f32.mrb[52].mxu1  ;;  %v1791_v60 = vpop.f32.mrb[84].mxu0 }
 0x202   : > { %v7169_v7 = vmul.f32 0.17677669, %v1511_v15  ;;  %v6000_v46 = vpop.f32.mrb[53].mxu1  ;;  %v6042_v11 = vpop.f32.mrb[85].mxu0  ;;  %v7175_v25 = vmul.f32 0.17677669, %v1791_v60 }
 0x203   : > { %v1514_v51 = vpop.f32.mrb[54].mxu1  ;;  %v1794_v56 = vpop.f32.mrb[86].mxu0 }
 0x204   : > { %v2531_v33 = vsel %vm2509_vm3, %v7169_v7, -inf  ;;  %v6001_v35 = vpop.f32.mrb[55].mxu1  ;;  %v6043_v17 = vpop.f32.mrb[87].mxu0  ;;  %v2552_v10 = vsel %vm2509_vm3, %v7175_v25, -inf }
 0x205   : > { %2541 = vmax.xlane.f32.xlu0 %v2540_v38  ;;  %2532 = vmax.xlane.f32.xlu1 %v2531_v33 }
 0x209   : > { %2547 = vmax.xlane.f32.xlu0 %v2546_v13  ;;  %v1591_v42 = vpop.f32.mrb[56].mxu1  ;;  %v1871_v9 = vpop.f32.mrb[88].mxu0 }
 0x20a   : > { %v7181_v44 = vmul.f32 0.17677669, %v1591_v42  ;;  %v7183_v40 = vmul.f32 0.17677669, %v1871_v9  ;;  %v6012_v53 = vpop.f32.mrb[57].mxu1  ;;  %v6054_v28 = vpop.f32.mrb[89].mxu0 }
 0x20b   : > { %v1594_v1 = vpop.f32.mrb[58].mxu1  ;;  %v1874_v5 = vpop.f32.mrb[90].mxu0 }
 0x20c   : > { %v2537_v15 = vsel %vm2509_vm3, %v7181_v44, -inf  ;;  %v6013_v38 = vpop.f32.mrb[59].mxu1  ;;  %v6055_v60 = vpop.f32.mrb[91].mxu0  ;;  %v2558_v46 = vsel %vm2509_vm3, %v7183_v40, -inf }
 0x20d   : > { %2553 = vmax.xlane.f32.xlu0 %v2552_v10  ;;  %2538 = vmax.xlane.f32.xlu1 %v2537_v15 }
 0x211   : > { %v1951_v11 = vpop.f32.mrb[92].mxu0  ;;  %2559 = vmax.xlane.f32.xlu0 %v2558_v46  ;;  %v1671_v51 = vpop.f32.mrb[60].mxu1 }
 0x212   : > { %v7189_v56 = vmul.f32 0.17677669, %v1951_v11  ;;  %v7191_v33 = vmul.f32 0.17677669, %v1671_v51  ;;  %v6024_v35 = vpop.f32.mrb[61].mxu1  ;;  %v6066_v17 = vpop.f32.mrb[93].mxu0 }
 0x213   : > { %v1674_v13 = vpop.f32.mrb[62].mxu1  ;;  %v1954_v42 = vpop.f32.mrb[94].mxu0 }
 0x214   : > { %v2564_v9 = vsel %vm2509_vm3, %v7189_v56, -inf  ;;  %v2543_v10 = vsel %vm2509_vm3, %v7191_v33, -inf  ;;  %v6025_v53 = vpop.f32.mrb[63].mxu1  ;;  %v6067_v28 = vpop.f32.mrb[95].mxu0 }
 0x215   : > { %2565 = vmax.xlane.f32.xlu0 %v2564_v9  ;;  %2544 = vmax.xlane.f32.xlu1 %v2543_v10 }
 0x219   : > { %v1751_v1 = vpop.f32.mrb[64].mxu1  ;;  %v2031_v5 = vpop.f32.mrb[96].mxu0 }
 0x21a   : > { %v7197_v15 = vmul.f32 0.17677669, %v1751_v1  ;;  %v7199_v38 = vmul.f32 0.17677669, %v2031_v5  ;;  %v6036_v60 = vpop.f32.mrb[65].mxu1  ;;  %v6078_v46 = vpop.f32.mrb[97].mxu0 }
 0x21b   : > { %v1754_v11 = vpop.f32.mrb[66].mxu1  ;;  %v2034_v51 = vpop.f32.mrb[98].mxu0 }
 0x21c   : > { %v2570_v35 = vsel %vm2509_vm3, %v7199_v38, -inf  ;;  %v2549_v17 = vsel %vm2509_vm3, %v7197_v15, -inf  ;;  %v6037_v13 = vpop.f32.mrb[67].mxu1  ;;  %v6079_v42 = vpop.f32.mrb[99].mxu0 }
 0x21d   : > { %2571 = vmax.xlane.f32.xlu0 %v2570_v35  ;;  %2550 = vmax.xlane.f32.xlu1 %v2549_v17 }
 0x221   : > { %v1831_v9 = vpop.f32.mrb[68].mxu1  ;;  %v2111_v10 = vpop.f32.mrb[100].mxu0 }
 0x222   : > { %v7205_v53 = vmul.f32 0.17677669, %v1831_v9  ;;  %v7207_v28 = vmul.f32 0.17677669, %v2111_v10  ;;  %v6048_v1 = vpop.f32.mrb[69].mxu1  ;;  %v6090_v5 = vpop.f32.mrb[101].mxu0 }
 0x223   : > { %v1834_v60 = vpop.f32.mrb[70].mxu1  ;;  %v2114_v46 = vpop.f32.mrb[102].mxu0 }
 0x224   : > { %v2576_v11 = vsel %vm2509_vm3, %v7207_v28, -inf  ;;  %v2555_v51 = vsel %vm2509_vm3, %v7205_v53, -inf  ;;  %v6049_v13 = vpop.f32.mrb[71].mxu1  ;;  %v6091_v42 = vpop.f32.mrb[103].mxu0 }
 0x225   : > { %2577 = vmax.xlane.f32.xlu0 %v2576_v11  ;;  %2556 = vmax.xlane.f32.xlu1 %v2555_v51 }
 0x229   : > { %v1911_v35 = vpop.f32.mrb[72].mxu1 }
 0x22a   : > { %v7213_v17 = vmul.f32 0.17677669, %v1911_v35  ;;  %v6060_v9 = vpop.f32.mrb[73].mxu1 }
 0x22b   : > { %v1914_v10 = vpop.f32.mrb[74].mxu1  ;;  %v7215_v55 = vpop.f32.mrb[104].mxu0 }
 0x22c   : > { %v2561_v1 = vsel %vm2509_vm3, %v7213_v17, -inf  ;;  %v6061_v5 = vpop.f32.mrb[75].mxu1  ;;  %v6102_v60 = vpop.f32.mrb[105].mxu0 }
 0x22d   : > { %2562 = vmax.xlane.f32.xlu1 %v2561_v1  ;;  %v2194_v46 = vpop.f32.mrb[106].mxu0 }
 0x22e   : > { %v6103_v16 = vpop.f32.mrb[107].mxu0 }
 0x231   : > { %v1991_v12 = vpop.f32.mrb[76].mxu1 }
 0x232   : > { %v7219_v13 = vmul.f32 0.17677669, %v1991_v12  ;;  %v6072_v11 = vpop.f32.mrb[77].mxu1 }
 0x233   : > { %v1994_v51 = vpop.f32.mrb[78].mxu1  ;;  %v7221_v42 = vpop.f32.mrb[108].mxu0 }
 0x234   : > { %v2567_v35 = vsel %vm2509_vm3, %v7219_v13, -inf  ;;  %v6073_v9 = vpop.f32.mrb[79].mxu1  ;;  %v6114_v10 = vpop.f32.mrb[109].mxu0 }
 0x235   : > { %2568 = vmax.xlane.f32.xlu1 %v2567_v35  ;;  %v2274_v19 = vpop.f32.mrb[110].mxu0 }
 0x236   : > { %v6115_v14 = vpop.f32.mrb[111].mxu0 }
 0x239   : > { %v2071_v5 = vpop.f32.mrb[80].mxu1 }
 0x23a   : > { %v7225_v60 = vmul.f32 0.17677669, %v2071_v5  ;;  %v6084_v1 = vpop.f32.mrb[81].mxu1 }
 0x23b   : > { %v2074_v16 = vpop.f32.mrb[82].mxu1  ;;  %v7227_v46 = vpop.f32.mrb[112].mxu0 }
 0x23c   : > { %v2573_v12 = vsel %vm2509_vm3, %v7225_v60, -inf  ;;  %v6085_v11 = vpop.f32.mrb[83].mxu1  ;;  %v6126_v51 = vpop.f32.mrb[113].mxu0 }
 0x23d   : > { %2574 = vmax.xlane.f32.xlu1 %v2573_v12  ;;  %v2354_v63 = vpop.f32.mrb[114].mxu0 }
 0x23e   : > { %v6127_v58 = vpop.f32.mrb[115].mxu0 }
 0x241   : > { %v2151_v9 = vpop.f32.mrb[84].mxu1 }
 0x242   : > { %v7231_v10 = vmul.f32 0.17677669, %v2151_v9  ;;  %v6096_v19 = vpop.f32.mrb[85].mxu1 }
 0x243   : > { %v2154_v14 = vpop.f32.mrb[86].mxu1  ;;  %v7233_v35 = vpop.f32.mrb[116].mxu0 }
 0x244   : > { %v2579_v5 = vsel %vm2509_vm3, %v7231_v10, -inf  ;;  %v6097_v1 = vpop.f32.mrb[87].mxu1  ;;  %v6138_v16 = vpop.f32.mrb[117].mxu0 }
 0x245   : > { %2580 = vmax.xlane.f32.xlu1 %v2579_v5  ;;  %v2434_v3 = vpop.f32.mrb[118].mxu0 }
 0x246   : > { %v6139_v52 = vpop.f32.mrb[119].mxu0 }
 0x249   : > { %v2231_v11 = vpop.f32.mrb[88].mxu1 }
 0x24a   : > { %v6108_v51 = vpop.f32.mrb[89].mxu1 }
 0x24b   : > { %v2234_v12 = vpop.f32.mrb[90].mxu1 }
 0x24c   : > { %v6109_v63 = vpop.f32.mrb[91].mxu1 }
 0x251   : > { %v2311_v58 = vpop.f32.mrb[92].mxu1 }
 0x252   : > { %v6120_v61 = vpop.f32.mrb[93].mxu1 }
 0x253   : > { %v2314_v9 = vpop.f32.mrb[94].mxu1 }
 0x254   : > { %v6121_v54 = vpop.f32.mrb[95].mxu1 }
 0x255   : > { %v7244_v54 = vmul.f32 0.17677669, %v7215_v55 }
 0x257   : > { %v2582_v9 = vsel %vm2509_vm3, %v7244_v54, -inf }
 0x259   : > { %v7237_v19 = vpop.f32.mrb[96].mxu1 }
 0x25a   : > { %v2512_v14 = vpop.xlane.xlu0 %2511  ;;  %v6132_v45 = vpop.f32.mrb[97].mxu1 }
 0x25b   : > { %v2606_v41 = vsub.f32 %v7133_v2, %v2512_v14  ;;  %v2394_v49 = vpop.f32.mrb[98].mxu1  ;;  %v7253_v14 = vmul.f32 0.17677669, %v2231_v11 }
 0x25c   : > { %v6133_v1 = vpop.f32.mrb[99].mxu1 }
 0x25d   : > { %v2638_v16 = vmul.f32 1.442695, %v2606_v41 }
 0x25f   : > { %6493 = vpow2.f32 %v2638_v16 }
 0x261   : > { %v7240_v3 = vpop.f32.mrb[100].mxu1 }
 0x262   : > { %v2515_v52 = vpop.xlane.xlu0 %2514  ;;  %v6144_v5 = vpop.f32.mrb[101].mxu1 }
 0x263   : > { %v2607_v51 = vsub.f32 %v7137_v0, %v2515_v52  ;;  %v2474_v12 = vpop.f32.mrb[102].mxu1 }
 0x264   : > { %v6145_v61 = vpop.f32.mrb[103].mxu1 }
 0x265   : > { %v2640_v63 = vmul.f32 1.442695, %v2607_v51  ;;  %v7263_v51 = vmul.f32 0.17677669, %v7221_v42 }
 0x267   : > { %6495 = vpow2.f32 %v2640_v63 }
 0x269   : > { %v7246_v45 = vpop.eup %6493 }
 0x26a   : > { %v2518_v2 = vpop.xlane.xlu1 %2517  ;;  %v2702_v41 = vsel %vm2509_vm3, %v7246_v45, 0.0 }
 0x26b   : > { %v2608_v49 = vsub.f32 %v7141_v23, %v2518_v2  ;;  %2703 = vadd.xlane.f32.xlu0 %v2702_v41  ;;  %v2585_v23 = vsel %vm2509_vm3, %v7253_v14, -inf  ;;  %v7272_v41 = vmul.f32 0.17677669, %v2311_v58 }
 0x26d   : > { %v2642_v0 = vmul.f32 1.442695, %v2608_v49 }
 0x26f   : > { %6497 = vpow2.f32 %v2642_v0  ;;  %2583 = vmax.xlane.f32.xlu0 %v2582_v9 }
 0x271   : > { %v7255_v1 = vpop.eup %6495 }
 0x272   : > { %v2521_v55 = vpop.xlane.xlu1 %2520  ;;  %v2705_v16 = vsel %vm2509_vm3, %v7255_v1, 0.0 }
 0x273   : > { %v2609_v52 = vsub.f32 %v7145_v59, %v2521_v55  ;;  %2706 = vadd.xlane.f32.xlu1 %v2705_v16  ;;  %v2588_v59 = vsel %vm2509_vm3, %v7263_v51, -inf  ;;  %v7282_v16 = vmul.f32 0.17677669, %v7227_v46 }
 0x275   : > { %v2644_v5 = vmul.f32 1.442695, %v2609_v52 }
 0x277   : > { %6499 = vpow2.f32 %v2644_v5  ;;  %2586 = vmax.xlane.f32.xlu1 %v2585_v23 }
 0x279   : > { %v7265_v11 = vpop.eup %6497 }
 0x27a   : > { %v2524_v12 = vpop.xlane.xlu0 %2523  ;;  %v2708_v61 = vsel %vm2509_vm3, %v7265_v11, 0.0 }
 0x27b   : > { %v2610_v63 = vsub.f32 %v7149_v26, %v2524_v12  ;;  %2709 = vadd.xlane.f32.xlu0 %v2708_v61  ;;  %v2591_v26 = vsel %vm2509_vm3, %v7272_v41, -inf }
 0x27d   : > { %v2646_v2 = vmul.f32 1.442695, %v2610_v63 }
 0x27f   : > { %6501 = vpow2.f32 %v2646_v2  ;;  %2589 = vmax.xlane.f32.xlu0 %v2588_v59 }
 0x281   : > { %v7274_v49 = vpop.eup %6499 }
 0x282   : > { %v2527_v42 = vpop.xlane.xlu1 %2526  ;;  %v2711_v9 = vsel %vm2509_vm3, %v7274_v49, 0.0 }
 0x283   : > { %v2611_v0 = vsub.f32 %v7153_v8, %v2527_v42  ;;  %2712 = vadd.xlane.f32.xlu1 %v2711_v9  ;;  %v2594_v8 = vsel %vm2509_vm3, %v7282_v16, -inf }
 0x285   : > { %v2648_v55 = vmul.f32 1.442695, %v2611_v0 }
 0x287   : > { %6503 = vpow2.f32 %v2648_v55  ;;  %2592 = vmax.xlane.f32.xlu1 %v2591_v26 }
 0x289   : > { %v7284_v58 = vpop.eup %6501 }
 0x28a   : > { %v2530_v52 = vpop.xlane.xlu0 %2529  ;;  %v2714_v23 = vsel %vm2509_vm3, %v7284_v58, 0.0 }
 0x28b   : > { %v2612_v5 = vsub.f32 %v7157_v57, %v2530_v52  ;;  %2715 = vadd.xlane.f32.xlu0 %v2714_v23  ;;  %v7297_v57 = vmul.f32 0.17677669, %v7237_v19 }
 0x28d   : > { %v2650_v12 = vmul.f32 1.442695, %v2612_v5  ;;  %v2597_v23 = vsel %vm2509_vm3, %v7297_v57, -inf }
 0x28e   : > { %v2536_v61 = vpop.xlane.xlu0 %2535 }
 0x28f   : > { %6505 = vpow2.f32 %v2650_v12  ;;  %v2614_v63 = vsub.f32 %v7159_v6, %v2536_v61  ;;  %2595 = vmax.xlane.f32.xlu0 %v2594_v8 }
 0x291   : > { %v7292_v46 = vpop.eup %6503  ;;  %v2654_v59 = vmul.f32 1.442695, %v2614_v63 }
 0x292   : > { %v2542_v2 = vpop.xlane.xlu0 %2541  ;;  %v2533_v42 = vpop.xlane.xlu1 %2532  ;;  %v2717_v9 = vsel %vm2509_vm3, %v7292_v46, 0.0 }
 0x293   : > { %v2616_v0 = vsub.f32 %v7163_v48, %v2542_v2  ;;  %v2613_v26 = vsub.f32 %v7169_v7, %v2533_v42  ;;  %2718 = vadd.xlane.f32.xlu1 %v2717_v9  ;;  %6507 = vpow2.f32 %v2654_v59  ;;  %v7307_v7 = vmul.f32 0.17677669, %v7233_v35 }
 0x295   : > { %v2658_v55 = vmul.f32 1.442695, %v2616_v0  ;;  %v2652_v6 = vmul.f32 1.442695, %v2613_v26  ;;  %v2600_v9 = vsel %vm2509_vm3, %v7307_v7, -inf }
 0x296   : > { %v2548_v52 = vpop.xlane.xlu0 %2547 }
 0x297   : > { %v2618_v5 = vsub.f32 %v7171_v4, %v2548_v52  ;;  %2598 = vmax.xlane.f32.xlu1 %v2597_v23  ;;  %6509 = vpow2.f32 %v2652_v6 }
 0x298   : > { %6511 = vpow2.f32 %v2658_v55 }
 0x299   : > { %v7304_v8 = vpop.eup %6505  ;;  %v2662_v19 = vmul.f32 1.442695, %v2618_v5 }
 0x29a   : > { %v2554_v12 = vpop.xlane.xlu0 %2553  ;;  %v2539_v48 = vpop.xlane.xlu1 %2538  ;;  %v2720_v61 = vsel %vm2509_vm3, %v7304_v8, 0.0 }
 0x29b   : > { %v2620_v63 = vsub.f32 %v7175_v25, %v2554_v12  ;;  %v2615_v59 = vsub.f32 %v7181_v44, %v2539_v48  ;;  %2721 = vadd.xlane.f32.xlu0 %v2720_v61  ;;  %6513 = vpow2.f32 %v2662_v19  ;;  %v7329_v19 = vmul.f32 0.17677669, %v7240_v3 }
 0x29d   : > { %v2666_v4 = vmul.f32 1.442695, %v2620_v63  ;;  %v2656_v2 = vmul.f32 1.442695, %v2615_v59  ;;  %v7315_v0 = vpop.eup %6507 }
 0x29e   : > { %v2560_v42 = vpop.xlane.xlu0 %2559  ;;  %v2726_v6 = vsel %vm2509_vm3, %v7315_v0, 0.0 }
 0x29f   : > { %v2622_v35 = vsub.f32 %v7183_v40, %v2560_v42  ;;  %2601 = vmax.xlane.f32.xlu0 %v2600_v9  ;;  %6515 = vpow2.f32 %v2656_v2 }
 0x2a0   : > { %6517 = vpow2.f32 %v2666_v4 }
 0x2a1   : > { %v2670_v26 = vmul.f32 1.442695, %v2622_v35  ;;  %v7318_v55 = vpop.eup %6509 }
 0x2a2   : > { %v2566_v25 = vpop.xlane.xlu0 %2565  ;;  %v2545_v44 = vpop.xlane.xlu1 %2544  ;;  %v2723_v40 = vsel %vm2509_vm3, %v7318_v55, 0.0 }
 0x2a3   : > { %v7322_v52 = vpop.eup %6511  ;;  %v2624_v23 = vsub.f32 %v7189_v56, %v2566_v25  ;;  %v2617_v5 = vsub.f32 %v7191_v33, %v2545_v44  ;;  %2727 = vadd.xlane.f32.xlu0 %v2726_v6  ;;  %2724 = vadd.xlane.f32.xlu1 %v2723_v40  ;;  %6519 = vpow2.f32 %v2670_v26  ;;  %v2603_v56 = vsel %vm2509_vm3, %v7329_v19, -inf }
 0x2a4   : > { %v2732_v61 = vsel %vm2509_vm3, %v7322_v52, 0.0 }
 0x2a5   : > { %v2674_v12 = vmul.f32 1.442695, %v2624_v23  ;;  %v2660_v48 = vmul.f32 1.442695, %v2617_v5  ;;  %v7333_v63 = vpop.eup %6513 }
 0x2a6   : > { %v2738_v4 = vsel %vm2509_vm3, %v7333_v63, 0.0 }
 0x2a7   : > { %2733 = vadd.xlane.f32.xlu0 %v2732_v61  ;;  %6521 = vpow2.f32 %v2660_v48  ;;  %2604 = vmax.xlane.f32.xlu1 %v2603_v56 }
 0x2a8   : > { %6523 = vpow2.f32 %v2674_v12 }
 0x2a9   : > { %v7337_v33 = vpop.eup %6515 }
 0x2aa   : > { %v2572_v3 = vpop.xlane.xlu0 %2571  ;;  %v2551_v59 = vpop.xlane.xlu1 %2550  ;;  %v2729_v35 = vsel %vm2509_vm3, %v7337_v33, 0.0 }
 0x2ab   : > { %v7341_v2 = vpop.eup %6517  ;;  %v2626_v42 = vsub.f32 %v7199_v38, %v2572_v3  ;;  %v2619_v9 = vsub.f32 %v7197_v15, %v2551_v59  ;;  %2739 = vadd.xlane.f32.xlu0 %v2738_v4  ;;  %2730 = vadd.xlane.f32.xlu1 %v2729_v35 }
 0x2ac   : > { %v2744_v44 = vsel %vm2509_vm3, %v7341_v2, 0.0 }
 0x2ad   : > { %v2678_v26 = vmul.f32 1.442695, %v2626_v42  ;;  %v2664_v25 = vmul.f32 1.442695, %v2619_v9  ;;  %v7349_v6 = vpop.eup %6519 }
 0x2ae   : > { %v2750_v15 = vsel %vm2509_vm3, %v7349_v6, 0.0 }
 0x2af   : > { %6525 = vpow2.f32 %v2678_v26  ;;  %2745 = vadd.xlane.f32.xlu0 %v2744_v44 }
 0x2b0   : > { %6527 = vpow2.f32 %v2664_v25 }
 0x2b1   : > { %v7351_v23 = vpop.eup %6521 }
 0x2b2   : > { %v2578_v38 = vpop.xlane.xlu0 %2577  ;;  %v2557_v5 = vpop.xlane.xlu1 %2556  ;;  %v2735_v61 = vsel %vm2509_vm3, %v7351_v23, 0.0 }
 0x2b3   : > { %v7355_v40 = vpop.eup %6523  ;;  %v2628_v12 = vsub.f32 %v7207_v28, %v2578_v38  ;;  %v2621_v48 = vsub.f32 %v7205_v53, %v2557_v5  ;;  %2751 = vadd.xlane.f32.xlu0 %v2750_v15  ;;  %2736 = vadd.xlane.f32.xlu1 %v2735_v61 }
 0x2b4   : > { %v2756_v59 = vsel %vm2509_vm3, %v7355_v40, 0.0 }
 0x2b5   : > { %v2682_v56 = vmul.f32 1.442695, %v2628_v12  ;;  %v2668_v3 = vmul.f32 1.442695, %v2621_v48 }
 0x2b7   : > { %6529 = vpow2.f32 %v2682_v56  ;;  %2757 = vadd.xlane.f32.xlu0 %v2756_v59 }
 0x2b8   : > { %6531 = vpow2.f32 %v2668_v3 }
 0x2b9   : > { %v7363_v4 = vpop.eup %6525 }
 0x2ba   : > { %v7365_v42 = vpop.eup %6527  ;;  %v2563_v28 = vpop.xlane.xlu1 %2562  ;;  %v2762_v53 = vsel %vm2509_vm3, %v7363_v4, 0.0 }
 0x2bb   : > { %v2623_v9 = vsub.f32 %v7213_v17, %v2563_v28  ;;  %2763 = vadd.xlane.f32.xlu0 %v2762_v53  ;;  %v2741_v35 = vsel %vm2509_vm3, %v7365_v42, 0.0 }
 0x2bc   : > { %2742 = vadd.xlane.f32.xlu1 %v2741_v35 }
 0x2bd   : > { %v2672_v26 = vmul.f32 1.442695, %v2623_v9 }
 0x2bf   : > { %6533 = vpow2.f32 %v2672_v26 }
 0x2c1   : > { %v7372_v25 = vpop.eup %6529 }
 0x2c2   : > { %v7374_v44 = vpop.eup %6531  ;;  %v2569_v38 = vpop.xlane.xlu1 %2568  ;;  %v2768_v5 = vsel %vm2509_vm3, %v7372_v25, 0.0 }
 0x2c3   : > { %v2625_v15 = vsub.f32 %v7219_v13, %v2569_v38  ;;  %2769 = vadd.xlane.f32.xlu0 %v2768_v5  ;;  %v2747_v17 = vsel %vm2509_vm3, %v7374_v44, 0.0 }
 0x2c4   : > { %2748 = vadd.xlane.f32.xlu1 %v2747_v17 }
 0x2c5   : > { %v2676_v12 = vmul.f32 1.442695, %v2625_v15 }
 0x2c7   : > { %6535 = vpow2.f32 %v2676_v12 }
 0x2c9   : > { %v7381_v48 = vpop.eup %6533 }
 0x2ca   : > { %v2575_v61 = vpop.xlane.xlu1 %2574  ;;  %v2753_v56 = vsel %vm2509_vm3, %v7381_v48, 0.0 }
 0x2cb   : > { %v2627_v3 = vsub.f32 %v7225_v60, %v2575_v61  ;;  %2754 = vadd.xlane.f32.xlu1 %v2753_v56  ;;  %v727_v61 = vadd.f32 %v7094_v20, %v7097_v30  ;;  %v730_v20 = vadd.f32 %v7102_v32, %v7097_v30 }
 0x2cd   : > { %v2680_v59 = vmul.f32 1.442695, %v2627_v3 }
 0x2cf   : > { %6537 = vpow2.f32 %v2680_v59  ;;  %v5682_v59 = vpack.c.bf16 %v727_v61, %v727_v61 }
 0x2d1   : > { %v7386_v28 = vpop.eup %6535 }
 0x2d2   : > { %v2581_v13 = vpop.xlane.xlu1 %2580  ;;  %v2759_v53 = vsel %vm2509_vm3, %v7386_v28, 0.0 }
 0x2d3   : > { %v2629_v9 = vsub.f32 %v7231_v10, %v2581_v13  ;;  %2760 = vadd.xlane.f32.xlu1 %v2759_v53 }
 0x2d5   : > { %v2684_v35 = vmul.f32 1.442695, %v2629_v9 }
 0x2d7   : > { %6539 = vpow2.f32 %v2684_v35 }
 0x2d9   : > { %v7391_v26 = vpop.eup %6537 }
 0x2da   : > { %v2765_v38 = vsel %vm2509_vm3, %v7391_v26, 0.0 }
 0x2db   : > { %2766 = vadd.xlane.f32.xlu1 %v2765_v38 }
 0x2e1   : > { %v7395_v60 = vpop.eup %6539 }
 0x2e2   : > { %v2771_v5 = vsel %vm2509_vm3, %v7395_v60, 0.0 }
 0x2e3   : > { %2772 = vadd.xlane.f32.xlu1 %v2771_v5  ;;  %v2991_v5 = vsel %vm2897_vm2, %v5682_v59, 0 }
 0x2f8   : > { %v2704_v15 = vpop.xlane.xlu0 %2703 }
 0x2f9   : > { %6541 = vrcp.f32 %v2704_v15  ;;  %v7959_v15 = vmov 0.0  }
 0x2fc   : > { %v2584_v17 = vpop.xlane.xlu0 %2583 }
 0x2fd   : > { %v2630_v10 = vsub.f32 %v7244_v54, %v2584_v17 }
 0x2ff   : > { %v2686_v12 = vmul.f32 1.442695, %v2630_v10 }
 0x300   : > { %v2707_v56 = vpop.xlane.xlu1 %2706 }
 0x301   : > { %6543 = vpow2.f32 %v2686_v12  ;;  %v5683_v12 = vpack.c.bf16 %v730_v20, %v730_v20 }
 0x302   : > { %6545 = vrcp.f32 %v2707_v56 }
 0x303   : > { %v6542_v3 = vpop.eup %6541 }
 0x304   : > { %v2799_v13 = vmul.f32 %v6542_v3, %v7246_v45  ;;  %v2587_v53 = vpop.xlane.xlu1 %2586 }
 0x305   : > { %v2631_v9 = vsub.f32 %v7253_v14, %v2587_v53  ;;  %v735_v53 = vadd.f32 %v7111_v62, %v7097_v30 }
 0x306   : > { %v2862_v35 = vpack.c.bf16 %v2799_v13, %v2799_v13  ;;  %v3037_v13 = vsel %vm2897_vm2, %v5683_v12, 0 }
 0x307   : > { %v2688_v38 = vmul.f32 1.442695, %v2631_v9 }
 0x308   : > { %6149 = vmatmul.mubr.msk.bf16.vlgmr.msra.gmra.mrb[120].mxu0 %vm2509_vm3, %v2862_v35  ;;  %v2710_v54 = vpop.xlane.xlu0 %2709 }
 0x309   : > { %6547 = vpow2.f32 %v2688_v38  ;;  %6159 = vmatpush3.bf16.msra.mxu0 %v2991_v5  ;;  %6160 = vmatprep.mubr.msk.bf16.mxu0 %vm6631_vm1, %v7959_v15  ;;  %v5684_v38 = vpack.c.bf16 %v735_v53, %v735_v53  ;;  %v743_v53 = vadd.f32 %v7108_v18, %v7097_v30 }
 0x30a   : > { %6549 = vrcp.f32 %v2710_v54  ;;  %6170 = vmatprep.subr.bf16.mxu0 %v7959_v15 }
 0x30b   : > { %v7411_v45 = vpop.eup %6543  ;;  %v5686_v18 = vpack.c.bf16 %v743_v53, %v743_v53 }
 0x30c   : > { %v6546_v14 = vpop.eup %6545  ;;  %v2590_v17 = vpop.xlane.xlu0 %2589  ;;  %v2774_v10 = vsel %vm2509_vm3, %v7411_v45, 0.0 }
 0x30d   : > { %v2801_v61 = vmul.f32 %v6546_v14, %v7255_v1  ;;  %v2632_v32 = vsub.f32 %v7263_v51, %v2590_v17  ;;  %2775 = vadd.xlane.f32.xlu0 %v2774_v10  ;;  %v3083_v17 = vsel %vm2897_vm2, %v5684_v38, 0  ;;  %v738_v10 = vadd.f32 %v7115_v50, %v7097_v30 }
 0x30f   : > { %v2690_v56 = vmul.f32 1.442695, %v2632_v32  ;;  %v2863_v3 = vpack.c.bf16 %v2801_v61, %v2801_v61  ;;  %v5685_v32 = vpack.c.bf16 %v738_v10, %v738_v10 }
 0x310   : > { %v2713_v59 = vpop.xlane.xlu1 %2712 }
 0x311   : > { %6551 = vpow2.f32 %v2690_v56  ;;  %6155 = vmatmul.mubr.msk.bf16.vlgmr.msra.gmra.mrb[104].mxu1 %vm2509_vm3, %v2863_v3 }
 0x312   : > { %6165 = vmatpush3.bf16.msra.mxu1 %v3037_v13  ;;  %6553 = vrcp.f32 %v2713_v59  ;;  %6166 = vmatprep.mubr.msk.bf16.mxu1 %vm6631_vm1, %v7959_v15 }
 0x313   : > { %v7423_v1 = vpop.eup %6547  ;;  %6176 = vmatprep.subr.bf16.mxu1 %v7959_v15 }
 0x314   : > { %v6550_v51 = vpop.eup %6549  ;;  %v2593_v9 = vpop.xlane.xlu1 %2592  ;;  %v2777_v35 = vsel %vm2509_vm3, %v7423_v1, 0.0 }
 0x315   : > { %v2803_v62 = vmul.f32 %v6550_v51, %v7265_v11  ;;  %v2633_v5 = vsub.f32 %v7272_v41, %v2593_v9  ;;  %2778 = vadd.xlane.f32.xlu1 %v2777_v35  ;;  %v3129_v51 = vsel %vm2897_vm2, %v5685_v32, 0 }
 0x317   : > { %v2692_v54 = vmul.f32 1.442695, %v2633_v5  ;;  %v2864_v20 = vpack.c.bf16 %v2803_v62, %v2803_v62 }
 0x318   : > { %v2716_v14 = vpop.xlane.xlu0 %2715 }
 0x319   : > { %6555 = vpow2.f32 %v2692_v54  ;;  %6161 = vmatmul.mubr.msk.bf16.vlgmr.msra.gmra.mrb[124].mxu0 %vm2509_vm3, %v2864_v20 }
 0x31a   : > { %6171 = vmatpush3.bf16.msra.mxu0 %v3083_v17  ;;  %6557 = vrcp.f32 %v2716_v14  ;;  %6172 = vmatprep.mubr.msk.bf16.mxu0 %vm6631_vm1, %v7959_v15  ;;  %v3175_v14 = vsel %vm2897_vm2, %v5686_v18, 0  ;;  %v746_v17 = vadd.f32 %v7113_v47, %v7097_v30 }
 0x31b   : > { %v7436_v11 = vpop.eup %6551  ;;  %6182 = vmatprep.subr.bf16.mxu0 %v7959_v15 }
 0x31c   : > { %v6554_v41 = vpop.eup %6553  ;;  %v2596_v12 = vpop.xlane.xlu0 %2595  ;;  %v2780_v61 = vsel %vm2509_vm3, %v7436_v11, 0.0 }
 0x31d   : > { %v2805_v50 = vmul.f32 %v6554_v41, %v7274_v49  ;;  %v2634_v56 = vsub.f32 %v7282_v16, %v2596_v12  ;;  %2781 = vadd.xlane.f32.xlu0 %v2780_v61  ;;  %v5687_v12 = vpack.c.bf16 %v746_v17, %v746_v17 }
 0x31f   : > { %v2694_v3 = vmul.f32 1.442695, %v2634_v56  ;;  %v2865_v59 = vpack.c.bf16 %v2805_v50, %v2805_v50 }
 0x320   : > { %v2719_v13 = vpop.xlane.xlu1 %2718 }
 0x321   : > { %6559 = vpow2.f32 %v2694_v3  ;;  %6167 = vmatmul.mubr.msk.bf16.vlgmr.msra.gmra.mrb[108].mxu1 %vm2509_vm3, %v2865_v59  ;;  %v751_v3 = vadd.f32 %v6846_v22, %v7097_v30  ;;  %v3221_v59 = vsel %vm2897_vm2, %v5687_v12, 0 }
 0x322   : > { %6177 = vmatpush3.bf16.msra.mxu1 %v3129_v51  ;;  %6561 = vrcp.f32 %v2719_v13  ;;  %6178 = vmatprep.mubr.msk.bf16.mxu1 %vm6631_vm1, %v7959_v15 }
 0x323   : > { %v7449_v49 = vpop.eup %6555  ;;  %6188 = vmatprep.subr.bf16.mxu1 %v7959_v15  ;;  %v5688_v51 = vpack.c.bf16 %v751_v3, %v751_v3  ;;  %v762_v3 = vadd.f32 %v6850_v24, %v7097_v30 }
 0x324   : > { %v6558_v16 = vpop.eup %6557  ;;  %v2599_v9 = vpop.xlane.xlu1 %2598  ;;  %v2783_v35 = vsel %vm2509_vm3, %v7449_v49, 0.0 }
 0x325   : > { %v2807_v38 = vmul.f32 %v6558_v16, %v7284_v58  ;;  %v2635_v62 = vsub.f32 %v7297_v57, %v2599_v9  ;;  %2784 = vadd.xlane.f32.xlu1 %v2783_v35 }
 0x327   : > { %v2696_v5 = vmul.f32 1.442695, %v2635_v62  ;;  %v2866_v54 = vpack.c.bf16 %v2807_v38, %v2807_v38  ;;  %v759_v62 = vadd.f32 %v6842_v21, %v7097_v30 }
 0x328   : > { %v2722_v20 = vpop.xlane.xlu0 %2721 }
 0x329   : > { %6563 = vpow2.f32 %v2696_v5  ;;  %6173 = vmatmul.mubr.msk.bf16.vlgmr.msra.gmra.mrb[128].mxu0 %vm2509_vm3, %v2866_v54  ;;  %v3267_v5 = vsel %vm2897_vm2, %v5688_v51, 0 }
 0x32a   : > { %6183 = vmatpush3.bf16.msra.mxu0 %v3175_v14  ;;  %6565 = vrcp.f32 %v2722_v20  ;;  %6184 = vmatprep.mubr.msk.bf16.mxu0 %vm6631_vm1, %v7959_v15  ;;  %v754_v20 = vadd.f32 %v6855_v27, %v7097_v30 }
 0x32b   : > { %v7462_v58 = vpop.eup %6559  ;;  %6194 = vmatprep.subr.bf16.mxu0 %v7959_v15 }
 0x32c   : > { %v6562_v57 = vpop.eup %6561  ;;  %v2602_v10 = vpop.xlane.xlu0 %2601  ;;  %v2786_v41 = vsel %vm2509_vm3, %v7462_v58, 0.0  ;;  %v5689_v27 = vpack.c.bf16 %v754_v20, %v754_v20 }
 0x32d   : > { %v2809_v47 = vmul.f32 %v6562_v57, %v7292_v46  ;;  %v2636_v61 = vsub.f32 %v7307_v7, %v2602_v10  ;;  %2787 = vadd.xlane.f32.xlu0 %v2786_v41  ;;  %v5690_v57 = vpack.c.bf16 %v759_v62, %v759_v62  ;;  %v770_v62 = vadd.f32 %v6867_v36, %v7097_v30 }
 0x32f   : > { %v2698_v32 = vmul.f32 1.442695, %v2636_v61  ;;  %v2867_v50 = vpack.c.bf16 %v2809_v47, %v2809_v47  ;;  %v5693_v20 = vpack.c.bf16 %v770_v62, %v770_v62 }
 0x330   : > { %v2728_v56 = vpop.xlane.xlu0 %2727  ;;  %v2725_v13 = vpop.xlane.xlu1 %2724 }
 0x331   : > { %6567 = vpow2.f32 %v2698_v32  ;;  %6179 = vmatmul.mubr.msk.bf16.vlgmr.msra.gmra.mrb[112].mxu1 %vm2509_vm3, %v2867_v50  ;;  %v3359_v32 = vsel %vm2897_vm2, %v5690_v57, 0  ;;  %v767_v50 = vadd.f32 %v6861_v31, %v7097_v30 }
 0x332   : > { %6569 = vrcp.f32 %v2728_v56  ;;  %6189 = vmatpush3.bf16.msra.mxu1 %v3221_v59  ;;  %6190 = vmatprep.mubr.msk.bf16.mxu1 %vm6631_vm1, %v7959_v15 }
 0x333   : > { %v7475_v46 = vpop.eup %6563  ;;  %6571 = vrcp.f32 %v2725_v13  ;;  %6200 = vmatprep.subr.bf16.mxu1 %v7959_v15  ;;  %v5692_v13 = vpack.c.bf16 %v767_v50, %v767_v50 }
 0x334   : > { %v6566_v7 = vpop.eup %6565  ;;  %v2734_v53 = vpop.xlane.xlu0 %2733  ;;  %v2789_v22 = vsel %vm2509_vm3, %v7475_v46, 0.0 }
 0x335   : > { %v2811_v16 = vmul.f32 %v6566_v7, %v7304_v8  ;;  %v2605_v9 = vpop.xlane.xlu1 %2604  ;;  %2790 = vadd.xlane.f32.xlu1 %v2789_v22  ;;  %6573 = vrcp.f32 %v2734_v53 }
 0x336   : > { %v2637_v35 = vsub.f32 %v7329_v19, %v2605_v9  ;;  %v775_v9 = vadd.f32 %v6857_v29, %v7097_v30 }
 0x337   : > { %v2868_v18 = vpack.c.bf16 %v2811_v16, %v2811_v16 }
 0x338   : > { %v2700_v38 = vmul.f32 1.442695, %v2637_v35  ;;  %v2740_v19 = vpop.xlane.xlu0 %2739  ;;  %v3451_v35 = vsel %vm2897_vm2, %v5692_v13, 0 }
 0x339   : > { %6185 = vmatmul.mubr.msk.bf16.vlgmr.msra.gmra.mrb[132].mxu0 %vm2509_vm3, %v2868_v18  ;;  %v2731_v54 = vpop.xlane.xlu1 %2730 }
 0x33a   : > { %6575 = vpow2.f32 %v2700_v38  ;;  %6195 = vmatpush3.bf16.msra.mxu0 %v3267_v5  ;;  %6196 = vmatprep.mubr.msk.bf16.mxu0 %vm6631_vm1, %v7959_v15 }
 0x33b   : > { %v7490_v8 = vpop.eup %6567  ;;  %6577 = vrcp.f32 %v2731_v54  ;;  %6206 = vmatprep.subr.bf16.mxu0 %v7959_v15  ;;  %v5694_v54 = vpack.c.bf16 %v775_v9, %v775_v9  ;;  %v7961_v9 = vld [vmem:[#allocation2_spill] sm:$0xff] }
 0x33c   : > { %v6570_v21 = vpop.eup %6569  ;;  %v2792_v14 = vsel %vm2509_vm3, %v7490_v8, 0.0  ;;  %6579 = vrcp.f32 %v2740_v19  ;;  %v2746_v59 = vpop.xlane.xlu0 %2745 }
 0x33d   : > { %v6572_v17 = vpop.eup %6571  ;;  %v2815_v10 = vmul.f32 %v6570_v21, %v7315_v0  ;;  %2793 = vadd.xlane.f32.xlu0 %v2792_v14  ;;  %v3313_v0 = vsel %vm2897_vm2, %v5689_v27, 0  ;;  %v3543_v14 = vsel %vm2897_vm2, %v5694_v54, 0 }
 0x33e   : > { %v2813_v41 = vmul.f32 %v6572_v17, %v7318_v55  ;;  %v783_v17 = vadd.f32 %v6874_v39, %v7097_v30 }
 0x33f   : > { %v2870_v12 = vpack.c.bf16 %v2815_v10, %v2815_v10  ;;  %v6574_v47 = vpop.eup %6573  ;;  %v778_v10 = vadd.f32 %v6865_v34, %v7097_v30 }
 0x340   : > { %v2869_v61 = vpack.c.bf16 %v2813_v41, %v2813_v41  ;;  %v2737_v56 = vpop.xlane.xlu1 %2736  ;;  %v2819_v55 = vmul.f32 %v6574_v47, %v7322_v52  ;;  %v5691_v52 = vpack.c.bf16 %v762_v3, %v762_v3  ;;  %v2752_v5 = vpop.xlane.xlu0 %2751  ;;  %v5696_v34 = vpack.c.bf16 %v783_v17, %v783_v17 }
 0x341   : > { %6197 = vmatmul.mubr.msk.bf16.vlgmr.msra.gmra.mrb[136].mxu0 %vm2509_vm3, %v2870_v12  ;;  %6581 = vrcp.f32 %v2737_v56  ;;  %v5695_v47 = vpack.c.bf16 %v778_v10, %v778_v10  ;;  %v791_v56 = vadd.f32 %v6869_v37, %v7097_v30 }
 0x342   : > { %6207 = vmatpush3.bf16.msra.mxu0 %v3359_v32  ;;  %6191 = vmatmul.mubr.msk.bf16.vlgmr.msra.gmra.mrb[116].mxu1 %vm2509_vm3, %v2869_v61  ;;  %6583 = vrcp.f32 %v2746_v59  ;;  %v2872_v22 = vpack.c.bf16 %v2819_v55, %v2819_v55  ;;  %v3405_v38 = vsel %vm2897_vm2, %v5691_v52, 0  ;;  %v3635_v3 = vsel %vm2897_vm2, %v5696_v34, 0 }
 0x343   : > { %6201 = vmatpush3.bf16.msra.mxu1 %v3313_v0  ;;  %6202 = vmatprep.mubr.msk.bf16.mxu1 %vm6631_vm1, %v7959_v15  ;;  %v3589_v0 = vsel %vm2897_vm2, %v5695_v47, 0 }
 0x344   : > { %v7508_v31 = vpop.eup %6575  ;;  %6208 = vmatprep.mubr.msk.bf16.mxu0 %vm6631_vm1, %v7959_v15  ;;  %6212 = vmatprep.subr.bf16.mxu1 %v7959_v15  ;;  %v2758_v41 = vpop.xlane.xlu0 %2757 }
 0x345   : > { %v6578_v24 = vpop.eup %6577  ;;  %v2795_v7 = vsel %vm2509_vm3, %v7508_v31, 0.0  ;;  %6218 = vmatprep.subr.bf16.mxu0 %v7959_v15 }
 0x346   : > { %v2817_v53 = vmul.f32 %v6578_v24, %v7337_v33  ;;  %2796 = vadd.xlane.f32.xlu1 %v2795_v7  ;;  %v6580_v51 = vpop.eup %6579  ;;  %v5698_v24 = vpack.c.bf16 %v791_v56, %v791_v56 }
 0x347   : > { %v2823_v33 = vmul.f32 %v6580_v51, %v7333_v63  ;;  %v7960_v51 = vld [vmem:[#allocation4_spill] sm:$0xff] }
 0x348   : > { %v2871_v16 = vpack.c.bf16 %v2817_v53, %v2817_v53  ;;  %v2764_v59 = vpop.xlane.xlu0 %2763 }
 0x349   : > { %6209 = vmatmul.mubr.msk.bf16.vlgmr.msra.gmra.mrb[140].mxu0 %vm2509_vm3, %v2872_v22  ;;  %v2743_v18 = vpop.xlane.xlu1 %2742  ;;  %v2874_v19 = vpack.c.bf16 %v2823_v33, %v2823_v33  ;;  %v3727_v22 = vsel %vm2897_vm2, %v5698_v24, 0 }
 0x34a   : > { %6219 = vmatpush3.bf16.msra.mxu0 %v3451_v35  ;;  %6203 = vmatmul.mubr.msk.bf16.vlgmr.msra.gmra.mrb[120].mxu1 %vm2509_vm3, %v2871_v16  ;;  %6585 = vrcp.f32 %v2743_v18  ;;  %v799_v16 = vadd.f32 %v7960_v51, %v7097_v30  ;;  %v794_v35 = vadd.f32 %v7961_v9, %v7097_v30 }
 0x34b   : > { %6213 = vmatpush3.bf16.msra.mxu1 %v3405_v38  ;;  %6214 = vmatprep.mubr.msk.bf16.mxu1 %vm6631_vm1, %v7959_v15  ;;  %v6582_v29 = vpop.eup %6581  ;;  %6587 = vrcp.f32 %v2752_v5 }
 0x34c   : > { %6220 = vmatprep.mubr.msk.bf16.mxu0 %vm6631_vm1, %v7959_v15  ;;  %6224 = vmatprep.subr.bf16.mxu1 %v7959_v15  ;;  %v2821_v36 = vmul.f32 %v6582_v29, %v7351_v23  ;;  %v6584_v21 = vpop.eup %6583  ;;  %v3497_v23 = vsel %vm2897_vm2, %v5693_v20, 0  ;;  %v5700_v5 = vpack.c.bf16 %v799_v16, %v799_v16  ;;  %v5699_v29 = vpack.c.bf16 %v794_v35, %v794_v35 }
 0x34d   : > { %6230 = vmatprep.subr.bf16.mxu0 %v7959_v15  ;;  %v2827_v27 = vmul.f32 %v6584_v21, %v7341_v2 }
 0x34e   : > { %v2873_v63 = vpack.c.bf16 %v2821_v36, %v2821_v36  ;;  %v3819_v21 = vsel %vm2897_vm2, %v5700_v5, 0 }
 0x34f   : > { %v2876_v2 = vpack.c.bf16 %v2827_v27, %v2827_v27 }
 0x350   : > { %v2770_v62 = vpop.xlane.xlu0 %2769 }
 0x351   : > { %6221 = vmatmul.mubr.msk.bf16.vlgmr.msra.gmra.mrb[144].mxu0 %vm2509_vm3, %v2874_v19  ;;  %v2749_v57 = vpop.xlane.xlu1 %2748  ;;  %v7962_v19 = vld [vmem:[#allocation3_spill] sm:$0xff] }
 0x352   : > { %6231 = vmatpush3.bf16.msra.mxu0 %v3543_v14  ;;  %6215 = vmatmul.mubr.msk.bf16.vlgmr.msra.gmra.mrb[124].mxu1 %vm2509_vm3, %v2873_v63  ;;  %6589 = vrcp.f32 %v2749_v57  ;;  %v807_v63 = vadd.f32 %v7962_v19, %v7097_v30  ;;  %v7963_v14 = vld [vmem:[#allocation6_spill] sm:$0xff] }
 0x353   : > { %6225 = vmatpush3.bf16.msra.mxu1 %v3497_v23  ;;  %6226 = vmatprep.mubr.msk.bf16.mxu1 %vm6631_vm1, %v7959_v15  ;;  %6591 = vrcp.f32 %v2758_v41  ;;  %v802_v17 = vadd.f32 %v7963_v14, %v7097_v30 }
 0x354   : > { %v6586_v39 = vpop.eup %6585  ;;  %6232 = vmatprep.mubr.msk.bf16.mxu0 %vm6631_vm1, %v7959_v15  ;;  %6236 = vmatprep.subr.bf16.mxu1 %v7959_v15  ;;  %v5702_v27 = vpack.c.bf16 %v807_v63, %v807_v63 }
 0x355   : > { %v2825_v12 = vmul.f32 %v6586_v39, %v7365_v42  ;;  %6242 = vmatprep.subr.bf16.mxu0 %v7959_v15  ;;  %v6588_v32 = vpop.eup %6587  ;;  %v786_v42 = vadd.f32 %v6880_v43, %v7097_v30  ;;  %v5701_v41 = vpack.c.bf16 %v802_v17, %v802_v17 }
 0x356   : > { %v2831_v55 = vmul.f32 %v6588_v32, %v7349_v6 }
 0x357   : > { %v2875_v61 = vpack.c.bf16 %v2825_v12, %v2825_v12  ;;  %v5697_v43 = vpack.c.bf16 %v786_v42, %v786_v42 }
 0x358   : > { %v2755_v50 = vpop.xlane.xlu1 %2754  ;;  %v2878_v6 = vpack.c.bf16 %v2831_v55, %v2831_v55 }
 0x359   : > { %6233 = vmatmul.mubr.msk.bf16.vlgmr.msra.gmra.mrb[148].mxu0 %vm2509_vm3, %v2876_v2  ;;  %6593 = vrcp.f32 %v2755_v50  ;;  %v3865_v50 = vsel %vm2897_vm2, %v5701_v41, 0 }
 0x35a   : > { %6227 = vmatmul.mubr.msk.bf16.vlgmr.msra.gmra.mrb[128].mxu1 %vm2509_vm3, %v2875_v61  ;;  %6243 = vmatpush3.bf16.msra.mxu0 %v3635_v3  ;;  %6595 = vrcp.f32 %v2764_v59  ;;  %v7964_v61 = vld [vmem:[#allocation8_spill] sm:$0xff] }
 0x35b   : > { %6237 = vmatpush3.bf16.msra.mxu1 %v3589_v0  ;;  %6238 = vmatprep.mubr.msk.bf16.mxu1 %vm6631_vm1, %v7959_v15  ;;  %v815_v2 = vadd.f32 %v7964_v61, %v7097_v30 }
 0x35c   : > { %v6590_v37 = vpop.eup %6589  ;;  %6244 = vmatprep.mubr.msk.bf16.mxu0 %vm6631_vm1, %v7959_v15  ;;  %6248 = vmatprep.subr.bf16.mxu1 %v7959_v15 }
 0x35d   : > { %v2829_v13 = vmul.f32 %v6590_v37, %v7374_v44  ;;  %6254 = vmatprep.subr.bf16.mxu0 %v7959_v15  ;;  %v6592_v52 = vpop.eup %6591  ;;  %v3681_v44 = vsel %vm2897_vm2, %v5697_v43, 0  ;;  %v5704_v42 = vpack.c.bf16 %v815_v2, %v815_v2 }
 0x35e   : > { %v2835_v38 = vmul.f32 %v6592_v52, %v7355_v40 }
 0x35f   : > { %v2877_v7 = vpack.c.bf16 %v2829_v13, %v2829_v13  ;;  %v4003_v24 = vsel %vm2897_vm2, %v5704_v42, 0  ;;  %v7966_v13 = vld [vmem:[#allocation10_spill] sm:$0xff] }
 0x360   : > { %v2761_v53 = vpop.xlane.xlu1 %2760  ;;  %v2880_v36 = vpack.c.bf16 %v2835_v38, %v2835_v38 }
 0x361   : > { %6245 = vmatmul.mubr.msk.bf16.vlgmr.msra.gmra.mrb[152].mxu0 %vm2509_vm3, %v2878_v6  ;;  %6597 = vrcp.f32 %v2761_v53 }
 0x362   : > { %6239 = vmatmul.mubr.msk.bf16.vlgmr.msra.gmra.mrb[132].mxu1 %vm2509_vm3, %v2877_v7  ;;  %6255 = vmatpush3.bf16.msra.mxu0 %v3727_v22  ;;  %6599 = vrcp.f32 %v2770_v62  ;;  %v7967_v22 = vld [vmem:[#allocation7_spill] sm:$0xff]  ;;  %v7968_v62 = vld [vmem:[#allocation9_spill] sm:$0xff] }
 0x363   : > { %v6594_v18 = vpop.eup %6593  ;;  %6249 = vmatpush3.bf16.msra.mxu1 %v3681_v44  ;;  %6250 = vmatprep.mubr.msk.bf16.mxu1 %vm6631_vm1, %v7959_v15  ;;  %v823_v51 = vadd.f32 %v7967_v22, %v7097_v30 }
 0x364   : > { %v2833_v33 = vmul.f32 %v6594_v18, %v7381_v48  ;;  %6256 = vmatprep.mubr.msk.bf16.mxu0 %vm6631_vm1, %v7959_v15  ;;  %6260 = vmatprep.subr.bf16.mxu1 %v7959_v15  ;;  %v6596_v40 = vpop.eup %6595  ;;  %v3773_v48 = vsel %vm2897_vm2, %v5699_v29, 0 }
 0x365   : > { %6266 = vmatprep.subr.bf16.mxu0 %v7959_v15  ;;  %v2839_v10 = vmul.f32 %v6596_v40, %v7363_v4  ;;  %v3911_v4 = vsel %vm2897_vm2, %v5702_v27, 0  ;;  %v5706_v35 = vpack.c.bf16 %v823_v51, %v823_v51  ;;  %v6485_v51 = vld [vmem:[%s7937_s3 + $0x20] sm:$0xff]  }
 0x366   : > { %v2879_v54 = vpack.c.bf16 %v2833_v33, %v2833_v33  ;;  %v826_v33 = vadd.f32 %v7968_v62, %v7097_v30 }
 0x367   : > { %v2882_v34 = vpack.c.bf16 %v2839_v10, %v2839_v10  ;;  %v4095_v38 = vsel %vm2897_vm2, %v5706_v35, 0 }
 0x368   : > { %v2767_v20 = vpop.xlane.xlu1 %2766 }
 0x369   : > { %6257 = vmatmul.mubr.msk.bf16.vlgmr.msra.gmra.mrb[156].mxu0 %vm2509_vm3, %v2880_v36  ;;  %6601 = vrcp.f32 %v2767_v20  ;;  %v7969_v20 = vld [vmem:[#allocation12_spill] sm:$0xff] }
 0x36a   : > { %6251 = vmatmul.mubr.msk.bf16.vlgmr.msra.gmra.mrb[136].mxu1 %vm2509_vm3, %v2879_v54  ;;  %6267 = vmatpush3.bf16.msra.mxu0 %v3819_v21  ;;  %v5707_v54 = vpack.c.bf16 %v826_v33, %v826_v33  ;;  %v831_v19 = vadd.f32 %v7969_v20, %v7097_v30 }
 0x36b   : > { %v6598_v57 = vpop.eup %6597  ;;  %6261 = vmatpush3.bf16.msra.mxu1 %v3773_v48  ;;  %6262 = vmatprep.mubr.msk.bf16.mxu1 %vm6631_vm1, %v7959_v15 }
 0x36c   : > { %v2837_v23 = vmul.f32 %v6598_v57, %v7386_v28  ;;  %6268 = vmatprep.mubr.msk.bf16.mxu0 %vm6631_vm1, %v7959_v15  ;;  %6272 = vmatprep.subr.bf16.mxu1 %v7959_v15  ;;  %v6600_v12 = vpop.eup %6599  ;;  %v7965_v28 = vld [vmem:[#allocation5_spill] sm:$0xff]  ;;  %v4141_v40 = vsel %vm2897_vm2, %v5707_v54, 0  ;;  %v5708_v48 = vpack.c.bf16 %v831_v19, %v831_v19  ;;  %v7970_v57 = vld [vmem:[#allocation14_spill] sm:$0xff] }
 0x36d   : > { %6278 = vmatprep.subr.bf16.mxu0 %v7959_v15  ;;  %v810_v32 = vadd.f32 %v7965_v28, %v7097_v30  ;;  %v2843_v3 = vmul.f32 %v6600_v12, %v7372_v25  ;;  %v834_v10 = vadd.f32 %v7970_v57, %v7097_v30 }
 0x36e   : > { %v2881_v39 = vpack.c.bf16 %v2837_v23, %v2837_v23  ;;  %v4187_v17 = vsel %vm2897_vm2, %v5708_v48, 0 }
 0x36f   : > { %v5703_v55 = vpack.c.bf16 %v810_v32, %v810_v32  ;;  %v2884_v37 = vpack.c.bf16 %v2843_v3, %v2843_v3  ;;  %v5709_v41 = vpack.c.bf16 %v834_v10, %v834_v10  ;;  %v6481_v32 = vld [vmem:[%s7937_s3] sm:$0xff]  }
 0x370   : > { %v2773_v47 = vpop.xlane.xlu1 %2772 }
 0x371   : > { %6269 = vmatmul.mubr.msk.bf16.vlgmr.msra.gmra.mrb[160].mxu0 %vm2509_vm3, %v2882_v34  ;;  %6603 = vrcp.f32 %v2773_v47  ;;  %v3957_v25 = vsel %vm2897_vm2, %v5703_v55, 0  ;;  %v7971_v34 = vld [vmem:[#allocation11_spill] sm:$0xff]  ;;  %v4233_v47 = vsel %vm2897_vm2, %v5709_v41, 0 }
 0x372   : > { %6263 = vmatmul.mubr.msk.bf16.vlgmr.msra.gmra.mrb[140].mxu1 %vm2509_vm3, %v2881_v39  ;;  %6279 = vmatpush3.bf16.msra.mxu0 %v3911_v4  ;;  %v839_v12 = vadd.f32 %v7971_v34, %v7097_v30 }
 0x373   : > { %v6602_v56 = vpop.eup %6601  ;;  %6273 = vmatpush3.bf16.msra.mxu1 %v3865_v50  ;;  %6274 = vmatprep.mubr.msk.bf16.mxu1 %vm6631_vm1, %v7959_v15 }
 0x374   : > { %v2841_v0 = vmul.f32 %v6602_v56, %v7391_v26  ;;  %6280 = vmatprep.mubr.msk.bf16.mxu0 %vm6631_vm1, %v7959_v15  ;;  %6284 = vmatprep.subr.bf16.mxu1 %v7959_v15  ;;  %v818_v26 = vadd.f32 %v7966_v13, %v7097_v30  ;;  %v5710_v2 = vpack.c.bf16 %v839_v12, %v839_v12  ;;  %v7972_v56 = vld [vmem:[#allocation13_spill] sm:$0xff] }
 0x375   : > { %6290 = vmatprep.subr.bf16.mxu0 %v7959_v15  ;;  %v842_v3 = vadd.f32 %v7972_v56, %v7097_v30 }
 0x376   : > { %v2883_v59 = vpack.c.bf16 %v2841_v0, %v2841_v0  ;;  %v5705_v6 = vpack.c.bf16 %v818_v26, %v818_v26  ;;  %v4279_v50 = vsel %vm2897_vm2, %v5710_v2, 0  ;;  %v6482_v26 = vld [vmem:[%s7937_s3 + $0x8] sm:$0xff]  }
 0x377   : > { %v5711_v42 = vpack.c.bf16 %v842_v3, %v842_v3 }
 0x378   : > { %v4049_v53 = vsel %vm2897_vm2, %v5705_v6, 0 }
 0x379   : > { %6281 = vmatmul.mubr.msk.bf16.vlgmr.msra.gmra.mrb[164].mxu0 %vm2509_vm3, %v2884_v37  ;;  %v4325_v37 = vsel %vm2897_vm2, %v5711_v42, 0 }
 0x37a   : > { %6275 = vmatmul.mubr.msk.bf16.vlgmr.msra.gmra.mrb[144].mxu1 %vm2509_vm3, %v2883_v59  ;;  %6291 = vmatpush3.bf16.msra.mxu0 %v4003_v24 }
 0x37b   : > { %v6604_v43 = vpop.eup %6603  ;;  %6285 = vmatpush3.bf16.msra.mxu1 %v3957_v25  ;;  %6286 = vmatprep.mubr.msk.bf16.mxu1 %vm6631_vm1, %v7959_v15 }
 0x37c   : > { %v2845_v7 = vmul.f32 %v6604_v43, %v7395_v60  ;;  %6296 = vmatprep.subr.bf16.mxu1 %v7959_v15  ;;  %6292 = vmatprep.mubr.msk.bf16.mxu0 %vm6631_vm1, %v7959_v15 }
 0x37d   : > { %6302 = vmatprep.subr.bf16.mxu0 %v7959_v15 }
 0x37e   : > { %v2885_v52 = vpack.c.bf16 %v2845_v7, %v2845_v7  ;;  %v6483_v7 = vld [vmem:[%s7937_s3 + $0x10] sm:$0xff]  }
 0x382   : > { %6287 = vmatmul.mubr.msk.bf16.vlgmr.msra.gmra.mrb[148].mxu1 %vm2509_vm3, %v2885_v52 }
 0x383   : > { %6297 = vmatpush3.bf16.msra.mxu1 %v4049_v53  ;;  %6298 = vmatprep.mubr.msk.bf16.mxu1 %vm6631_vm1, %v7959_v15  ;;  %v6484_v53 = vld [vmem:[%s7937_s3 + $0x18] sm:$0xff]  }
 0x384   : > { %6308 = vmatprep.subr.bf16.mxu1 %v7959_v15 }
 0x39a   : > { %v2776_v60 = vpop.xlane.xlu0 %2775 }
 0x39b   : > { %6605 = vrcp.f32 %v2776_v60 }
 0x3a2   : > { %v2779_v16 = vpop.xlane.xlu1 %2778 }
 0x3a3   : > { %6607 = vrcp.f32 %v2779_v16 }
 0x3a5   : > { %v6606_v9 = vpop.eup %6605 }
 0x3a6   : > { %v2847_v44 = vmul.f32 %v6606_v9, %v7411_v45 }
 0x3a8   : > { %v2886_v18 = vpack.c.bf16 %v2847_v44, %v2847_v44  ;;  %v6486_v44 = vld [vmem:[%s7937_s3 + $0x28] sm:$0xff]  }
 0x3aa   : > { %6293 = vmatmul.mubr.msk.bf16.vlgmr.msra.gmra.mrb[168].mxu0 %vm2509_vm3, %v2886_v18  ;;  %v2782_v5 = vpop.xlane.xlu0 %2781 }
 0x3ab   : > { %6303 = vmatpush3.bf16.msra.mxu0 %v4095_v38  ;;  %6609 = vrcp.f32 %v2782_v5  ;;  %6304 = vmatprep.mubr.msk.bf16.mxu0 %vm6631_vm1, %v7959_v15  ;;  %v6487_v38 = vld [vmem:[%s7937_s3 + $0x30] sm:$0xff]  }
 0x3ac   : > { %6314 = vmatprep.subr.bf16.mxu0 %v7959_v15 }
 0x3ad   : > { %v6608_v29 = vpop.eup %6607 }
 0x3ae   : > { %v2849_v45 = vmul.f32 %v6608_v29, %v7423_v1  ;;  %v6488_v29 = vld [vmem:[%s7937_s3 + $0x38] sm:$0xff]  }
 0x3b0   : > { %v2887_v36 = vpack.c.bf16 %v2849_v45, %v2849_v45 }
 0x3b2   : > { %6299 = vmatmul.mubr.msk.bf16.vlgmr.msra.gmra.mrb[152].mxu1 %vm2509_vm3, %v2887_v36  ;;  %v2785_v63 = vpop.xlane.xlu1 %2784 }
 0x3b3   : > { %6309 = vmatpush3.bf16.msra.mxu1 %v4141_v40  ;;  %6611 = vrcp.f32 %v2785_v63  ;;  %6310 = vmatprep.mubr.msk.bf16.mxu1 %vm6631_vm1, %v7959_v15 }
 0x3b4   : > { %6320 = vmatprep.subr.bf16.mxu1 %v7959_v15 }
 0x3b5   : > { %v6610_v21 = vpop.eup %6609 }
 0x3b6   : > { %v2851_v1 = vmul.f32 %v6610_v21, %v7436_v11 }
 0x3b8   : > { %v2888_v14 = vpack.c.bf16 %v2851_v1, %v2851_v1 }
 0x3ba   : > { %6305 = vmatmul.mubr.msk.bf16.vlgmr.msra.gmra.mrb[172].mxu0 %vm2509_vm3, %v2888_v14  ;;  %v2788_v23 = vpop.xlane.xlu0 %2787 }
 0x3bb   : > { %6315 = vmatpush3.bf16.msra.mxu0 %v4187_v17  ;;  %6613 = vrcp.f32 %v2788_v23  ;;  %6316 = vmatprep.mubr.msk.bf16.mxu0 %vm6631_vm1, %v7959_v15 }
 0x3bc   : > { %6326 = vmatprep.subr.bf16.mxu0 %v7959_v15 }
 0x3bd   : > { %v6612_v27 = vpop.eup %6611 }
 0x3be   : > { %v2853_v11 = vmul.f32 %v6612_v27, %v7449_v49 }
 0x3c0   : > { %v2889_v39 = vpack.c.bf16 %v2853_v11, %v2853_v11 }
 0x3c2   : > { %6311 = vmatmul.mubr.msk.bf16.vlgmr.msra.gmra.mrb[156].mxu1 %vm2509_vm3, %v2889_v39  ;;  %v2791_v4 = vpop.xlane.xlu1 %2790 }
 0x3c3   : > { %6321 = vmatpush3.bf16.msra.mxu1 %v4233_v47  ;;  %6615 = vrcp.f32 %v2791_v4  ;;  %6322 = vmatprep.mubr.msk.bf16.mxu1 %vm6631_vm1, %v7959_v15 }
 0x3c4   : > { %6332 = vmatprep.subr.bf16.mxu1 %v7959_v15 }
 0x3c5   : > { %v6614_v61 = vpop.eup %6613 }
 0x3c6   : > { %v2855_v49 = vmul.f32 %v6614_v61, %v7462_v58 }
 0x3c8   : > { %v2890_v28 = vpack.c.bf16 %v2855_v49, %v2855_v49 }
 0x3ca   : > { %6317 = vmatmul.mubr.msk.bf16.vlgmr.msra.gmra.mrb[176].mxu0 %vm2509_vm3, %v2890_v28  ;;  %v2794_v0 = vpop.xlane.xlu0 %2793 }
 0x3cb   : > { %6327 = vmatpush3.bf16.msra.mxu0 %v4279_v50  ;;  %6617 = vrcp.f32 %v2794_v0  ;;  %6328 = vmatprep.mubr.msk.bf16.mxu0 %vm6631_vm1, %v7959_v15 }
 0x3cc   : > { %6338 = vmatprep.subr.bf16.mxu0 %v6481_v32 }
 0x3cd   : > { %v6616_v58 = vpop.eup %6615 }
 0x3ce   : > { %v2857_v55 = vmul.f32 %v6616_v58, %v7475_v46 }
 0x3d0   : > { %v2891_v59 = vpack.c.bf16 %v2857_v55, %v2857_v55 }
 0x3d2   : > { %6323 = vmatmul.mubr.msk.bf16.vlgmr.msra.gmra.mrb[160].mxu1 %vm2509_vm3, %v2891_v59 }
 0x3d3   : > { %6333 = vmatpush3.bf16.msra.mxu1 %v4325_v37  ;;  %v2797_v30 = vpop.xlane.xlu1 %2796  ;;  %6334 = vmatprep.mubr.msk.bf16.mxu1 %vm6631_vm1, %v7959_v15 }
 0x3d4   : > { %6619 = vrcp.f32 %v2797_v30 }
 0x3d5   : > { %v6618_v24 = vpop.eup %6617 }
 0x3d6   : > { %v2859_v25 = vmul.f32 %v6618_v24, %v7490_v8 }
 0x3d8   : > { %v2892_v13 = vpack.c.bf16 %v2859_v25, %v2859_v25 }
 0x3da   : > { %6329 = vmatmul.mubr.msk.bf16.vlgmr.msra.gmra.mrb[180].mxu0 %vm2509_vm3, %v2892_v13 }
 0x3db   : > { %6339 = vmatpush3.bf16.msra.mxu0 %v6481_v32  ;;  %v2935_v46 = vpop.f32.mrb[120].mxu0 }
 0x3dc   : > { %v6150_v43 = vpop.f32.mrb[121].mxu0  ;;  %6340 = vmatprep.subr.bf16.mxu0 %v6482_v26 }
 0x3dd   : > { %v2938_v15 = vpop.f32.mrb[122].mxu0 }
 0x3de   : > { %v6620_v6 = vpop.eup %6619  ;;  %v6151_v52 = vpop.f32.mrb[123].mxu0 }
 0x3df   : > { %v2861_v8 = vmul.f32 %v6620_v6, %v7508_v31  ;;  %6341 = vmatpush3.bf16.msra.mxu0 %v6482_v26 }
 0x3e0   : > { %6342 = vmatprep.subr.bf16.mxu0 %v6483_v7 }
 0x3e1   : > { %v2893_v60 = vpack.c.bf16 %v2861_v8, %v2861_v8 }
 0x3e3   : > { %6335 = vmatmul.mubr.msk.bf16.vlgmr.msra.gmra.mrb[164].mxu1 %vm2509_vm3, %v2893_v60  ;;  %6343 = vmatpush3.bf16.msra.mxu0 %v6483_v7 }
 0x3e4   : > { %v2981_v22 = vpop.f32.mrb[104].mxu1  ;;  %6344 = vmatprep.subr.bf16.mxu0 %v6484_v53 }
 0x3e5   : > { %v4384_v16 = vpack.c.bf16 %v2981_v22, %v2935_v46  ;;  %v6156_v9 = vpop.f32.mrb[105].mxu1 }
 0x3e6   : > { %v2984_v35 = vpop.f32.mrb[106].mxu1 }
 0x3e7   : > { %v6157_v31 = vpop.f32.mrb[107].mxu1  ;;  %6345 = vmatpush3.bf16.msra.mxu0 %v6484_v53  ;;  %6354 = vmatprep.mubr.bf16.mxu0 %v4384_v16 }
 0x3e8   : > { %6346 = vmatprep.subr.bf16.mxu0 %v6485_v51 }
 0x3eb   : > { %6347 = vmatpush3.bf16.msra.mxu0 %v6485_v51 }
 0x3ec   : > { %v3027_v18 = vpop.f32.mrb[124].mxu0  ;;  %6348 = vmatprep.subr.bf16.mxu0 %v6486_v44 }
 0x3ed   : > { %v6162_v62 = vpop.f32.mrb[125].mxu0 }
 0x3ee   : > { %v3030_v33 = vpop.f32.mrb[126].mxu0 }
 0x3ef   : > { %v6163_v5 = vpop.f32.mrb[127].mxu0  ;;  %6349 = vmatpush3.bf16.msra.mxu0 %v6486_v44 }
 0x3f0   : > { %6350 = vmatprep.subr.bf16.mxu0 %v6487_v38 }
 0x3f3   : > { %6351 = vmatpush3.bf16.msra.mxu0 %v6487_v38 }
 0x3f4   : > { %v3073_v54 = vpop.f32.mrb[108].mxu1  ;;  %6352 = vmatprep.subr.bf16.mxu0 %v6488_v29 }
 0x3f5   : > { %v4385_v45 = vpack.c.bf16 %v3073_v54, %v3027_v18  ;;  %v6168_v36 = vpop.f32.mrb[109].mxu1 }
 0x3f6   : > { %v3076_v40 = vpop.f32.mrb[110].mxu1 }
 0x3f7   : > { %v6169_v20 = vpop.f32.mrb[111].mxu1  ;;  %6353 = vmatpush3.bf16.msra.mxu0 %v6488_v29 }
 0x3fa   : > { %6355 = vmatmul.mubr.bf16.vlgmr.msra.gmra.mrb[184].mxu0 %v4385_v45 }
 0x3fc   : > { %v3119_v19 = vpop.f32.mrb[128].mxu0 }
 0x3fd   : > { %v6174_v63 = vpop.f32.mrb[129].mxu0 }
 0x3fe   : > { %v3122_v21 = vpop.f32.mrb[130].mxu0 }
 0x3ff   : > { %v6175_v48 = vpop.f32.mrb[131].mxu0 }
 0x404   : > { %v3165_v1 = vpop.f32.mrb[112].mxu1 }
 0x405   : > { %v4386_v14 = vpack.c.bf16 %v3165_v1, %v3119_v19  ;;  %v6180_v17 = vpop.f32.mrb[113].mxu1 }
 0x406   : > { %v3168_v57 = vpop.f32.mrb[114].mxu1 }
 0x407   : > { %v6181_v10 = vpop.f32.mrb[115].mxu1  ;;  %6358 = vmatprep.mubr.bf16.mxu0 %v4386_v14 }
 0x40c   : > { %v3211_v23 = vpop.f32.mrb[132].mxu0 }
 0x40d   : > { %v6186_v27 = vpop.f32.mrb[133].mxu0 }
 0x40e   : > { %v3214_v41 = vpop.f32.mrb[134].mxu0 }
 0x40f   : > { %v6187_v11 = vpop.f32.mrb[135].mxu0 }
 0x414   : > { %v3303_v39 = vpop.f32.mrb[136].mxu0 }
 0x415   : > { %v3257_v34 = vpop.f32.mrb[116].mxu1  ;;  %v6198_v12 = vpop.f32.mrb[137].mxu0 }
 0x416   : > { %v4387_v47 = vpack.c.bf16 %v3257_v34, %v3211_v23  ;;  %v6192_v4 = vpop.f32.mrb[117].mxu1  ;;  %v3306_v61 = vpop.f32.mrb[138].mxu0 }
 0x417   : > { %v3260_v2 = vpop.f32.mrb[118].mxu1  ;;  %v6199_v49 = vpop.f32.mrb[139].mxu0 }
 0x418   : > { %v6193_v28 = vpop.f32.mrb[119].mxu1  ;;  %6359 = vmatmul.mubr.bf16.gmra.mrb[188].mxu0 %v4387_v47 }
 0x419   : > { %v6489_v28 = vld [vmem:[%s7939_s5] sm:$0xff]  }
 0x41a   : > { %6386 = vmatprep.subr.bf16.mxu1 %v6489_v28 }
 0x41b   : > { %6387 = vmatpush3.bf16.msra.mxu1 %v6489_v28 }
 0x41c   : > { %v3395_v32 = vpop.f32.mrb[140].mxu0 }
 0x41d   : > { %v3349_v50 = vpop.f32.mrb[120].mxu1  ;;  %v6210_v56 = vpop.f32.mrb[141].mxu0 }
 0x41e   : > { %v4388_v3 = vpack.c.bf16 %v3349_v50, %v3303_v39  ;;  %v6204_v0 = vpop.f32.mrb[121].mxu1  ;;  %v3398_v58 = vpop.f32.mrb[142].mxu0 }
 0x41f   : > { %v3352_v42 = vpop.f32.mrb[122].mxu1  ;;  %v6211_v55 = vpop.f32.mrb[143].mxu0 }
 0x420   : > { %v6205_v59 = vpop.f32.mrb[123].mxu1  ;;  %6362 = vmatprep.mubr.bf16.mxu0 %v4388_v3  ;;  %v6490_v3 = vld [vmem:[%s7939_s5 + $0x8] sm:$0xff]  }
 0x421   : > { %6388 = vmatprep.subr.bf16.mxu1 %v6490_v3 }
 0x422   : > { %6389 = vmatpush3.bf16.msra.mxu1 %v6490_v3 }
 0x424   : > { %v3487_v37 = vpop.f32.mrb[144].mxu0 }
 0x425   : > { %v3441_v30 = vpop.f32.mrb[124].mxu1  ;;  %v6222_v24 = vpop.f32.mrb[145].mxu0 }
 0x426   : > { %v4389_v25 = vpack.c.bf16 %v3441_v30, %v3395_v32  ;;  %v6216_v13 = vpop.f32.mrb[125].mxu1  ;;  %v3490_v26 = vpop.f32.mrb[146].mxu0 }
 0x427   : > { %v3444_v46 = vpop.f32.mrb[126].mxu1  ;;  %v6223_v43 = vpop.f32.mrb[147].mxu0 }
 0x428   : > { %v6217_v7 = vpop.f32.mrb[127].mxu1  ;;  %6363 = vmatmul.mubr.bf16.gmra.mrb[192].mxu0 %v4389_v25 }
 0x42c   : > { %v3579_v15 = vpop.f32.mrb[148].mxu0 }
 0x42d   : > { %v3533_v6 = vpop.f32.mrb[128].mxu1  ;;  %v6234_v52 = vpop.f32.mrb[149].mxu0 }
 0x42e   : > { %v4390_v8 = vpack.c.bf16 %v3533_v6, %v3487_v37  ;;  %v6228_v53 = vpop.f32.mrb[129].mxu1  ;;  %v3582_v60 = vpop.f32.mrb[150].mxu0 }
 0x42f   : > { %v3536_v22 = vpop.f32.mrb[130].mxu1  ;;  %v6235_v51 = vpop.f32.mrb[151].mxu0 }
 0x430   : > { %v6229_v16 = vpop.f32.mrb[131].mxu1  ;;  %6366 = vmatprep.mubr.bf16.mxu0 %v4390_v8 }
 0x434   : > { %v3671_v9 = vpop.f32.mrb[152].mxu0 }
 0x435   : > { %v3625_v35 = vpop.f32.mrb[132].mxu1  ;;  %v6246_v31 = vpop.f32.mrb[153].mxu0 }
 0x436   : > { %v4391_v44 = vpack.c.bf16 %v3625_v35, %v3579_v15  ;;  %v6240_v18 = vpop.f32.mrb[133].mxu1  ;;  %v3674_v38 = vpop.f32.mrb[154].mxu0 }
 0x437   : > { %v3628_v62 = vpop.f32.mrb[134].mxu1  ;;  %v6247_v33 = vpop.f32.mrb[155].mxu0 }
 0x438   : > { %v6241_v5 = vpop.f32.mrb[135].mxu1  ;;  %6367 = vmatmul.mubr.bf16.gmra.mrb[196].mxu0 %v4391_v44 }
 0x43c   : > { %v3763_v29 = vpop.f32.mrb[156].mxu0 }
 0x43d   : > { %v3717_v54 = vpop.f32.mrb[136].mxu1  ;;  %v6258_v45 = vpop.f32.mrb[157].mxu0 }
 0x43e   : > { %v4392_v36 = vpack.c.bf16 %v3717_v54, %v3671_v9  ;;  %v6252_v40 = vpop.f32.mrb[137].mxu1  ;;  %v3766_v20 = vpop.f32.mrb[158].mxu0 }
 0x43f   : > { %v3720_v19 = vpop.f32.mrb[138].mxu1  ;;  %v6259_v63 = vpop.f32.mrb[159].mxu0 }
 0x440   : > { %v6253_v21 = vpop.f32.mrb[139].mxu1  ;;  %6370 = vmatprep.mubr.bf16.mxu0 %v4392_v36  ;;  %v7714_v19 = vld [vmem:[%s7938_s4] ss:$0 sm:$0xff] }
 0x444   : > { %v3855_v48 = vpop.f32.mrb[160].mxu0 }
 0x445   : > { %v3809_v1 = vpop.f32.mrb[140].mxu1  ;;  %v6270_v14 = vpop.f32.mrb[161].mxu0 }
 0x446   : > { %v4393_v17 = vpack.c.bf16 %v3809_v1, %v3763_v29  ;;  %v6264_v57 = vpop.f32.mrb[141].mxu1  ;;  %v3858_v10 = vpop.f32.mrb[162].mxu0 }
 0x447   : > { %v3812_v23 = vpop.f32.mrb[142].mxu1  ;;  %v6271_v27 = vpop.f32.mrb[163].mxu0 }
 0x448   : > { %v6265_v41 = vpop.f32.mrb[143].mxu1  ;;  %6371 = vmatmul.mubr.bf16.gmra.mrb[200].mxu0 %v4393_v17 }
 0x44c   : > { %v3947_v11 = vpop.f32.mrb[164].mxu0 }
 0x44d   : > { %v3901_v39 = vpop.f32.mrb[144].mxu1  ;;  %v6282_v34 = vpop.f32.mrb[165].mxu0 }
 0x44e   : > { %v4394_v12 = vpack.c.bf16 %v3901_v39, %v3855_v48  ;;  %v6276_v47 = vpop.f32.mrb[145].mxu1  ;;  %v3950_v4 = vpop.f32.mrb[166].mxu0 }
 0x44f   : > { %v3904_v61 = vpop.f32.mrb[146].mxu1  ;;  %v6283_v2 = vpop.f32.mrb[167].mxu0 }
 0x450   : > { %v6277_v49 = vpop.f32.mrb[147].mxu1  ;;  %6374 = vmatprep.mubr.bf16.mxu0 %v4394_v12 }
 0x455   : > { %v3993_v32 = vpop.f32.mrb[148].mxu1 }
 0x456   : > { %v4395_v50 = vpack.c.bf16 %v3993_v32, %v3947_v11  ;;  %v6288_v56 = vpop.f32.mrb[149].mxu1 }
 0x457   : > { %v3996_v0 = vpop.f32.mrb[150].mxu1 }
 0x458   : > { %v6289_v58 = vpop.f32.mrb[151].mxu1  ;;  %6375 = vmatmul.mubr.bf16.gmra.mrb[204].mxu0 %v4395_v50 }
 0x47d   : > { %v4039_v42 = vpop.f32.mrb[168].mxu0 }
 0x47e   : > { %v6294_v55 = vpop.f32.mrb[169].mxu0 }
 0x47f   : > { %v4042_v59 = vpop.f32.mrb[170].mxu0 }
 0x480   : > { %v6295_v37 = vpop.f32.mrb[171].mxu0 }
 0x485   : > { %v4085_v30 = vpop.f32.mrb[152].mxu1 }
 0x486   : > { %v4396_v24 = vpack.c.bf16 %v4085_v30, %v4039_v42  ;;  %v6300_v25 = vpop.f32.mrb[153].mxu1 }
 0x487   : > { %v4088_v13 = vpop.f32.mrb[154].mxu1 }
 0x488   : > { %v6301_v26 = vpop.f32.mrb[155].mxu1  ;;  %6378 = vmatprep.mubr.bf16.mxu0 %v4396_v24 }
 0x48d   : > { %v4131_v46 = vpop.f32.mrb[172].mxu0 }
 0x48e   : > { %v6306_v43 = vpop.f32.mrb[173].mxu0 }
 0x48f   : > { %v4134_v7 = vpop.f32.mrb[174].mxu0 }
 0x490   : > { %v6307_v15 = vpop.f32.mrb[175].mxu0 }
 0x495   : > { %v4177_v6 = vpop.f32.mrb[156].mxu1 }
 0x496   : > { %v4397_v52 = vpack.c.bf16 %v4177_v6, %v4131_v46  ;;  %v6312_v8 = vpop.f32.mrb[157].mxu1 }
 0x497   : > { %v4180_v53 = vpop.f32.mrb[158].mxu1 }
 0x498   : > { %v6313_v60 = vpop.f32.mrb[159].mxu1  ;;  %6379 = vmatmul.mubr.bf16.gmra.mrb[208].mxu0 %v4397_v52 }
 0x49d   : > { %v4223_v22 = vpop.f32.mrb[176].mxu0 }
 0x49e   : > { %v6318_v51 = vpop.f32.mrb[177].mxu0 }
 0x49f   : > { %v4226_v16 = vpop.f32.mrb[178].mxu0 }
 0x4a0   : > { %v6319_v9 = vpop.f32.mrb[179].mxu0 }
 0x4a5   : > { %v4269_v35 = vpop.f32.mrb[160].mxu1 }
 0x4a6   : > { %v4398_v31 = vpack.c.bf16 %v4269_v35, %v4223_v22  ;;  %v6324_v44 = vpop.f32.mrb[161].mxu1 }
 0x4a7   : > { %v4272_v18 = vpop.f32.mrb[162].mxu1 }
 0x4a8   : > { %v6325_v38 = vpop.f32.mrb[163].mxu1  ;;  %6382 = vmatprep.mubr.bf16.mxu0 %v4398_v31 }
 0x4ad   : > { %v4315_v62 = vpop.f32.mrb[180].mxu0 }
 0x4ae   : > { %v6330_v33 = vpop.f32.mrb[181].mxu0 }
 0x4af   : > { %v4318_v5 = vpop.f32.mrb[182].mxu0 }
 0x4b0   : > { %v6331_v29 = vpop.f32.mrb[183].mxu0 }
 0x4b6   : > { %v4361_v54 = vpop.f32.mrb[164].mxu1 }
 0x4b7   : > { %v4399_v45 = vpack.c.bf16 %v4361_v54, %v4315_v62  ;;  %v6336_v36 = vpop.f32.mrb[165].mxu1 }
 0x4b8   : > { %v4364_v40 = vpop.f32.mrb[166].mxu1 }
 0x4b9   : > { %v6337_v20 = vpop.f32.mrb[167].mxu1  ;;  %6383 = vmatmul.mubr.bf16.gmra.mrb[212].mxu0 %v4399_v45 }
 0x4cd   : > { %v6356_v63 = vpop.f32.mrb[184].mxu0 }
 0x4ce   : > { %v4497_v21 = vadd.f32 %v6356_v63, %v7714_v19  ;;  %v4488_v48 = vpop.f32.mrb[185].mxu0 }
 0x4cf   : > { %v4489_v1 = vadd.f32 %v7714_v19, %v4488_v48  ;;  %v6357_v14 = vpop.f32.mrb[186].mxu0 }
 0x4d0   : > { %v4617_v17 = vmul.f32 0.01, %v4497_v21  ;;  %v4500_v57 = vadd.f32 %v6357_v14, %v7714_v19  ;;  %v4491_v10 = vpop.f32.mrb[187].mxu0 }
 0x4d1   : > { %v4615_v23 = vmul.f32 0.01, %v4489_v1  ;;  %v4492_v27 = vadd.f32 %v7714_v19, %v4491_v10 }
 0x4d2   : > { %v4618_v41 = vmul.f32 0.01, %v4500_v57  ;;  %v4649_v39 = vmax.f32 %v4497_v21, %v4617_v17 }
 0x4d3   : > { %v4616_v11 = vmul.f32 0.01, %v4492_v27  ;;  %v4647_v12 = vmax.f32 %v4489_v1, %v4615_v23 }
 0x4d4   : > { %v4650_v34 = vmax.f32 %v4500_v57, %v4618_v41 }
 0x4d5   : > { %v4648_v47 = vmax.f32 %v4492_v27, %v4616_v11 }
 0x4d6   : > { %v4685_v4 = vpack.c.bf16 %v4650_v34, %v4649_v39 }
 0x4d7   : > { %v4684_v61 = vpack.c.bf16 %v4648_v47, %v4647_v12 }
 0x4d9   : > { %6390 = vmatprep.mubr.msk.bf16.mxu1 %vm442_vm0, %v4684_v61 }
 0x4da   : > { %6391 = vmatmul.mubr.msk.bf16.vlgmr.msra.gmra.mrb[168].mxu1 %vm442_vm0, %v4685_v4 }
 0x4eb   : > { %v6360_v2 = vpop.f32.mrb[188].mxu0 }
 0x4ec   : > { %v4513_v49 = vadd.f32 %v6360_v2, %v7714_v19  ;;  %v4504_v28 = vpop.f32.mrb[189].mxu0 }
 0x4ed   : > { %v4505_v32 = vadd.f32 %v7714_v19, %v4504_v28  ;;  %v6361_v50 = vpop.f32.mrb[190].mxu0 }
 0x4ee   : > { %v4621_v56 = vmul.f32 0.01, %v4513_v49  ;;  %v4516_v3 = vadd.f32 %v6361_v50, %v7714_v19  ;;  %v4507_v0 = vpop.f32.mrb[191].mxu0 }
 0x4ef   : > { %v4619_v58 = vmul.f32 0.01, %v4505_v32  ;;  %v4508_v42 = vadd.f32 %v7714_v19, %v4507_v0 }
 0x4f0   : > { %v4622_v55 = vmul.f32 0.01, %v4516_v3  ;;  %v4653_v37 = vmax.f32 %v4513_v49, %v4621_v56 }
 0x4f1   : > { %v4620_v59 = vmul.f32 0.01, %v4508_v42  ;;  %v4651_v24 = vmax.f32 %v4505_v32, %v4619_v58 }
 0x4f2   : > { %v4654_v30 = vmax.f32 %v4516_v3, %v4622_v55 }
 0x4f3   : > { %v4652_v25 = vmax.f32 %v4508_v42, %v4620_v59 }
 0x4f4   : > { %v4687_v13 = vpack.c.bf16 %v4654_v30, %v4653_v37 }
 0x4f5   : > { %v4686_v26 = vpack.c.bf16 %v4652_v25, %v4651_v24 }
 0x4f7   : > { %6394 = vmatprep.mubr.msk.bf16.mxu1 %vm442_vm0, %v4686_v26 }
 0x4f8   : > { %6395 = vmatmul.mubr.msk.bf16.gmra.mrb[172].mxu1 %vm442_vm0, %v4687_v13 }
 0x4fb   : > { %v6364_v46 = vpop.f32.mrb[192].mxu0 }
 0x4fc   : > { %v4529_v43 = vadd.f32 %v6364_v46, %v7714_v19  ;;  %v4520_v7 = vpop.f32.mrb[193].mxu0 }
 0x4fd   : > { %v4521_v15 = vadd.f32 %v7714_v19, %v4520_v7  ;;  %v6365_v6 = vpop.f32.mrb[194].mxu0 }
 0x4fe   : > { %v4625_v52 = vmul.f32 0.01, %v4529_v43  ;;  %v4532_v8 = vadd.f32 %v6365_v6, %v7714_v19  ;;  %v4523_v53 = vpop.f32.mrb[195].mxu0 }
 0x4ff   : > { %v4623_v60 = vmul.f32 0.01, %v4521_v15  ;;  %v4524_v22 = vadd.f32 %v7714_v19, %v4523_v53 }
 0x500   : > { %v4626_v51 = vmul.f32 0.01, %v4532_v8  ;;  %v4657_v9 = vmax.f32 %v4529_v43, %v4625_v52  ;;  %v6491_v52 = vld [vmem:[%s7941_s7] sm:$0xff]  }
 0x501   : > { %v4624_v16 = vmul.f32 0.01, %v4524_v22  ;;  %v4655_v31 = vmax.f32 %v4521_v15, %v4623_v60  ;;  %6422 = vmatprep.subr.bf16.mxu1 %v6491_v52 }
 0x502   : > { %v4658_v35 = vmax.f32 %v4532_v8, %v4626_v51  ;;  %6423 = vmatpush3.bf16.msra.mxu1 %v6491_v52  ;;  %v6492_v51 = vld [vmem:[%s7941_s7 + $0x8] sm:$0xff]  }
 0x503   : > { %v4656_v44 = vmax.f32 %v4524_v22, %v4624_v16  ;;  %6424 = vmatprep.subr.bf16.mxu1 %v6492_v51 }
 0x504   : > { %v4689_v18 = vpack.c.bf16 %v4658_v35, %v4657_v9 }
 0x505   : > { %v4688_v38 = vpack.c.bf16 %v4656_v44, %v4655_v31 }
 0x506   : > { %6425 = vmatpush3.bf16.msra.mxu1 %v6492_v51 }
 0x507   : > { %6398 = vmatprep.mubr.msk.bf16.mxu1 %vm442_vm0, %v4688_v38 }
 0x508   : > { %6399 = vmatmul.mubr.msk.bf16.gmra.mrb[176].mxu1 %vm442_vm0, %v4689_v18 }
 0x50b   : > { %v6368_v62 = vpop.f32.mrb[196].mxu0 }
 0x50c   : > { %v4545_v33 = vadd.f32 %v6368_v62, %v7714_v19  ;;  %v4536_v5 = vpop.f32.mrb[197].mxu0 }
 0x50d   : > { %v4537_v29 = vadd.f32 %v7714_v19, %v4536_v5  ;;  %v6369_v54 = vpop.f32.mrb[198].mxu0 }
 0x50e   : > { %v4629_v45 = vmul.f32 0.01, %v4545_v33  ;;  %v4548_v36 = vadd.f32 %v6369_v54, %v7714_v19  ;;  %v4539_v40 = vpop.f32.mrb[199].mxu0 }
 0x50f   : > { %v4627_v20 = vmul.f32 0.01, %v4537_v29  ;;  %v4540_v63 = vadd.f32 %v7714_v19, %v4539_v40 }
 0x510   : > { %v4630_v21 = vmul.f32 0.01, %v4548_v36  ;;  %v4661_v1 = vmax.f32 %v4545_v33, %v4629_v45 }
 0x511   : > { %v4628_v48 = vmul.f32 0.01, %v4540_v63  ;;  %v4659_v17 = vmax.f32 %v4537_v29, %v4627_v20 }
 0x512   : > { %v4662_v14 = vmax.f32 %v4548_v36, %v4630_v21 }
 0x513   : > { %v4660_v57 = vmax.f32 %v4540_v63, %v4628_v48 }
 0x514   : > { %v4691_v10 = vpack.c.bf16 %v4662_v14, %v4661_v1 }
 0x515   : > { %v4690_v23 = vpack.c.bf16 %v4660_v57, %v4659_v17 }
 0x517   : > { %6402 = vmatprep.mubr.msk.bf16.mxu1 %vm442_vm0, %v4690_v23 }
 0x518   : > { %6403 = vmatmul.mubr.msk.bf16.gmra.mrb[180].mxu1 %vm442_vm0, %v4691_v10 }
 0x51b   : > { %v6372_v27 = vpop.f32.mrb[200].mxu0 }
 0x51c   : > { %v4561_v41 = vadd.f32 %v6372_v27, %v7714_v19  ;;  %v4552_v11 = vpop.f32.mrb[201].mxu0 }
 0x51d   : > { %v4553_v39 = vadd.f32 %v7714_v19, %v4552_v11  ;;  %v6373_v34 = vpop.f32.mrb[202].mxu0 }
 0x51e   : > { %v4633_v12 = vmul.f32 0.01, %v4561_v41  ;;  %v4564_v47 = vadd.f32 %v6373_v34, %v7714_v19  ;;  %v4555_v4 = vpop.f32.mrb[203].mxu0 }
 0x51f   : > { %v4631_v61 = vmul.f32 0.01, %v4553_v39  ;;  %v4556_v2 = vadd.f32 %v7714_v19, %v4555_v4 }
 0x520   : > { %v4634_v49 = vmul.f32 0.01, %v4564_v47  ;;  %v4665_v32 = vmax.f32 %v4561_v41, %v4633_v12 }
 0x521   : > { %v4632_v28 = vmul.f32 0.01, %v4556_v2  ;;  %v4663_v56 = vmax.f32 %v4553_v39, %v4631_v61 }
 0x522   : > { %v4666_v50 = vmax.f32 %v4564_v47, %v4634_v49 }
 0x523   : > { %v4664_v3 = vmax.f32 %v4556_v2, %v4632_v28  ;;  %v7773_v28 = vld [vmem:[%s7940_s6] ss:$0 sm:$0xff] }
 0x524   : > { %v4693_v0 = vpack.c.bf16 %v4666_v50, %v4665_v32 }
 0x525   : > { %v4692_v58 = vpack.c.bf16 %v4664_v3, %v4663_v56 }
 0x527   : > { %6406 = vmatprep.mubr.msk.bf16.mxu1 %vm442_vm0, %v4692_v58 }
 0x528   : > { %6407 = vmatmul.mubr.msk.bf16.gmra.mrb[184].mxu1 %vm442_vm0, %v4693_v0 }
 0x52b   : > { %v6376_v42 = vpop.f32.mrb[204].mxu0 }
 0x52c   : > { %v4577_v55 = vadd.f32 %v6376_v42, %v7714_v19  ;;  %v4568_v59 = vpop.f32.mrb[205].mxu0 }
 0x52d   : > { %v4569_v37 = vadd.f32 %v7714_v19, %v4568_v59  ;;  %v6377_v30 = vpop.f32.mrb[206].mxu0 }
 0x52e   : > { %v4637_v24 = vmul.f32 0.01, %v4577_v55  ;;  %v4580_v25 = vadd.f32 %v6377_v30, %v7714_v19  ;;  %v4571_v13 = vpop.f32.mrb[207].mxu0 }
 0x52f   : > { %v4635_v26 = vmul.f32 0.01, %v4569_v37  ;;  %v4572_v46 = vadd.f32 %v7714_v19, %v4571_v13 }
 0x530   : > { %v4638_v43 = vmul.f32 0.01, %v4580_v25  ;;  %v4669_v15 = vmax.f32 %v4577_v55, %v4637_v24 }
 0x531   : > { %v4636_v7 = vmul.f32 0.01, %v4572_v46  ;;  %v4667_v8 = vmax.f32 %v4569_v37, %v4635_v26 }
 0x532   : > { %v4670_v6 = vmax.f32 %v4580_v25, %v4638_v43 }
 0x533   : > { %v4668_v53 = vmax.f32 %v4572_v46, %v4636_v7 }
 0x534   : > { %v4695_v60 = vpack.c.bf16 %v4670_v6, %v4669_v15 }
 0x535   : > { %v4694_v22 = vpack.c.bf16 %v4668_v53, %v4667_v8 }
 0x537   : > { %6410 = vmatprep.mubr.msk.bf16.mxu1 %vm442_vm0, %v4694_v22 }
 0x538   : > { %6411 = vmatmul.mubr.msk.bf16.gmra.mrb[188].mxu1 %vm442_vm0, %v4695_v60 }
 0x56b   : > { %v6380_v16 = vpop.f32.mrb[208].mxu0 }
 0x56c   : > { %v4593_v9 = vadd.f32 %v6380_v16, %v7714_v19  ;;  %v4584_v35 = vpop.f32.mrb[209].mxu0 }
 0x56d   : > { %v4585_v31 = vadd.f32 %v7714_v19, %v4584_v35  ;;  %v6381_v44 = vpop.f32.mrb[210].mxu0 }
 0x56e   : > { %v4641_v18 = vmul.f32 0.01, %v4593_v9  ;;  %v4596_v38 = vadd.f32 %v6381_v44, %v7714_v19  ;;  %v4587_v62 = vpop.f32.mrb[211].mxu0 }
 0x56f   : > { %v4639_v33 = vmul.f32 0.01, %v4585_v31  ;;  %v4588_v5 = vadd.f32 %v7714_v19, %v4587_v62 }
 0x570   : > { %v4642_v29 = vmul.f32 0.01, %v4596_v38  ;;  %v4673_v45 = vmax.f32 %v4593_v9, %v4641_v18 }
 0x571   : > { %v4640_v54 = vmul.f32 0.01, %v4588_v5  ;;  %v4671_v40 = vmax.f32 %v4585_v31, %v4639_v33 }
 0x572   : > { %v4674_v36 = vmax.f32 %v4596_v38, %v4642_v29 }
 0x573   : > { %v4672_v20 = vmax.f32 %v4588_v5, %v4640_v54 }
 0x574   : > { %v4697_v63 = vpack.c.bf16 %v4674_v36, %v4673_v45 }
 0x575   : > { %v4696_v21 = vpack.c.bf16 %v4672_v20, %v4671_v40 }
 0x577   : > { %6414 = vmatprep.mubr.msk.bf16.mxu1 %vm442_vm0, %v4696_v21 }
 0x578   : > { %6415 = vmatmul.mubr.msk.bf16.gmra.mrb[192].mxu1 %vm442_vm0, %v4697_v63 }
 0x58c   : > { %v6384_v48 = vpop.f32.mrb[212].mxu0 }
 0x58d   : > { %v4609_v1 = vadd.f32 %v6384_v48, %v7714_v19  ;;  %v4600_v14 = vpop.f32.mrb[213].mxu0 }
 0x58e   : > { %v4601_v17 = vadd.f32 %v7714_v19, %v4600_v14  ;;  %v6385_v57 = vpop.f32.mrb[214].mxu0 }
 0x58f   : > { %v4645_v10 = vmul.f32 0.01, %v4609_v1  ;;  %v4612_v23 = vadd.f32 %v6385_v57, %v7714_v19  ;;  %v4603_v27 = vpop.f32.mrb[215].mxu0 }
 0x590   : > { %v4643_v41 = vmul.f32 0.01, %v4601_v17  ;;  %v4604_v11 = vadd.f32 %v7714_v19, %v4603_v27 }
 0x591   : > { %v4646_v39 = vmul.f32 0.01, %v4612_v23  ;;  %v4677_v12 = vmax.f32 %v4609_v1, %v4645_v10 }
 0x592   : > { %v4644_v34 = vmul.f32 0.01, %v4604_v11  ;;  %v4675_v4 = vmax.f32 %v4601_v17, %v4643_v41 }
 0x593   : > { %v4678_v47 = vmax.f32 %v4612_v23, %v4646_v39 }
 0x594   : > { %v4676_v61 = vmax.f32 %v4604_v11, %v4644_v34 }
 0x595   : > { %v4699_v2 = vpack.c.bf16 %v4678_v47, %v4677_v12 }
 0x596   : > { %v4698_v49 = vpack.c.bf16 %v4676_v61, %v4675_v4 }
 0x598   : > { %6418 = vmatprep.mubr.msk.bf16.mxu1 %vm442_vm0, %v4698_v49 }
 0x599   : > { %6419 = vmatmul.mubr.msk.bf16.gmra.mrb[196].mxu1 %vm442_vm0, %v4699_v2 }
 0x5ad   : > { %v6392_v32 = vpop.f32.mrb[168].mxu1 }
 0x5ae   : > { %v4809_v19 = vadd.f32 %v6392_v32, %v7773_v28  ;;  %v4800_v50 = vpop.f32.mrb[169].mxu1 }
 0x5af   : > { %v4801_v56 = vadd.f32 %v7773_v28, %v4800_v50  ;;  %v6393_v3 = vpop.f32.mrb[170].mxu1 }
 0x5b0   : > { %v4929_v0 = vmul.f32 0.01, %v4809_v19  ;;  %v4812_v58 = vadd.f32 %v6393_v3, %v7773_v28  ;;  %v4803_v42 = vpop.f32.mrb[171].mxu1 }
 0x5b1   : > { %v4927_v55 = vmul.f32 0.01, %v4801_v56  ;;  %v4804_v59 = vadd.f32 %v7773_v28, %v4803_v42 }
 0x5b2   : > { %v4930_v37 = vmul.f32 0.01, %v4812_v58  ;;  %v4961_v24 = vmax.f32 %v4809_v19, %v4929_v0 }
 0x5b3   : > { %v4928_v30 = vmul.f32 0.01, %v4804_v59  ;;  %v4959_v13 = vmax.f32 %v4801_v56, %v4927_v55 }
 0x5b4   : > { %v4962_v25 = vmax.f32 %v4812_v58, %v4930_v37 }
 0x5b5   : > { %v4960_v26 = vmax.f32 %v4804_v59, %v4928_v30 }
 0x5b6   : > { %v4997_v46 = vpack.c.bf16 %v4962_v25, %v4961_v24 }
 0x5b7   : > { %v4996_v43 = vpack.c.bf16 %v4960_v26, %v4959_v13 }
 0x5b9   : > { %6426 = vmatprep.mubr.msk.bf16.mxu1 %vm442_vm0, %v4996_v43 }
 0x5ba   : > { %6427 = vmatmul.mubr.msk.bf16.vlgmr.msra.gmra.mrb[200].mxu1 %vm442_vm0, %v4997_v46 }
 0x5cb   : > { %v6396_v7 = vpop.f32.mrb[172].mxu1 }
 0x5cc   : > { %v4825_v15 = vadd.f32 %v6396_v7, %v7773_v28  ;;  %v4816_v6 = vpop.f32.mrb[173].mxu1 }
 0x5cd   : > { %v4817_v52 = vadd.f32 %v7773_v28, %v4816_v6  ;;  %v6397_v8 = vpop.f32.mrb[174].mxu1 }
 0x5ce   : > { %v4933_v53 = vmul.f32 0.01, %v4825_v15  ;;  %v4828_v60 = vadd.f32 %v6397_v8, %v7773_v28  ;;  %v4819_v22 = vpop.f32.mrb[175].mxu1 }
 0x5cf   : > { %v4931_v51 = vmul.f32 0.01, %v4817_v52  ;;  %v4820_v16 = vadd.f32 %v7773_v28, %v4819_v22 }
 0x5d0   : > { %v4934_v9 = vmul.f32 0.01, %v4828_v60  ;;  %v4965_v31 = vmax.f32 %v4825_v15, %v4933_v53 }
 0x5d1   : > { %v4932_v35 = vmul.f32 0.01, %v4820_v16  ;;  %v4963_v18 = vmax.f32 %v4817_v52, %v4931_v51 }
 0x5d2   : > { %v4966_v44 = vmax.f32 %v4828_v60, %v4934_v9 }
 0x5d3   : > { %v4964_v38 = vmax.f32 %v4820_v16, %v4932_v35 }
 0x5d4   : > { %v4999_v62 = vpack.c.bf16 %v4966_v44, %v4965_v31 }
 0x5d5   : > { %v4998_v33 = vpack.c.bf16 %v4964_v38, %v4963_v18 }
 0x5d7   : > { %6430 = vmatprep.mubr.msk.bf16.mxu1 %vm442_vm0, %v4998_v33 }
 0x5d8   : > { %6431 = vmatmul.mubr.msk.bf16.gmra.mrb[204].mxu1 %vm442_vm0, %v4999_v62 }
 0x5db   : > { %v6400_v5 = vpop.f32.mrb[176].mxu1 }
 0x5dc   : > { %v4841_v29 = vadd.f32 %v6400_v5, %v7773_v28  ;;  %v4832_v54 = vpop.f32.mrb[177].mxu1 }
 0x5dd   : > { %v4833_v45 = vadd.f32 %v7773_v28, %v4832_v54  ;;  %v6401_v36 = vpop.f32.mrb[178].mxu1 }
 0x5de   : > { %v4937_v40 = vmul.f32 0.01, %v4841_v29  ;;  %v4844_v20 = vadd.f32 %v6401_v36, %v7773_v28  ;;  %v4835_v63 = vpop.f32.mrb[179].mxu1 }
 0x5df   : > { %v4935_v21 = vmul.f32 0.01, %v4833_v45  ;;  %v4836_v48 = vadd.f32 %v7773_v28, %v4835_v63 }
 0x5e0   : > { %v4938_v1 = vmul.f32 0.01, %v4844_v20  ;;  %v4969_v17 = vmax.f32 %v4841_v29, %v4937_v40 }
 0x5e1   : > { %v4936_v14 = vmul.f32 0.01, %v4836_v48  ;;  %v4967_v10 = vmax.f32 %v4833_v45, %v4935_v21 }
 0x5e2   : > { %v4970_v57 = vmax.f32 %v4844_v20, %v4938_v1 }
 0x5e3   : > { %v4968_v23 = vmax.f32 %v4836_v48, %v4936_v14 }
 0x5e4   : > { %v5001_v27 = vpack.c.bf16 %v4970_v57, %v4969_v17 }
 0x5e5   : > { %v5000_v41 = vpack.c.bf16 %v4968_v23, %v4967_v10 }
 0x5e7   : > { %6434 = vmatprep.mubr.msk.bf16.mxu1 %vm442_vm0, %v5000_v41 }
 0x5e8   : > { %6435 = vmatmul.mubr.msk.bf16.gmra.mrb[208].mxu1 %vm442_vm0, %v5001_v27 }
 0x5eb   : > { %v6404_v11 = vpop.f32.mrb[180].mxu1 }
 0x5ec   : > { %v4857_v39 = vadd.f32 %v6404_v11, %v7773_v28  ;;  %v4848_v34 = vpop.f32.mrb[181].mxu1 }
 0x5ed   : > { %v4849_v12 = vadd.f32 %v7773_v28, %v4848_v34  ;;  %v6405_v47 = vpop.f32.mrb[182].mxu1 }
 0x5ee   : > { %v4941_v4 = vmul.f32 0.01, %v4857_v39  ;;  %v4860_v61 = vadd.f32 %v6405_v47, %v7773_v28  ;;  %v4851_v2 = vpop.f32.mrb[183].mxu1 }
 0x5ef   : > { %v4939_v49 = vmul.f32 0.01, %v4849_v12  ;;  %v4852_v32 = vadd.f32 %v7773_v28, %v4851_v2 }
 0x5f0   : > { %v4942_v19 = vmul.f32 0.01, %v4860_v61  ;;  %v4973_v56 = vmax.f32 %v4857_v39, %v4941_v4 }
 0x5f1   : > { %v4940_v50 = vmul.f32 0.01, %v4852_v32  ;;  %v4971_v0 = vmax.f32 %v4849_v12, %v4939_v49 }
 0x5f2   : > { %v4974_v3 = vmax.f32 %v4860_v61, %v4942_v19 }
 0x5f3   : > { %v4972_v58 = vmax.f32 %v4852_v32, %v4940_v50 }
 0x5f4   : > { %v5003_v42 = vpack.c.bf16 %v4974_v3, %v4973_v56 }
 0x5f5   : > { %v5002_v55 = vpack.c.bf16 %v4972_v58, %v4971_v0 }
 0x5f7   : > { %6438 = vmatprep.mubr.msk.bf16.mxu1 %vm442_vm0, %v5002_v55 }
 0x5f8   : > { %6439 = vmatmul.mubr.msk.bf16.gmra.mrb[212].mxu1 %vm442_vm0, %v5003_v42 }
 0x5fb   : > { %v6408_v59 = vpop.f32.mrb[184].mxu1 }
 0x5fc   : > { %v4873_v37 = vadd.f32 %v6408_v59, %v7773_v28  ;;  %v4864_v30 = vpop.f32.mrb[185].mxu1 }
 0x5fd   : > { %v4865_v24 = vadd.f32 %v7773_v28, %v4864_v30  ;;  %v6409_v25 = vpop.f32.mrb[186].mxu1 }
 0x5fe   : > { %v4945_v13 = vmul.f32 0.01, %v4873_v37  ;;  %v4876_v26 = vadd.f32 %v6409_v25, %v7773_v28  ;;  %v4867_v46 = vpop.f32.mrb[187].mxu1 }
 0x5ff   : > { %v4943_v43 = vmul.f32 0.01, %v4865_v24  ;;  %v4868_v7 = vadd.f32 %v7773_v28, %v4867_v46 }
 0x600   : > { %v4946_v15 = vmul.f32 0.01, %v4876_v26  ;;  %v4977_v52 = vmax.f32 %v4873_v37, %v4945_v13 }
 0x601   : > { %v4944_v6 = vmul.f32 0.01, %v4868_v7  ;;  %v4975_v53 = vmax.f32 %v4865_v24, %v4943_v43 }
 0x602   : > { %v4978_v8 = vmax.f32 %v4876_v26, %v4946_v15 }
 0x603   : > { %v4976_v60 = vmax.f32 %v4868_v7, %v4944_v6  ;;  %v7826_v7 = vld [vmem:[%s7942_s8] ss:$0 sm:$0xff] }
 0x604   : > { %v5005_v22 = vpack.c.bf16 %v4978_v8, %v4977_v52 }
 0x605   : > { %v5004_v51 = vpack.c.bf16 %v4976_v60, %v4975_v53 }
 0x607   : > { %6442 = vmatprep.mubr.msk.bf16.mxu1 %vm442_vm0, %v5004_v51 }
 0x608   : > { %6443 = vmatmul.mubr.msk.bf16.gmra.mrb[216].mxu1 %vm442_vm0, %v5005_v22 }
 0x60b   : > { %v6412_v16 = vpop.f32.mrb[188].mxu1 }
 0x60c   : > { %v4889_v9 = vadd.f32 %v6412_v16, %v7773_v28  ;;  %v4880_v35 = vpop.f32.mrb[189].mxu1 }
 0x60d   : > { %v4881_v31 = vadd.f32 %v7773_v28, %v4880_v35  ;;  %v6413_v44 = vpop.f32.mrb[190].mxu1 }
 0x60e   : > { %v4949_v18 = vmul.f32 0.01, %v4889_v9  ;;  %v4892_v38 = vadd.f32 %v6413_v44, %v7773_v28  ;;  %v4883_v62 = vpop.f32.mrb[191].mxu1 }
 0x60f   : > { %v4947_v33 = vmul.f32 0.01, %v4881_v31  ;;  %v4884_v5 = vadd.f32 %v7773_v28, %v4883_v62 }
 0x610   : > { %v4950_v29 = vmul.f32 0.01, %v4892_v38  ;;  %v4981_v45 = vmax.f32 %v4889_v9, %v4949_v18 }
 0x611   : > { %v4948_v54 = vmul.f32 0.01, %v4884_v5  ;;  %v4979_v40 = vmax.f32 %v4881_v31, %v4947_v33 }
 0x612   : > { %v4982_v36 = vmax.f32 %v4892_v38, %v4950_v29 }
 0x613   : > { %v4980_v20 = vmax.f32 %v4884_v5, %v4948_v54 }
 0x614   : > { %v5007_v63 = vpack.c.bf16 %v4982_v36, %v4981_v45 }
 0x615   : > { %v5006_v21 = vpack.c.bf16 %v4980_v20, %v4979_v40 }
 0x617   : > { %6446 = vmatprep.mubr.msk.bf16.mxu1 %vm442_vm0, %v5006_v21 }
 0x618   : > { %6447 = vmatmul.mubr.msk.bf16.gmra.mrb[220].mxu1 %vm442_vm0, %v5007_v63 }
 0x64b   : > { %v6416_v48 = vpop.f32.mrb[192].mxu1 }
 0x64c   : > { %v4905_v1 = vadd.f32 %v6416_v48, %v7773_v28  ;;  %v4896_v14 = vpop.f32.mrb[193].mxu1 }
 0x64d   : > { %v4897_v17 = vadd.f32 %v7773_v28, %v4896_v14  ;;  %v6417_v57 = vpop.f32.mrb[194].mxu1 }
 0x64e   : > { %v4953_v10 = vmul.f32 0.01, %v4905_v1  ;;  %v4908_v23 = vadd.f32 %v6417_v57, %v7773_v28  ;;  %v4899_v27 = vpop.f32.mrb[195].mxu1 }
 0x64f   : > { %v4951_v41 = vmul.f32 0.01, %v4897_v17  ;;  %v4900_v11 = vadd.f32 %v7773_v28, %v4899_v27 }
 0x650   : > { %v4954_v39 = vmul.f32 0.01, %v4908_v23  ;;  %v4985_v12 = vmax.f32 %v4905_v1, %v4953_v10 }
 0x651   : > { %v4952_v34 = vmul.f32 0.01, %v4900_v11  ;;  %v4983_v4 = vmax.f32 %v4897_v17, %v4951_v41 }
 0x652   : > { %v4986_v47 = vmax.f32 %v4908_v23, %v4954_v39 }
 0x653   : > { %v4984_v61 = vmax.f32 %v4900_v11, %v4952_v34 }
 0x654   : > { %v5009_v2 = vpack.c.bf16 %v4986_v47, %v4985_v12 }
 0x655   : > { %v5008_v49 = vpack.c.bf16 %v4984_v61, %v4983_v4 }
 0x657   : > { %6450 = vmatprep.mubr.msk.bf16.mxu1 %vm442_vm0, %v5008_v49 }
 0x658   : > { %6451 = vmatmul.mubr.msk.bf16.gmra.mrb[224].mxu1 %vm442_vm0, %v5009_v2 }
 0x66c   : > { %v6420_v32 = vpop.f32.mrb[196].mxu1 }
 0x66d   : > { %v4921_v19 = vadd.f32 %v6420_v32, %v7773_v28  ;;  %v4912_v50 = vpop.f32.mrb[197].mxu1 }
 0x66e   : > { %v4913_v56 = vadd.f32 %v7773_v28, %v4912_v50  ;;  %v6421_v3 = vpop.f32.mrb[198].mxu1 }
 0x66f   : > { %v4957_v0 = vmul.f32 0.01, %v4921_v19  ;;  %v4924_v58 = vadd.f32 %v6421_v3, %v7773_v28  ;;  %v4915_v42 = vpop.f32.mrb[199].mxu1 }
 0x670   : > { %v4955_v55 = vmul.f32 0.01, %v4913_v56  ;;  %v4916_v59 = vadd.f32 %v7773_v28, %v4915_v42 }
 0x671   : > { %v4958_v37 = vmul.f32 0.01, %v4924_v58  ;;  %v4989_v24 = vmax.f32 %v4921_v19, %v4957_v0 }
 0x672   : > { %v4956_v30 = vmul.f32 0.01, %v4916_v59  ;;  %v4987_v13 = vmax.f32 %v4913_v56, %v4955_v55 }
 0x673   : > { %v4990_v25 = vmax.f32 %v4924_v58, %v4958_v37 }
 0x674   : > { %v4988_v26 = vmax.f32 %v4916_v59, %v4956_v30 }
 0x675   : > { %v5011_v46 = vpack.c.bf16 %v4990_v25, %v4989_v24 }
 0x676   : > { %v5010_v43 = vpack.c.bf16 %v4988_v26, %v4987_v13 }
 0x678   : > { %6454 = vmatprep.mubr.msk.bf16.mxu1 %vm442_vm0, %v5010_v43 }
 0x679   : > { %6455 = vmatmul.mubr.msk.bf16.gmra.mrb[228].mxu1 %vm442_vm0, %v5011_v46 }
 0x68d   : > { %v6428_v15 = vpop.f32.mrb[200].mxu1 }
 0x68e   : > { %v5121_v28 = vadd.f32 %v6428_v15, %v7826_v7  ;;  %v5112_v6 = vpop.f32.mrb[201].mxu1 }
 0x68f   : > { %v5113_v52 = vadd.f32 %v7826_v7, %v5112_v6  ;;  %v6429_v8 = vpop.f32.mrb[202].mxu1 }
 0x690   : > { %v5241_v53 = vmul.f32 0.01, %v5121_v28  ;;  %v5124_v60 = vadd.f32 %v6429_v8, %v7826_v7  ;;  %v5115_v22 = vpop.f32.mrb[203].mxu1 }
 0x691   : > { %v5239_v51 = vmul.f32 0.01, %v5113_v52  ;;  %v5116_v16 = vadd.f32 %v7826_v7, %v5115_v22 }
 0x692   : > { %v5273_v9 = vmax.f32 %v5121_v28, %v5241_v53  ;;  %v5242_v35 = vmul.f32 0.01, %v5124_v60 }
 0x693   : > { %v5271_v31 = vmax.f32 %v5113_v52, %v5239_v51  ;;  %v5240_v44 = vmul.f32 0.01, %v5116_v16 }
 0x694   : > { %5306 = vst.msk [vmem:[%s7836_s26 + $0x10] sm:$0xff] %vm5303_vm4, %v5273_v9  ;;  %v5274_v18 = vmax.f32 %v5124_v60, %v5242_v35 }
 0x695   : > { %5304 = vst.msk [vmem:[%s7836_s26] sm:$0xff] %vm5303_vm4, %v5271_v31  ;;  %v5272_v38 = vmax.f32 %v5116_v16, %v5240_v44 }
 0x696   : > { %5307 = vst.msk [vmem:[%s7836_s26 + $0x18] sm:$0xff] %vm5303_vm4, %v5274_v18 }
 0x697   : > { %5305 = vst.msk [vmem:[%s7836_s26 + $0x8] sm:$0xff] %vm5303_vm4, %v5272_v38 }
 0x6ab   : > { %v6432_v62 = vpop.f32.mrb[204].mxu1 }
 0x6ac   : > { %v5137_v33 = vadd.f32 %v6432_v62, %v7826_v7  ;;  %v5128_v5 = vpop.f32.mrb[205].mxu1 }
 0x6ad   : > { %v5129_v29 = vadd.f32 %v7826_v7, %v5128_v5  ;;  %v6433_v54 = vpop.f32.mrb[206].mxu1 }
 0x6ae   : > { %v5245_v45 = vmul.f32 0.01, %v5137_v33  ;;  %v5140_v36 = vadd.f32 %v6433_v54, %v7826_v7  ;;  %v5131_v40 = vpop.f32.mrb[207].mxu1 }
 0x6af   : > { %v5243_v20 = vmul.f32 0.01, %v5129_v29  ;;  %v5132_v63 = vadd.f32 %v7826_v7, %v5131_v40 }
 0x6b0   : > { %v5277_v21 = vmax.f32 %v5137_v33, %v5245_v45  ;;  %v5246_v48 = vmul.f32 0.01, %v5140_v36 }
 0x6b1   : > { %v5275_v1 = vmax.f32 %v5129_v29, %v5243_v20  ;;  %v5244_v14 = vmul.f32 0.01, %v5132_v63 }
 0x6b2   : > { %5310 = vst.msk [vmem:[%s7836_s26 + $0x30] sm:$0xff] %vm5303_vm4, %v5277_v21  ;;  %v5278_v17 = vmax.f32 %v5140_v36, %v5246_v48 }
 0x6b3   : > { %5308 = vst.msk [vmem:[%s7836_s26 + $0x20] sm:$0xff] %vm5303_vm4, %v5275_v1  ;;  %v5276_v57 = vmax.f32 %v5132_v63, %v5244_v14 }
 0x6b4   : > { %5311 = vst.msk [vmem:[%s7836_s26 + $0x38] sm:$0xff] %vm5303_vm4, %v5278_v17 }
 0x6b5   : > { %5309 = vst.msk [vmem:[%s7836_s26 + $0x28] sm:$0xff] %vm5303_vm4, %v5276_v57 }
 0x6bb   : > { %v6436_v10 = vpop.f32.mrb[208].mxu1 }
 0x6bc   : > { %v5153_v23 = vadd.f32 %v6436_v10, %v7826_v7  ;;  %v5144_v27 = vpop.f32.mrb[209].mxu1 }
 0x6bd   : > { %v5145_v41 = vadd.f32 %v7826_v7, %v5144_v27  ;;  %v6437_v11 = vpop.f32.mrb[210].mxu1 }
 0x6be   : > { %v5249_v39 = vmul.f32 0.01, %v5153_v23  ;;  %v5156_v34 = vadd.f32 %v6437_v11, %v7826_v7  ;;  %v5147_v12 = vpop.f32.mrb[211].mxu1 }
 0x6bf   : > { %v5247_v47 = vmul.f32 0.01, %v5145_v41  ;;  %v5148_v4 = vadd.f32 %v7826_v7, %v5147_v12 }
 0x6c0   : > { %v5281_v61 = vmax.f32 %v5153_v23, %v5249_v39  ;;  %v5250_v2 = vmul.f32 0.01, %v5156_v34 }
 0x6c1   : > { %v5279_v49 = vmax.f32 %v5145_v41, %v5247_v47  ;;  %v5248_v32 = vmul.f32 0.01, %v5148_v4 }
 0x6c2   : > { %5314 = vst.msk [vmem:[%s7836_s26 + $0x50] sm:$0xff] %vm5303_vm4, %v5281_v61  ;;  %v5282_v19 = vmax.f32 %v5156_v34, %v5250_v2 }
 0x6c3   : > { %5312 = vst.msk [vmem:[%s7836_s26 + $0x40] sm:$0xff] %vm5303_vm4, %v5279_v49  ;;  %v5280_v50 = vmax.f32 %v5148_v4, %v5248_v32 }
 0x6c4   : > { %5315 = vst.msk [vmem:[%s7836_s26 + $0x58] sm:$0xff] %vm5303_vm4, %v5282_v19 }
 0x6c5   : > { %5313 = vst.msk [vmem:[%s7836_s26 + $0x48] sm:$0xff] %vm5303_vm4, %v5280_v50 }
 0x6cb   : > { %v6440_v56 = vpop.f32.mrb[212].mxu1 }
 0x6cc   : > { %v5169_v3 = vadd.f32 %v6440_v56, %v7826_v7  ;;  %v5160_v0 = vpop.f32.mrb[213].mxu1 }
 0x6cd   : > { %v5161_v58 = vadd.f32 %v7826_v7, %v5160_v0  ;;  %v6441_v42 = vpop.f32.mrb[214].mxu1 }
 0x6ce   : > { %v5253_v55 = vmul.f32 0.01, %v5169_v3  ;;  %v5172_v59 = vadd.f32 %v6441_v42, %v7826_v7  ;;  %v5163_v37 = vpop.f32.mrb[215].mxu1 }
 0x6cf   : > { %v5251_v30 = vmul.f32 0.01, %v5161_v58  ;;  %v5164_v24 = vadd.f32 %v7826_v7, %v5163_v37 }
 0x6d0   : > { %v5285_v25 = vmax.f32 %v5169_v3, %v5253_v55  ;;  %v5254_v13 = vmul.f32 0.01, %v5172_v59 }
 0x6d1   : > { %v5283_v26 = vmax.f32 %v5161_v58, %v5251_v30  ;;  %v5252_v46 = vmul.f32 0.01, %v5164_v24 }
 0x6d2   : > { %5318 = vst.msk [vmem:[%s7836_s26 + $0x70] sm:$0xff] %vm5303_vm4, %v5285_v25  ;;  %v5286_v43 = vmax.f32 %v5172_v59, %v5254_v13 }
 0x6d3   : > { %5316 = vst.msk [vmem:[%s7836_s26 + $0x60] sm:$0xff] %vm5303_vm4, %v5283_v26  ;;  %v5284_v15 = vmax.f32 %v5164_v24, %v5252_v46 }
 0x6d4   : > { %5319 = vst.msk [vmem:[%s7836_s26 + $0x78] sm:$0xff] %vm5303_vm4, %v5286_v43 }
 0x6d5   : > { %5317 = vst.msk [vmem:[%s7836_s26 + $0x68] sm:$0xff] %vm5303_vm4, %v5284_v15 }
 0x6db   : > { %v6444_v28 = vpop.f32.mrb[216].mxu1 }
 0x6dc   : > { %v5185_v6 = vadd.f32 %v6444_v28, %v7826_v7  ;;  %v5176_v52 = vpop.f32.mrb[217].mxu1 }
 0x6dd   : > { %v5177_v8 = vadd.f32 %v7826_v7, %v5176_v52  ;;  %v6445_v53 = vpop.f32.mrb[218].mxu1 }
 0x6de   : > { %v5257_v60 = vmul.f32 0.01, %v5185_v6  ;;  %v5188_v22 = vadd.f32 %v6445_v53, %v7826_v7  ;;  %v5179_v51 = vpop.f32.mrb[219].mxu1 }
 0x6df   : > { %v5255_v16 = vmul.f32 0.01, %v5177_v8  ;;  %v5180_v9 = vadd.f32 %v7826_v7, %v5179_v51 }
 0x6e0   : > { %v5289_v35 = vmax.f32 %v5185_v6, %v5257_v60  ;;  %v5258_v31 = vmul.f32 0.01, %v5188_v22 }
 0x6e1   : > { %v5287_v44 = vmax.f32 %v5177_v8, %v5255_v16  ;;  %v5256_v18 = vmul.f32 0.01, %v5180_v9 }
 0x6e2   : > { %5322 = vst.msk [vmem:[%s7836_s26 + $0x90] sm:$0xff] %vm5303_vm4, %v5289_v35  ;;  %v5290_v38 = vmax.f32 %v5188_v22, %v5258_v31 }
 0x6e3   : > { %5320 = vst.msk [vmem:[%s7836_s26 + $0x80] sm:$0xff] %vm5303_vm4, %v5287_v44  ;;  %v5288_v62 = vmax.f32 %v5180_v9, %v5256_v18 }
 0x6e4   : > { %5323 = vst.msk [vmem:[%s7836_s26 + $0x98] sm:$0xff] %vm5303_vm4, %v5290_v38 }
 0x6e5   : > { %5321 = vst.msk [vmem:[%s7836_s26 + $0x88] sm:$0xff] %vm5303_vm4, %v5288_v62 }
 0x6eb   : > { %v6448_v33 = vpop.f32.mrb[220].mxu1 }
 0x6ec   : > { %v5201_v5 = vadd.f32 %v6448_v33, %v7826_v7  ;;  %v5192_v29 = vpop.f32.mrb[221].mxu1 }
 0x6ed   : > { %v5193_v54 = vadd.f32 %v7826_v7, %v5192_v29  ;;  %v6449_v45 = vpop.f32.mrb[222].mxu1 }
 0x6ee   : > { %v5261_v36 = vmul.f32 0.01, %v5201_v5  ;;  %v5204_v40 = vadd.f32 %v6449_v45, %v7826_v7  ;;  %v5195_v20 = vpop.f32.mrb[223].mxu1 }
 0x6ef   : > { %v5259_v63 = vmul.f32 0.01, %v5193_v54  ;;  %v5196_v21 = vadd.f32 %v7826_v7, %v5195_v20 }
 0x6f0   : > { %v5293_v48 = vmax.f32 %v5201_v5, %v5261_v36  ;;  %v5262_v1 = vmul.f32 0.01, %v5204_v40 }
 0x6f1   : > { %v5291_v14 = vmax.f32 %v5193_v54, %v5259_v63  ;;  %v5260_v17 = vmul.f32 0.01, %v5196_v21 }
 0x6f2   : > { %5326 = vst.msk [vmem:[%s7836_s26 + $0xb0] sm:$0xff] %vm5303_vm4, %v5293_v48  ;;  %v5294_v57 = vmax.f32 %v5204_v40, %v5262_v1 }
 0x6f3   : > { %5324 = vst.msk [vmem:[%s7836_s26 + $0xa0] sm:$0xff] %vm5303_vm4, %v5291_v14  ;;  %v5292_v10 = vmax.f32 %v5196_v21, %v5260_v17 }
 0x6f4   : > { %5327 = vst.msk [vmem:[%s7836_s26 + $0xb8] sm:$0xff] %vm5303_vm4, %v5294_v57 }
 0x6f5   : > { %5325 = vst.msk [vmem:[%s7836_s26 + $0xa8] sm:$0xff] %vm5303_vm4, %v5292_v10 }
 0x72b   : > { %v6452_v23 = vpop.f32.mrb[224].mxu1 }
 0x72c   : > { %v5217_v27 = vadd.f32 %v6452_v23, %v7826_v7  ;;  %v5208_v41 = vpop.f32.mrb[225].mxu1 }
 0x72d   : > { %v5209_v11 = vadd.f32 %v7826_v7, %v5208_v41  ;;  %v6453_v39 = vpop.f32.mrb[226].mxu1 }
 0x72e   : > { %v5265_v34 = vmul.f32 0.01, %v5217_v27  ;;  %v5220_v12 = vadd.f32 %v6453_v39, %v7826_v7  ;;  %v5211_v47 = vpop.f32.mrb[227].mxu1 }
 0x72f   : > { %v5263_v4 = vmul.f32 0.01, %v5209_v11  ;;  %v5212_v61 = vadd.f32 %v7826_v7, %v5211_v47 }
 0x730   : > { %v5297_v2 = vmax.f32 %v5217_v27, %v5265_v34  ;;  %v5266_v49 = vmul.f32 0.01, %v5220_v12 }
 0x731   : > { %v5295_v32 = vmax.f32 %v5209_v11, %v5263_v4  ;;  %v5264_v19 = vmul.f32 0.01, %v5212_v61 }
 0x732   : > { %5330 = vst.msk [vmem:[%s7836_s26 + $0xd0] sm:$0xff] %vm5303_vm4, %v5297_v2  ;;  %v5298_v50 = vmax.f32 %v5220_v12, %v5266_v49 }
 0x733   : > { %5328 = vst.msk [vmem:[%s7836_s26 + $0xc0] sm:$0xff] %vm5303_vm4, %v5295_v32  ;;  %v5296_v56 = vmax.f32 %v5212_v61, %v5264_v19 }
 0x734   : > { %5331 = vst.msk [vmem:[%s7836_s26 + $0xd8] sm:$0xff] %vm5303_vm4, %v5298_v50 }
 0x735   : > { %5329 = vst.msk [vmem:[%s7836_s26 + $0xc8] sm:$0xff] %vm5303_vm4, %v5296_v56 }
 0x74c   : > { %v6456_v3 = vpop.f32.mrb[228].mxu1 }
 0x74d   : > { %v5233_v0 = vadd.f32 %v6456_v3, %v7826_v7  ;;  %v5224_v58 = vpop.f32.mrb[229].mxu1 }
 0x74e   : > { %v5225_v42 = vadd.f32 %v7826_v7, %v5224_v58  ;;  %v6457_v55 = vpop.f32.mrb[230].mxu1 }
 0x74f   : > { %v5269_v59 = vmul.f32 0.01, %v5233_v0  ;;  %v5236_v37 = vadd.f32 %v6457_v55, %v7826_v7  ;;  %v5227_v30 = vpop.f32.mrb[231].mxu1 }
 0x750   : > { %v5267_v24 = vmul.f32 0.01, %v5225_v42  ;;  %v5228_v25 = vadd.f32 %v7826_v7, %v5227_v30 }
 0x751   : > { %v5301_v13 = vmax.f32 %v5233_v0, %v5269_v59  ;;  %v5270_v26 = vmul.f32 0.01, %v5236_v37 }
 0x752   : > { %v5299_v46 = vmax.f32 %v5225_v42, %v5267_v24  ;;  %v5268_v43 = vmul.f32 0.01, %v5228_v25 }
 0x753   : > { %5334 = vst.msk [vmem:[%s7836_s26 + $0xf0] sm:$0xff] %vm5303_vm4, %v5301_v13  ;;  %v5302_v15 = vmax.f32 %v5236_v37, %v5270_v26 }
 0x754   : > { %5332 = vst.msk [vmem:[%s7836_s26 + $0xe0] sm:$0xff] %vm5303_vm4, %v5299_v46  ;;  %v5300_v28 = vmax.f32 %v5228_v25, %v5268_v43 }
 0x755   : > { %5335 = vst.msk [vmem:[%s7836_s26 + $0xf8] sm:$0xff] %vm5303_vm4, %v5302_v15 }
 0x756   : > { %5333 = vst.msk [vmem:[%s7836_s26 + $0xe8] sm:$0xff] %vm5303_vm4, %v5300_v28 }
 0x757 PF: > { %s19_s30 = sadd.s32 1, %s6627_s30  }
 0x758   : > { %p16_p4 = scmp.ge.s32.totalorder %s19_s30, 10  }
 0x75a   :  { %18 = sbr.rel (!%p16_p4) target bundleno = 1 (0x1), region = 86 }

</bundles_post_ra>
